<compile_context>
chip_gen: v6e
topology: v6e:2x2x1
jax: 0.10.0
libtpu: 0.0.40
codegen_flags: <defaults>
</compile_context>

<pallas_src>
import functools

import jax
import jax.numpy as jnp
from jax.experimental import pallas as pl
from jax.experimental.pallas import tpu as pltpu


# ------------------------------ Pallas kernel -------------------------------


def _layernorm(y, g, b, eps=1e-12):
    mean = jnp.mean(y, axis=-1, keepdims=True)
    cen = y - mean
    var = jnp.mean(cen * cen, axis=-1, keepdims=True)
    return cen * jax.lax.rsqrt(var + eps) * g + b


def _gelu(y):
    # tanh-approximation GELU (BERT-style "gelu_new"); exact erf differs ~1e-3.
    return 0.5 * y * (1.0 + jnp.tanh(0.7978845608028654
                                     * (y + 0.044715 * y * y * y)))


def _bert_mc_kernel(x_ref, mask_ref, emb_g_ref, emb_b_ref,
                    wq_ref, bq_ref, wk_ref, bk_ref, wv_ref, bv_ref,
                    wo_ref, bo_ref, ln1_g_ref, ln1_b_ref,
                    w1_ref, b1_ref, w2_ref, b2_ref, ln2_g_ref, ln2_b_ref,
                    pool_w_ref, pool_b_ref, cls_w_ref, cls_b_ref,
                    logits_ref, x_scr,
                    *, num_layers, num_heads, b4, seq, scale):
    hidden = x_ref.shape[-1]

    # Embedding LayerNorm (no zeros-residual buffer needed).
    x = _layernorm(x_ref[...].astype(jnp.float32), emb_g_ref[...], emb_b_ref[...])
    mask = mask_ref[...]                                   # (B4, 1, S) additive bias

    for l in range(num_layers):                            # static unroll
        # ---------------- self-attention (per-head weight blocks) ----------------
        attn = jnp.zeros((b4 * seq, hidden), dtype=jnp.float32)
        for h in range(num_heads):                         # static unroll
            q = jnp.dot(x, wq_ref[l, h],
                        preferred_element_type=jnp.float32) + bq_ref[l, h]
            k = jnp.dot(x, wk_ref[l, h],
                        preferred_element_type=jnp.float32) + bk_ref[l, h]
            v = jnp.dot(x, wv_ref[l, h],
                        preferred_element_type=jnp.float32) + bv_ref[l, h]
            dh = q.shape[-1]
            q = q.reshape(b4, seq, dh)
            k = k.reshape(b4, seq, dh)
            v = v.reshape(b4, seq, dh)
            # batched QK^T via dot_general contracting last dims (no explicit .T)
            s = jnp.einsum("bqd,bkd->bqk", q, k,
                           preferred_element_type=jnp.float32) * scale + mask
            s = s - jnp.max(s, axis=-1, keepdims=True)
            p = jnp.exp(s)
            p = p * pl.reciprocal(jnp.sum(p, axis=-1, keepdims=True), approx=True)
            ctx = jnp.einsum("bqk,bkd->bqd", p, v,
                             preferred_element_type=jnp.float32)
            # head merge done implicitly by summing per-head output projections
            attn = attn + jnp.dot(ctx.reshape(b4 * seq, dh), wo_ref[l, h],
                                  preferred_element_type=jnp.float32)
        attn = attn + bo_ref[l]
        x = _layernorm(attn + x, ln1_g_ref[l], ln1_b_ref[l])

        # ------------------------------ feed-forward -----------------------------
        hmid = _gelu(jnp.dot(x, w1_ref[l],
                             preferred_element_type=jnp.float32) + b1_ref[l])
        ffo = jnp.dot(hmid, w2_ref[l],
                      preferred_element_type=jnp.float32) + b2_ref[l]
        x = _layernorm(ffo + x, ln2_g_ref[l], ln2_b_ref[l])

    # ---------------- pooler (CLS token) + classifier, fused in-kernel -----------
    x_scr[...] = x
    cls = x_scr[pl.ds(0, b4, stride=seq), :]               # rows 0, S, 2S, ... -> (B4, H)
    pooled = jnp.tanh(jnp.dot(cls, pool_w_ref[...],
                              preferred_element_type=jnp.float32) + pool_b_ref[...])
    # dropout: eval/inference mode -> identity.
    # classifier (H -> 1) as an elementwise multiply + lane reduction.
    logits = jnp.sum(pooled * cls_w_ref[...], axis=-1, keepdims=True) + cls_b_ref[...]
    logits_ref[...] = logits.astype(logits_ref.dtype)


def _full_spec(a):
    zeros = (0,) * a.ndim
    return pl.BlockSpec(a.shape, lambda i, _z=zeros: _z)


# ----------------------------- parameter setup ------------------------------


def init_params(key, *, vocab=128, hidden=32, heads=2, inter=64, n_layers=2,
                max_pos=16, type_vocab=2):
    keys = iter(jax.random.split(key, 24))

    def nrm(shape):
        return 0.02 * jax.random.normal(next(keys), shape, dtype=jnp.float32)

    L, H, I = n_layers, hidden, inter
    return {
        "num_heads": heads,
        "word_emb": nrm((vocab, H)),
        "pos_emb": nrm((max_pos, H)),
        "type_emb": nrm((type_vocab, H)),
        "emb_ln_g": jnp.ones((H,), jnp.float32),
        "emb_ln_b": jnp.zeros((H,), jnp.float32),
        "wq": nrm((L, H, H)), "bq": jnp.zeros((L, H), jnp.float32),
        "wk": nrm((L, H, H)), "bk": jnp.zeros((L, H), jnp.float32),
        "wv": nrm((L, H, H)), "bv": jnp.zeros((L, H), jnp.float32),
        "wo": nrm((L, H, H)), "bo": jnp.zeros((L, H), jnp.float32),
        "ln1_g": jnp.ones((L, H), jnp.float32),
        "ln1_b": jnp.zeros((L, H), jnp.float32),
        "w1": nrm((L, H, I)), "b1": jnp.zeros((L, I), jnp.float32),
        "w2": nrm((L, I, H)), "b2": jnp.zeros((L, H), jnp.float32),
        "ln2_g": jnp.ones((L, H), jnp.float32),
        "ln2_b": jnp.zeros((L, H), jnp.float32),
        "pool_w": nrm((H, H)), "pool_b": jnp.zeros((H,), jnp.float32),
        "cls_w": nrm((H, 1)), "cls_b": jnp.zeros((1,), jnp.float32),
    }


# ------------------------------- forward pass --------------------------------


def model_forward(params, input_ids, token_type_ids, attention_mask, labels=None):
    B, C, S = input_ids.shape                       # (batch, num_choices, seq)
    input_ids = input_ids.reshape(-1, S)            # (B*C, S)
    token_type_ids = token_type_ids.reshape(-1, S)
    attention_mask = attention_mask.reshape(-1, S)
    B4 = input_ids.shape[0]
    H = params["word_emb"].shape[1]
    heads = params["num_heads"]
    Dh = H // heads
    L = params["wq"].shape[0]
    I = params["w1"].shape[-1]
    scale = 1.0 / float(Dh) ** 0.5

    # --- embeddings (table gathers are plain-JAX glue; LN happens in-kernel) ---
    pos_ids = jnp.arange(S)
    x = (params["word_emb"][input_ids]
         + params["pos_emb"][pos_ids][None, :, :]
         + params["type_emb"][token_type_ids]).astype(jnp.float32)
    x = x.reshape(B4 * S, H)

    # additive attention-mask bias: (B4, 1, S), broadcast over heads & queries in-kernel
    mask_bias = ((1.0 - attention_mask.astype(jnp.float32)) * -1e9).reshape(B4, 1, S)

    # Pre-arrange weights per head so the kernel never slices the lane dim.
    wq = params["wq"].reshape(L, H, heads, Dh).transpose(0, 2, 1, 3)   # (L, h, H, Dh)
    wk = params["wk"].reshape(L, H, heads, Dh).transpose(0, 2, 1, 3)
    wv = params["wv"].reshape(L, H, heads, Dh).transpose(0, 2, 1, 3)
    bq = params["bq"].reshape(L, heads, 1, Dh)
    bk = params["bk"].reshape(L, heads, 1, Dh)
    bv = params["bv"].reshape(L, heads, 1, Dh)
    wo = params["wo"].reshape(L, heads, Dh, H)                          # (L, h, Dh, H)
    bo = params["bo"].reshape(L, 1, H)
    ln1_g = params["ln1_g"].reshape(L, 1, H)
    ln1_b = params["ln1_b"].reshape(L, 1, H)
    w1 = params["w1"]
    b1 = params["b1"].reshape(L, 1, I)
    w2 = params["w2"]
    b2 = params["b2"].reshape(L, 1, H)
    ln2_g = params["ln2_g"].reshape(L, 1, H)
    ln2_b = params["ln2_b"].reshape(L, 1, H)
    emb_g = params["emb_ln_g"].reshape(1, H)
    emb_b = params["emb_ln_b"].reshape(1, H)
    pool_w = params["pool_w"]
    pool_b = params["pool_b"].reshape(1, H)
    cls_w_row = params["cls_w"].reshape(1, H)      # (H,1) -> row vector
    cls_b = params["cls_b"].reshape(1, 1)

    inputs = (x, mask_bias, emb_g, emb_b,
              wq, bq, wk, bk, wv, bv, wo, bo, ln1_g, ln1_b,
              w1, b1, w2, b2, ln2_g, ln2_b,
              pool_w, pool_b, cls_w_row, cls_b)

    kernel = functools.partial(_bert_mc_kernel, num_layers=L, num_heads=heads,
                               b4=B4, seq=S, scale=scale)

    logits = pl.pallas_call(
        kernel,
        out_shape=jax.ShapeDtypeStruct((B4, 1), jnp.float32),
        grid=(1,),
        in_specs=[_full_spec(a) for a in inputs],
        out_specs=pl.BlockSpec((B4, 1), lambda i: (0, 0)),
        scratch_shapes=[pltpu.VMEM((B4 * S, H), jnp.float32)],
        compiler_params=pltpu.CompilerParams(
            dimension_semantics=("arbitrary",)),
    )(*inputs)

    logits = logits.reshape(-1, 4)                  # (B, 4)

    if labels is not None:
        labels = labels.reshape(-1)
        logp = jax.nn.log_softmax(logits, axis=-1)
        loss = -jnp.mean(jnp.take_along_axis(logp, labels[:, None], axis=-1))
        return loss, logits
    return logits


# ----------------------------------- main ------------------------------------

if __name__ == "__main__":
    B, C, S = 2, 4, 8     # batch, num_choices (fixed at 4 by the module), seq_len
    key = jax.random.PRNGKey(0)
    pkey, ikey = jax.random.split(key)

    params = init_params(pkey, vocab=128, hidden=32, heads=2, inter=64,
                         n_layers=2, max_pos=S)

    input_ids = jax.random.randint(ikey, (B, C, S), 0, 128, dtype=jnp.int32)
    token_type_ids = jnp.zeros((B, C, S), dtype=jnp.int32)
    attention_mask = jnp.ones((B, C, S), dtype=jnp.int32)

    logits = model_forward(params, input_ids, token_type_ids, attention_mask)
    logits = jax.block_until_ready(logits)
    assert logits.shape == (B, C) and logits.dtype == jnp.float32
    print("KERNEL_OK")
</pallas_src>

<mosaic_0001>
module attributes {stable_mosaic.version = 11 : i64} {
  func.func @_bert_mc_kernel(%arg0: i32, %arg1: memref<64x32xf32, #tpu.memory_space<vmem>>, %arg2: memref<8x1x8xf32, #tpu.memory_space<vmem>>, %arg3: memref<1x32xf32, #tpu.memory_space<vmem>>, %arg4: memref<1x32xf32, #tpu.memory_space<vmem>>, %arg5: memref<2x2x32x16xf32, #tpu.memory_space<vmem>>, %arg6: memref<2x2x1x16xf32, #tpu.memory_space<vmem>>, %arg7: memref<2x2x32x16xf32, #tpu.memory_space<vmem>>, %arg8: memref<2x2x1x16xf32, #tpu.memory_space<vmem>>, %arg9: memref<2x2x32x16xf32, #tpu.memory_space<vmem>>, %arg10: memref<2x2x1x16xf32, #tpu.memory_space<vmem>>, %arg11: memref<2x2x16x32xf32, #tpu.memory_space<vmem>>, %arg12: memref<2x1x32xf32, #tpu.memory_space<vmem>>, %arg13: memref<2x1x32xf32, #tpu.memory_space<vmem>>, %arg14: memref<2x1x32xf32, #tpu.memory_space<vmem>>, %arg15: memref<2x32x64xf32, #tpu.memory_space<vmem>>, %arg16: memref<2x1x64xf32, #tpu.memory_space<vmem>>, %arg17: memref<2x64x32xf32, #tpu.memory_space<vmem>>, %arg18: memref<2x1x32xf32, #tpu.memory_space<vmem>>, %arg19: memref<2x1x32xf32, #tpu.memory_space<vmem>>, %arg20: memref<2x1x32xf32, #tpu.memory_space<vmem>>, %arg21: memref<32x32xf32, #tpu.memory_space<vmem>>, %arg22: memref<1x32xf32, #tpu.memory_space<vmem>>, %arg23: memref<1x32xf32, #tpu.memory_space<vmem>>, %arg24: memref<1x1xf32, #tpu.memory_space<vmem>>, %arg25: memref<8x1xf32, #tpu.memory_space<vmem>>, %arg26: memref<64x32xf32, #tpu.memory_space<vmem>>) attributes {dimension_semantics = [#tpu.dimension_semantics<arbitrary>], iteration_bounds = array<i64: 1>, scalar_prefetch = 0 : i64, scratch_operands = 1 : i64, tpu.core_type = #tpu.core_type<tc>, window_params = [{pipeline_mode = #tpu.pipeline_mode<synchronous>, transform_indices = @transform_0, window_bounds = array<i64: 64, 32>}, {pipeline_mode = #tpu.pipeline_mode<synchronous>, transform_indices = @transform_1, window_bounds = array<i64: 8, 1, 8>}, {pipeline_mode = #tpu.pipeline_mode<synchronous>, transform_indices = @transform_2, window_bounds = array<i64: 1, 32>}, {pipeline_mode = #tpu.pipeline_mode<synchronous>, transform_indices = @transform_3, window_bounds = array<i64: 1, 32>}, {pipeline_mode = #tpu.pipeline_mode<synchronous>, transform_indices = @transform_4, window_bounds = array<i64: 2, 2, 32, 16>}, {pipeline_mode = #tpu.pipeline_mode<synchronous>, transform_indices = @transform_5, window_bounds = array<i64: 2, 2, 1, 16>}, {pipeline_mode = #tpu.pipeline_mode<synchronous>, transform_indices = @transform_6, window_bounds = array<i64: 2, 2, 32, 16>}, {pipeline_mode = #tpu.pipeline_mode<synchronous>, transform_indices = @transform_7, window_bounds = array<i64: 2, 2, 1, 16>}, {pipeline_mode = #tpu.pipeline_mode<synchronous>, transform_indices = @transform_8, window_bounds = array<i64: 2, 2, 32, 16>}, {pipeline_mode = #tpu.pipeline_mode<synchronous>, transform_indices = @transform_9, window_bounds = array<i64: 2, 2, 1, 16>}, {pipeline_mode = #tpu.pipeline_mode<synchronous>, transform_indices = @transform_10, window_bounds = array<i64: 2, 2, 16, 32>}, {pipeline_mode = #tpu.pipeline_mode<synchronous>, transform_indices = @transform_11, window_bounds = array<i64: 2, 1, 32>}, {pipeline_mode = #tpu.pipeline_mode<synchronous>, transform_indices = @transform_12, window_bounds = array<i64: 2, 1, 32>}, {pipeline_mode = #tpu.pipeline_mode<synchronous>, transform_indices = @transform_13, window_bounds = array<i64: 2, 1, 32>}, {pipeline_mode = #tpu.pipeline_mode<synchronous>, transform_indices = @transform_14, window_bounds = array<i64: 2, 32, 64>}, {pipeline_mode = #tpu.pipeline_mode<synchronous>, transform_indices = @transform_15, window_bounds = array<i64: 2, 1, 64>}, {pipeline_mode = #tpu.pipeline_mode<synchronous>, transform_indices = @transform_16, window_bounds = array<i64: 2, 64, 32>}, {pipeline_mode = #tpu.pipeline_mode<synchronous>, transform_indices = @transform_17, window_bounds = array<i64: 2, 1, 32>}, {pipeline_mode = #tpu.pipeline_mode<synchronous>, transform_indices = @transform_18, window_bounds = array<i64: 2, 1, 32>}, {pipeline_mode = #tpu.pipeline_mode<synchronous>, transform_indices = @transform_19, window_bounds = array<i64: 2, 1, 32>}, {pipeline_mode = #tpu.pipeline_mode<synchronous>, transform_indices = @transform_20, window_bounds = array<i64: 32, 32>}, {pipeline_mode = #tpu.pipeline_mode<synchronous>, transform_indices = @transform_21, window_bounds = array<i64: 1, 32>}, {pipeline_mode = #tpu.pipeline_mode<synchronous>, transform_indices = @transform_22, window_bounds = array<i64: 1, 32>}, {pipeline_mode = #tpu.pipeline_mode<synchronous>, transform_indices = @transform_23, window_bounds = array<i64: 1, 1>}, {pipeline_mode = #tpu.pipeline_mode<synchronous>, transform_indices = @transform_24, window_bounds = array<i64: 8, 1>}]} {
    %c0 = arith.constant 0 : index
    %c0_0 = arith.constant 0 : index
    %0 = vector.load %arg1[%c0, %c0_0] : memref<64x32xf32, #tpu.memory_space<vmem>>, vector<64x32xf32>
    %c0_1 = arith.constant 0 : index
    %c0_2 = arith.constant 0 : index
    %1 = vector.load %arg3[%c0_1, %c0_2] : memref<1x32xf32, #tpu.memory_space<vmem>>, vector<1x32xf32>
    %c0_3 = arith.constant 0 : index
    %c0_4 = arith.constant 0 : index
    %2 = vector.load %arg4[%c0_3, %c0_4] : memref<1x32xf32, #tpu.memory_space<vmem>>, vector<1x32xf32>
    %cst = arith.constant dense<0.000000e+00> : vector<64xf32>
    %3 = vector.multi_reduction <add>, %0, %cst [1] : vector<64x32xf32> to vector<64xf32>
    %4 = vector.shape_cast %3 : vector<64xf32> to vector<64x1xf32>
    %cst_5 = arith.constant 3.200000e+01 : f32
    %5 = vector.broadcast %cst_5 : f32 to vector<64x1xf32>
    %6 = arith.divf %4, %5 : vector<64x1xf32>
    %7 = vector.broadcast %6 : vector<64x1xf32> to vector<64x32xf32>
    %8 = arith.subf %0, %7 : vector<64x32xf32>
    %9 = arith.mulf %8, %8 : vector<64x32xf32>
    %cst_6 = arith.constant dense<0.000000e+00> : vector<64xf32>
    %10 = vector.multi_reduction <add>, %9, %cst_6 [1] : vector<64x32xf32> to vector<64xf32>
    %11 = vector.shape_cast %10 : vector<64xf32> to vector<64x1xf32>
    %cst_7 = arith.constant 3.200000e+01 : f32
    %12 = vector.broadcast %cst_7 : f32 to vector<64x1xf32>
    %13 = arith.divf %11, %12 : vector<64x1xf32>
    %cst_8 = arith.constant 9.99999996E-13 : f32
    %14 = vector.broadcast %cst_8 : f32 to vector<64x1xf32>
    %15 = arith.addf %13, %14 : vector<64x1xf32>
    %16 = math.rsqrt %15 : vector<64x1xf32>
    %17 = vector.broadcast %16 : vector<64x1xf32> to vector<64x32xf32>
    %18 = arith.mulf %8, %17 : vector<64x32xf32>
    %19 = vector.broadcast %1 : vector<1x32xf32> to vector<64x32xf32>
    %20 = arith.mulf %18, %19 : vector<64x32xf32>
    %21 = vector.broadcast %2 : vector<1x32xf32> to vector<64x32xf32>
    %22 = arith.addf %20, %21 : vector<64x32xf32>
    %c0_9 = arith.constant 0 : index
    %c0_10 = arith.constant 0 : index
    %c0_11 = arith.constant 0 : index
    %23 = vector.load %arg2[%c0_9, %c0_10, %c0_11] : memref<8x1x8xf32, #tpu.memory_space<vmem>>, vector<8x1x8xf32>
    %cst_12 = arith.constant 0.000000e+00 : f32
    %24 = vector.broadcast %cst_12 : f32 to vector<64x32xf32>
    %c0_13 = arith.constant 0 : index
    %c0_14 = arith.constant 0 : index
    %c0_15 = arith.constant 0 : index
    %c0_16 = arith.constant 0 : index
    %25 = vector.load %arg5[%c0_13, %c0_14, %c0_15, %c0_16] : memref<2x2x32x16xf32, #tpu.memory_space<vmem>>, vector<1x1x32x16xf32>
    %26 = vector.shape_cast %25 : vector<1x1x32x16xf32> to vector<32x16xf32>
    %cst_17 = arith.constant dense<0.000000e+00> : vector<64x16xf32>
    %27 = tpu.matmul %22, %26, %cst_17 {dimension_numbers = #tpu.dot_dimension_numbers<[1], [0], [0], [1], [0, 0, 1, 1], [], []>} : vector<64x32xf32>, vector<32x16xf32>, vector<64x16xf32> -> vector<64x16xf32>
    %c0_18 = arith.constant 0 : index
    %c0_19 = arith.constant 0 : index
    %c0_20 = arith.constant 0 : index
    %c0_21 = arith.constant 0 : index
    %28 = vector.load %arg6[%c0_18, %c0_19, %c0_20, %c0_21] : memref<2x2x1x16xf32, #tpu.memory_space<vmem>>, vector<1x1x1x16xf32>
    %29 = vector.shape_cast %28 : vector<1x1x1x16xf32> to vector<1x16xf32>
    %30 = vector.broadcast %29 : vector<1x16xf32> to vector<64x16xf32>
    %31 = arith.addf %27, %30 : vector<64x16xf32>
    %c0_22 = arith.constant 0 : index
    %c0_23 = arith.constant 0 : index
    %c0_24 = arith.constant 0 : index
    %c0_25 = arith.constant 0 : index
    %32 = vector.load %arg7[%c0_22, %c0_23, %c0_24, %c0_25] : memref<2x2x32x16xf32, #tpu.memory_space<vmem>>, vector<1x1x32x16xf32>
    %33 = vector.shape_cast %32 : vector<1x1x32x16xf32> to vector<32x16xf32>
    %cst_26 = arith.constant dense<0.000000e+00> : vector<64x16xf32>
    %34 = tpu.matmul %22, %33, %cst_26 {dimension_numbers = #tpu.dot_dimension_numbers<[1], [0], [0], [1], [0, 0, 1, 1], [], []>} : vector<64x32xf32>, vector<32x16xf32>, vector<64x16xf32> -> vector<64x16xf32>
    %c0_27 = arith.constant 0 : index
    %c0_28 = arith.constant 0 : index
    %c0_29 = arith.constant 0 : index
    %c0_30 = arith.constant 0 : index
    %35 = vector.load %arg8[%c0_27, %c0_28, %c0_29, %c0_30] : memref<2x2x1x16xf32, #tpu.memory_space<vmem>>, vector<1x1x1x16xf32>
    %36 = vector.shape_cast %35 : vector<1x1x1x16xf32> to vector<1x16xf32>
    %37 = vector.broadcast %36 : vector<1x16xf32> to vector<64x16xf32>
    %38 = arith.addf %34, %37 : vector<64x16xf32>
    %c0_31 = arith.constant 0 : index
    %c0_32 = arith.constant 0 : index
    %c0_33 = arith.constant 0 : index
    %c0_34 = arith.constant 0 : index
    %39 = vector.load %arg9[%c0_31, %c0_32, %c0_33, %c0_34] : memref<2x2x32x16xf32, #tpu.memory_space<vmem>>, vector<1x1x32x16xf32>
    %40 = vector.shape_cast %39 : vector<1x1x32x16xf32> to vector<32x16xf32>
    %cst_35 = arith.constant dense<0.000000e+00> : vector<64x16xf32>
    %41 = tpu.matmul %22, %40, %cst_35 {dimension_numbers = #tpu.dot_dimension_numbers<[1], [0], [0], [1], [0, 0, 1, 1], [], []>} : vector<64x32xf32>, vector<32x16xf32>, vector<64x16xf32> -> vector<64x16xf32>
    %c0_36 = arith.constant 0 : index
    %c0_37 = arith.constant 0 : index
    %c0_38 = arith.constant 0 : index
    %c0_39 = arith.constant 0 : index
    %42 = vector.load %arg10[%c0_36, %c0_37, %c0_38, %c0_39] : memref<2x2x1x16xf32, #tpu.memory_space<vmem>>, vector<1x1x1x16xf32>
    %43 = vector.shape_cast %42 : vector<1x1x1x16xf32> to vector<1x16xf32>
    %44 = vector.broadcast %43 : vector<1x16xf32> to vector<64x16xf32>
    %45 = arith.addf %41, %44 : vector<64x16xf32>
    %46 = vector.shape_cast %31 : vector<64x16xf32> to vector<8x8x16xf32>
    %47 = vector.shape_cast %38 : vector<64x16xf32> to vector<8x8x16xf32>
    %48 = vector.shape_cast %45 : vector<64x16xf32> to vector<8x8x16xf32>
    "tpu.trace_start"() <{level = 10 : i32, message = "bqd,bkd->bqk"}> : () -> ()
    %cst_40 = arith.constant dense<0.000000e+00> : vector<8x8x8xf32>
    %49 = tpu.matmul %46, %47, %cst_40 {dimension_numbers = #tpu.dot_dimension_numbers<[2], [2], [1], [1], [0, 0, 0, 1, 1, 1], [0], [0]>} : vector<8x8x16xf32>, vector<8x8x16xf32>, vector<8x8x8xf32> -> vector<8x8x8xf32>
    "tpu.trace_stop"() : () -> ()
    %cst_41 = arith.constant 2.500000e-01 : f32
    %50 = vector.broadcast %cst_41 : f32 to vector<8x8x8xf32>
    %51 = arith.mulf %49, %50 : vector<8x8x8xf32>
    %52 = vector.broadcast %23 : vector<8x1x8xf32> to vector<8x8x8xf32>
    %53 = arith.addf %51, %52 : vector<8x8x8xf32>
    %cst_42 = arith.constant dense<0xFF800000> : vector<8x8xf32>
    %54 = vector.multi_reduction <maximumf>, %53, %cst_42 [2] : vector<8x8x8xf32> to vector<8x8xf32>
    %55 = vector.shape_cast %54 : vector<8x8xf32> to vector<8x8x1xf32>
    %56 = vector.broadcast %55 : vector<8x8x1xf32> to vector<8x8x8xf32>
    %57 = arith.subf %53, %56 : vector<8x8x8xf32>
    %58 = math.exp %57 : vector<8x8x8xf32>
    %cst_43 = arith.constant dense<0.000000e+00> : vector<8x8xf32>
    %59 = vector.multi_reduction <add>, %58, %cst_43 [2] : vector<8x8x8xf32> to vector<8x8xf32>
    %60 = vector.shape_cast %59 : vector<8x8xf32> to vector<8x8x1xf32>
    %61 = tpu.reciprocal %60 {approx = true} : vector<8x8x1xf32> -> vector<8x8x1xf32>
    %62 = vector.broadcast %61 : vector<8x8x1xf32> to vector<8x8x8xf32>
    %63 = arith.mulf %58, %62 : vector<8x8x8xf32>
    "tpu.trace_start"() <{level = 10 : i32, message = "bqk,bkd->bqd"}> : () -> ()
    %cst_44 = arith.constant dense<0.000000e+00> : vector<8x8x16xf32>
    %64 = tpu.matmul %63, %48, %cst_44 {dimension_numbers = #tpu.dot_dimension_numbers<[2], [1], [1], [2], [0, 0, 0, 1, 1, 2], [0], [0]>} : vector<8x8x8xf32>, vector<8x8x16xf32>, vector<8x8x16xf32> -> vector<8x8x16xf32>
    "tpu.trace_stop"() : () -> ()
    %65 = vector.shape_cast %64 : vector<8x8x16xf32> to vector<64x16xf32>
    %c0_45 = arith.constant 0 : index
    %c0_46 = arith.constant 0 : index
    %c0_47 = arith.constant 0 : index
    %c0_48 = arith.constant 0 : index
    %66 = vector.load %arg11[%c0_45, %c0_46, %c0_47, %c0_48] : memref<2x2x16x32xf32, #tpu.memory_space<vmem>>, vector<1x1x16x32xf32>
    %67 = vector.shape_cast %66 : vector<1x1x16x32xf32> to vector<16x32xf32>
    %cst_49 = arith.constant dense<0.000000e+00> : vector<64x32xf32>
    %68 = tpu.matmul %65, %67, %cst_49 {dimension_numbers = #tpu.dot_dimension_numbers<[1], [0], [0], [1], [0, 0, 1, 1], [], []>} : vector<64x16xf32>, vector<16x32xf32>, vector<64x32xf32> -> vector<64x32xf32>
    %69 = arith.addf %24, %68 : vector<64x32xf32>
    %c0_50 = arith.constant 0 : index
    %c1 = arith.constant 1 : index
    %c0_51 = arith.constant 0 : index
    %c0_52 = arith.constant 0 : index
    %70 = vector.load %arg5[%c0_50, %c1, %c0_51, %c0_52] : memref<2x2x32x16xf32, #tpu.memory_space<vmem>>, vector<1x1x32x16xf32>
    %71 = vector.shape_cast %70 : vector<1x1x32x16xf32> to vector<32x16xf32>
    %cst_53 = arith.constant dense<0.000000e+00> : vector<64x16xf32>
    %72 = tpu.matmul %22, %71, %cst_53 {dimension_numbers = #tpu.dot_dimension_numbers<[1], [0], [0], [1], [0, 0, 1, 1], [], []>} : vector<64x32xf32>, vector<32x16xf32>, vector<64x16xf32> -> vector<64x16xf32>
    %c0_54 = arith.constant 0 : index
    %c1_55 = arith.constant 1 : index
    %c0_56 = arith.constant 0 : index
    %c0_57 = arith.constant 0 : index
    %73 = vector.load %arg6[%c0_54, %c1_55, %c0_56, %c0_57] : memref<2x2x1x16xf32, #tpu.memory_space<vmem>>, vector<1x1x1x16xf32>
    %74 = vector.shape_cast %73 : vector<1x1x1x16xf32> to vector<1x16xf32>
    %75 = vector.broadcast %74 : vector<1x16xf32> to vector<64x16xf32>
    %76 = arith.addf %72, %75 : vector<64x16xf32>
    %c0_58 = arith.constant 0 : index
    %c1_59 = arith.constant 1 : index
    %c0_60 = arith.constant 0 : index
    %c0_61 = arith.constant 0 : index
    %77 = vector.load %arg7[%c0_58, %c1_59, %c0_60, %c0_61] : memref<2x2x32x16xf32, #tpu.memory_space<vmem>>, vector<1x1x32x16xf32>
    %78 = vector.shape_cast %77 : vector<1x1x32x16xf32> to vector<32x16xf32>
    %cst_62 = arith.constant dense<0.000000e+00> : vector<64x16xf32>
    %79 = tpu.matmul %22, %78, %cst_62 {dimension_numbers = #tpu.dot_dimension_numbers<[1], [0], [0], [1], [0, 0, 1, 1], [], []>} : vector<64x32xf32>, vector<32x16xf32>, vector<64x16xf32> -> vector<64x16xf32>
    %c0_63 = arith.constant 0 : index
    %c1_64 = arith.constant 1 : index
    %c0_65 = arith.constant 0 : index
    %c0_66 = arith.constant 0 : index
    %80 = vector.load %arg8[%c0_63, %c1_64, %c0_65, %c0_66] : memref<2x2x1x16xf32, #tpu.memory_space<vmem>>, vector<1x1x1x16xf32>
    %81 = vector.shape_cast %80 : vector<1x1x1x16xf32> to vector<1x16xf32>
    %82 = vector.broadcast %81 : vector<1x16xf32> to vector<64x16xf32>
    %83 = arith.addf %79, %82 : vector<64x16xf32>
    %c0_67 = arith.constant 0 : index
    %c1_68 = arith.constant 1 : index
    %c0_69 = arith.constant 0 : index
    %c0_70 = arith.constant 0 : index
    %84 = vector.load %arg9[%c0_67, %c1_68, %c0_69, %c0_70] : memref<2x2x32x16xf32, #tpu.memory_space<vmem>>, vector<1x1x32x16xf32>
    %85 = vector.shape_cast %84 : vector<1x1x32x16xf32> to vector<32x16xf32>
    %cst_71 = arith.constant dense<0.000000e+00> : vector<64x16xf32>
    %86 = tpu.matmul %22, %85, %cst_71 {dimension_numbers = #tpu.dot_dimension_numbers<[1], [0], [0], [1], [0, 0, 1, 1], [], []>} : vector<64x32xf32>, vector<32x16xf32>, vector<64x16xf32> -> vector<64x16xf32>
    %c0_72 = arith.constant 0 : index
    %c1_73 = arith.constant 1 : index
    %c0_74 = arith.constant 0 : index
    %c0_75 = arith.constant 0 : index
    %87 = vector.load %arg10[%c0_72, %c1_73, %c0_74, %c0_75] : memref<2x2x1x16xf32, #tpu.memory_space<vmem>>, vector<1x1x1x16xf32>
    %88 = vector.shape_cast %87 : vector<1x1x1x16xf32> to vector<1x16xf32>
    %89 = vector.broadcast %88 : vector<1x16xf32> to vector<64x16xf32>
    %90 = arith.addf %86, %89 : vector<64x16xf32>
    %91 = vector.shape_cast %76 : vector<64x16xf32> to vector<8x8x16xf32>
    %92 = vector.shape_cast %83 : vector<64x16xf32> to vector<8x8x16xf32>
    %93 = vector.shape_cast %90 : vector<64x16xf32> to vector<8x8x16xf32>
    "tpu.trace_start"() <{level = 10 : i32, message = "bqd,bkd->bqk"}> : () -> ()
    %cst_76 = arith.constant dense<0.000000e+00> : vector<8x8x8xf32>
    %94 = tpu.matmul %91, %92, %cst_76 {dimension_numbers = #tpu.dot_dimension_numbers<[2], [2], [1], [1], [0, 0, 0, 1, 1, 1], [0], [0]>} : vector<8x8x16xf32>, vector<8x8x16xf32>, vector<8x8x8xf32> -> vector<8x8x8xf32>
    "tpu.trace_stop"() : () -> ()
    %cst_77 = arith.constant 2.500000e-01 : f32
    %95 = vector.broadcast %cst_77 : f32 to vector<8x8x8xf32>
    %96 = arith.mulf %94, %95 : vector<8x8x8xf32>
    %97 = vector.broadcast %23 : vector<8x1x8xf32> to vector<8x8x8xf32>
    %98 = arith.addf %96, %97 : vector<8x8x8xf32>
    %cst_78 = arith.constant dense<0xFF800000> : vector<8x8xf32>
    %99 = vector.multi_reduction <maximumf>, %98, %cst_78 [2] : vector<8x8x8xf32> to vector<8x8xf32>
    %100 = vector.shape_cast %99 : vector<8x8xf32> to vector<8x8x1xf32>
    %101 = vector.broadcast %100 : vector<8x8x1xf32> to vector<8x8x8xf32>
    %102 = arith.subf %98, %101 : vector<8x8x8xf32>
    %103 = math.exp %102 : vector<8x8x8xf32>
    %cst_79 = arith.constant dense<0.000000e+00> : vector<8x8xf32>
    %104 = vector.multi_reduction <add>, %103, %cst_79 [2] : vector<8x8x8xf32> to vector<8x8xf32>
    %105 = vector.shape_cast %104 : vector<8x8xf32> to vector<8x8x1xf32>
    %106 = tpu.reciprocal %105 {approx = true} : vector<8x8x1xf32> -> vector<8x8x1xf32>
    %107 = vector.broadcast %106 : vector<8x8x1xf32> to vector<8x8x8xf32>
    %108 = arith.mulf %103, %107 : vector<8x8x8xf32>
    "tpu.trace_start"() <{level = 10 : i32, message = "bqk,bkd->bqd"}> : () -> ()
    %cst_80 = arith.constant dense<0.000000e+00> : vector<8x8x16xf32>
    %109 = tpu.matmul %108, %93, %cst_80 {dimension_numbers = #tpu.dot_dimension_numbers<[2], [1], [1], [2], [0, 0, 0, 1, 1, 2], [0], [0]>} : vector<8x8x8xf32>, vector<8x8x16xf32>, vector<8x8x16xf32> -> vector<8x8x16xf32>
    "tpu.trace_stop"() : () -> ()
    %110 = vector.shape_cast %109 : vector<8x8x16xf32> to vector<64x16xf32>
    %c0_81 = arith.constant 0 : index
    %c1_82 = arith.constant 1 : index
    %c0_83 = arith.constant 0 : index
    %c0_84 = arith.constant 0 : index
    %111 = vector.load %arg11[%c0_81, %c1_82, %c0_83, %c0_84] : memref<2x2x16x32xf32, #tpu.memory_space<vmem>>, vector<1x1x16x32xf32>
    %112 = vector.shape_cast %111 : vector<1x1x16x32xf32> to vector<16x32xf32>
    %cst_85 = arith.constant dense<0.000000e+00> : vector<64x32xf32>
    %113 = tpu.matmul %110, %112, %cst_85 {dimension_numbers = #tpu.dot_dimension_numbers<[1], [0], [0], [1], [0, 0, 1, 1], [], []>} : vector<64x16xf32>, vector<16x32xf32>, vector<64x32xf32> -> vector<64x32xf32>
    %114 = arith.addf %69, %113 : vector<64x32xf32>
    %c0_86 = arith.constant 0 : index
    %c0_87 = arith.constant 0 : index
    %c0_88 = arith.constant 0 : index
    %115 = vector.load %arg12[%c0_86, %c0_87, %c0_88] : memref<2x1x32xf32, #tpu.memory_space<vmem>>, vector<1x1x32xf32>
    %116 = vector.shape_cast %115 : vector<1x1x32xf32> to vector<1x32xf32>
    %117 = vector.broadcast %116 : vector<1x32xf32> to vector<64x32xf32>
    %118 = arith.addf %114, %117 : vector<64x32xf32>
    %119 = arith.addf %118, %22 : vector<64x32xf32>
    %c0_89 = arith.constant 0 : index
    %c0_90 = arith.constant 0 : index
    %c0_91 = arith.constant 0 : index
    %120 = vector.load %arg13[%c0_89, %c0_90, %c0_91] : memref<2x1x32xf32, #tpu.memory_space<vmem>>, vector<1x1x32xf32>
    %121 = vector.shape_cast %120 : vector<1x1x32xf32> to vector<1x32xf32>
    %c0_92 = arith.constant 0 : index
    %c0_93 = arith.constant 0 : index
    %c0_94 = arith.constant 0 : index
    %122 = vector.load %arg14[%c0_92, %c0_93, %c0_94] : memref<2x1x32xf32, #tpu.memory_space<vmem>>, vector<1x1x32xf32>
    %123 = vector.shape_cast %122 : vector<1x1x32xf32> to vector<1x32xf32>
    %cst_95 = arith.constant dense<0.000000e+00> : vector<64xf32>
    %124 = vector.multi_reduction <add>, %119, %cst_95 [1] : vector<64x32xf32> to vector<64xf32>
    %125 = vector.shape_cast %124 : vector<64xf32> to vector<64x1xf32>
    %cst_96 = arith.constant 3.200000e+01 : f32
    %126 = vector.broadcast %cst_96 : f32 to vector<64x1xf32>
    %127 = arith.divf %125, %126 : vector<64x1xf32>
    %128 = vector.broadcast %127 : vector<64x1xf32> to vector<64x32xf32>
    %129 = arith.subf %119, %128 : vector<64x32xf32>
    %130 = arith.mulf %129, %129 : vector<64x32xf32>
    %cst_97 = arith.constant dense<0.000000e+00> : vector<64xf32>
    %131 = vector.multi_reduction <add>, %130, %cst_97 [1] : vector<64x32xf32> to vector<64xf32>
    %132 = vector.shape_cast %131 : vector<64xf32> to vector<64x1xf32>
    %cst_98 = arith.constant 3.200000e+01 : f32
    %133 = vector.broadcast %cst_98 : f32 to vector<64x1xf32>
    %134 = arith.divf %132, %133 : vector<64x1xf32>
    %cst_99 = arith.constant 9.99999996E-13 : f32
    %135 = vector.broadcast %cst_99 : f32 to vector<64x1xf32>
    %136 = arith.addf %134, %135 : vector<64x1xf32>
    %137 = math.rsqrt %136 : vector<64x1xf32>
    %138 = vector.broadcast %137 : vector<64x1xf32> to vector<64x32xf32>
    %139 = arith.mulf %129, %138 : vector<64x32xf32>
    %140 = vector.broadcast %121 : vector<1x32xf32> to vector<64x32xf32>
    %141 = arith.mulf %139, %140 : vector<64x32xf32>
    %142 = vector.broadcast %123 : vector<1x32xf32> to vector<64x32xf32>
    %143 = arith.addf %141, %142 : vector<64x32xf32>
    %c0_100 = arith.constant 0 : index
    %c0_101 = arith.constant 0 : index
    %c0_102 = arith.constant 0 : index
    %144 = vector.load %arg15[%c0_100, %c0_101, %c0_102] : memref<2x32x64xf32, #tpu.memory_space<vmem>>, vector<1x32x64xf32>
    %145 = vector.shape_cast %144 : vector<1x32x64xf32> to vector<32x64xf32>
    %cst_103 = arith.constant dense<0.000000e+00> : vector<64x64xf32>
    %146 = tpu.matmul %143, %145, %cst_103 {dimension_numbers = #tpu.dot_dimension_numbers<[1], [0], [0], [1], [0, 0, 1, 1], [], []>} : vector<64x32xf32>, vector<32x64xf32>, vector<64x64xf32> -> vector<64x64xf32>
    %c0_104 = arith.constant 0 : index
    %c0_105 = arith.constant 0 : index
    %c0_106 = arith.constant 0 : index
    %147 = vector.load %arg16[%c0_104, %c0_105, %c0_106] : memref<2x1x64xf32, #tpu.memory_space<vmem>>, vector<1x1x64xf32>
    %148 = vector.shape_cast %147 : vector<1x1x64xf32> to vector<1x64xf32>
    %149 = vector.broadcast %148 : vector<1x64xf32> to vector<64x64xf32>
    %150 = arith.addf %146, %149 : vector<64x64xf32>
    %cst_107 = arith.constant 5.000000e-01 : f32
    %151 = vector.broadcast %cst_107 : f32 to vector<64x64xf32>
    %152 = arith.mulf %151, %150 : vector<64x64xf32>
    %cst_108 = arith.constant 4.471500e-02 : f32
    %153 = vector.broadcast %cst_108 : f32 to vector<64x64xf32>
    %154 = arith.mulf %153, %150 : vector<64x64xf32>
    %155 = arith.mulf %154, %150 : vector<64x64xf32>
    %156 = arith.mulf %155, %150 : vector<64x64xf32>
    %157 = arith.addf %150, %156 : vector<64x64xf32>
    %cst_109 = arith.constant 0.797884583 : f32
    %158 = vector.broadcast %cst_109 : f32 to vector<64x64xf32>
    %159 = arith.mulf %158, %157 : vector<64x64xf32>
    %160 = math.tanh %159 : vector<64x64xf32>
    %cst_110 = arith.constant 1.000000e+00 : f32
    %161 = vector.broadcast %cst_110 : f32 to vector<64x64xf32>
    %162 = arith.addf %161, %160 : vector<64x64xf32>
    %163 = arith.mulf %152, %162 : vector<64x64xf32>
    %c0_111 = arith.constant 0 : index
    %c0_112 = arith.constant 0 : index
    %c0_113 = arith.constant 0 : index
    %164 = vector.load %arg17[%c0_111, %c0_112, %c0_113] : memref<2x64x32xf32, #tpu.memory_space<vmem>>, vector<1x64x32xf32>
    %165 = vector.shape_cast %164 : vector<1x64x32xf32> to vector<64x32xf32>
    %cst_114 = arith.constant dense<0.000000e+00> : vector<64x32xf32>
    %166 = tpu.matmul %163, %165, %cst_114 {dimension_numbers = #tpu.dot_dimension_numbers<[1], [0], [0], [1], [0, 0, 1, 1], [], []>} : vector<64x64xf32>, vector<64x32xf32>, vector<64x32xf32> -> vector<64x32xf32>
    %c0_115 = arith.constant 0 : index
    %c0_116 = arith.constant 0 : index
    %c0_117 = arith.constant 0 : index
    %167 = vector.load %arg18[%c0_115, %c0_116, %c0_117] : memref<2x1x32xf32, #tpu.memory_space<vmem>>, vector<1x1x32xf32>
    %168 = vector.shape_cast %167 : vector<1x1x32xf32> to vector<1x32xf32>
    %169 = vector.broadcast %168 : vector<1x32xf32> to vector<64x32xf32>
    %170 = arith.addf %166, %169 : vector<64x32xf32>
    %171 = arith.addf %170, %143 : vector<64x32xf32>
    %c0_118 = arith.constant 0 : index
    %c0_119 = arith.constant 0 : index
    %c0_120 = arith.constant 0 : index
    %172 = vector.load %arg19[%c0_118, %c0_119, %c0_120] : memref<2x1x32xf32, #tpu.memory_space<vmem>>, vector<1x1x32xf32>
    %173 = vector.shape_cast %172 : vector<1x1x32xf32> to vector<1x32xf32>
    %c0_121 = arith.constant 0 : index
    %c0_122 = arith.constant 0 : index
    %c0_123 = arith.constant 0 : index
    %174 = vector.load %arg20[%c0_121, %c0_122, %c0_123] : memref<2x1x32xf32, #tpu.memory_space<vmem>>, vector<1x1x32xf32>
    %175 = vector.shape_cast %174 : vector<1x1x32xf32> to vector<1x32xf32>
    %cst_124 = arith.constant dense<0.000000e+00> : vector<64xf32>
    %176 = vector.multi_reduction <add>, %171, %cst_124 [1] : vector<64x32xf32> to vector<64xf32>
    %177 = vector.shape_cast %176 : vector<64xf32> to vector<64x1xf32>
    %cst_125 = arith.constant 3.200000e+01 : f32
    %178 = vector.broadcast %cst_125 : f32 to vector<64x1xf32>
    %179 = arith.divf %177, %178 : vector<64x1xf32>
    %180 = vector.broadcast %179 : vector<64x1xf32> to vector<64x32xf32>
    %181 = arith.subf %171, %180 : vector<64x32xf32>
    %182 = arith.mulf %181, %181 : vector<64x32xf32>
    %cst_126 = arith.constant dense<0.000000e+00> : vector<64xf32>
    %183 = vector.multi_reduction <add>, %182, %cst_126 [1] : vector<64x32xf32> to vector<64xf32>
    %184 = vector.shape_cast %183 : vector<64xf32> to vector<64x1xf32>
    %cst_127 = arith.constant 3.200000e+01 : f32
    %185 = vector.broadcast %cst_127 : f32 to vector<64x1xf32>
    %186 = arith.divf %184, %185 : vector<64x1xf32>
    %cst_128 = arith.constant 9.99999996E-13 : f32
    %187 = vector.broadcast %cst_128 : f32 to vector<64x1xf32>
    %188 = arith.addf %186, %187 : vector<64x1xf32>
    %189 = math.rsqrt %188 : vector<64x1xf32>
    %190 = vector.broadcast %189 : vector<64x1xf32> to vector<64x32xf32>
    %191 = arith.mulf %181, %190 : vector<64x32xf32>
    %192 = vector.broadcast %173 : vector<1x32xf32> to vector<64x32xf32>
    %193 = arith.mulf %191, %192 : vector<64x32xf32>
    %194 = vector.broadcast %175 : vector<1x32xf32> to vector<64x32xf32>
    %195 = arith.addf %193, %194 : vector<64x32xf32>
    %cst_129 = arith.constant 0.000000e+00 : f32
    %196 = vector.broadcast %cst_129 : f32 to vector<64x32xf32>
    %c1_130 = arith.constant 1 : index
    %c0_131 = arith.constant 0 : index
    %c0_132 = arith.constant 0 : index
    %c0_133 = arith.constant 0 : index
    %197 = vector.load %arg5[%c1_130, %c0_131, %c0_132, %c0_133] : memref<2x2x32x16xf32, #tpu.memory_space<vmem>>, vector<1x1x32x16xf32>
    %198 = vector.shape_cast %197 : vector<1x1x32x16xf32> to vector<32x16xf32>
    %cst_134 = arith.constant dense<0.000000e+00> : vector<64x16xf32>
    %199 = tpu.matmul %195, %198, %cst_134 {dimension_numbers = #tpu.dot_dimension_numbers<[1], [0], [0], [1], [0, 0, 1, 1], [], []>} : vector<64x32xf32>, vector<32x16xf32>, vector<64x16xf32> -> vector<64x16xf32>
    %c1_135 = arith.constant 1 : index
    %c0_136 = arith.constant 0 : index
    %c0_137 = arith.constant 0 : index
    %c0_138 = arith.constant 0 : index
    %200 = vector.load %arg6[%c1_135, %c0_136, %c0_137, %c0_138] : memref<2x2x1x16xf32, #tpu.memory_space<vmem>>, vector<1x1x1x16xf32>
    %201 = vector.shape_cast %200 : vector<1x1x1x16xf32> to vector<1x16xf32>
    %202 = vector.broadcast %201 : vector<1x16xf32> to vector<64x16xf32>
    %203 = arith.addf %199, %202 : vector<64x16xf32>
    %c1_139 = arith.constant 1 : index
    %c0_140 = arith.constant 0 : index
    %c0_141 = arith.constant 0 : index
    %c0_142 = arith.constant 0 : index
    %204 = vector.load %arg7[%c1_139, %c0_140, %c0_141, %c0_142] : memref<2x2x32x16xf32, #tpu.memory_space<vmem>>, vector<1x1x32x16xf32>
    %205 = vector.shape_cast %204 : vector<1x1x32x16xf32> to vector<32x16xf32>
    %cst_143 = arith.constant dense<0.000000e+00> : vector<64x16xf32>
    %206 = tpu.matmul %195, %205, %cst_143 {dimension_numbers = #tpu.dot_dimension_numbers<[1], [0], [0], [1], [0, 0, 1, 1], [], []>} : vector<64x32xf32>, vector<32x16xf32>, vector<64x16xf32> -> vector<64x16xf32>
    %c1_144 = arith.constant 1 : index
    %c0_145 = arith.constant 0 : index
    %c0_146 = arith.constant 0 : index
    %c0_147 = arith.constant 0 : index
    %207 = vector.load %arg8[%c1_144, %c0_145, %c0_146, %c0_147] : memref<2x2x1x16xf32, #tpu.memory_space<vmem>>, vector<1x1x1x16xf32>
    %208 = vector.shape_cast %207 : vector<1x1x1x16xf32> to vector<1x16xf32>
    %209 = vector.broadcast %208 : vector<1x16xf32> to vector<64x16xf32>
    %210 = arith.addf %206, %209 : vector<64x16xf32>
    %c1_148 = arith.constant 1 : index
    %c0_149 = arith.constant 0 : index
    %c0_150 = arith.constant 0 : index
    %c0_151 = arith.constant 0 : index
    %211 = vector.load %arg9[%c1_148, %c0_149, %c0_150, %c0_151] : memref<2x2x32x16xf32, #tpu.memory_space<vmem>>, vector<1x1x32x16xf32>
    %212 = vector.shape_cast %211 : vector<1x1x32x16xf32> to vector<32x16xf32>
    %cst_152 = arith.constant dense<0.000000e+00> : vector<64x16xf32>
    %213 = tpu.matmul %195, %212, %cst_152 {dimension_numbers = #tpu.dot_dimension_numbers<[1], [0], [0], [1], [0, 0, 1, 1], [], []>} : vector<64x32xf32>, vector<32x16xf32>, vector<64x16xf32> -> vector<64x16xf32>
    %c1_153 = arith.constant 1 : index
    %c0_154 = arith.constant 0 : index
    %c0_155 = arith.constant 0 : index
    %c0_156 = arith.constant 0 : index
    %214 = vector.load %arg10[%c1_153, %c0_154, %c0_155, %c0_156] : memref<2x2x1x16xf32, #tpu.memory_space<vmem>>, vector<1x1x1x16xf32>
    %215 = vector.shape_cast %214 : vector<1x1x1x16xf32> to vector<1x16xf32>
    %216 = vector.broadcast %215 : vector<1x16xf32> to vector<64x16xf32>
    %217 = arith.addf %213, %216 : vector<64x16xf32>
    %218 = vector.shape_cast %203 : vector<64x16xf32> to vector<8x8x16xf32>
    %219 = vector.shape_cast %210 : vector<64x16xf32> to vector<8x8x16xf32>
    %220 = vector.shape_cast %217 : vector<64x16xf32> to vector<8x8x16xf32>
    "tpu.trace_start"() <{level = 10 : i32, message = "bqd,bkd->bqk"}> : () -> ()
    %cst_157 = arith.constant dense<0.000000e+00> : vector<8x8x8xf32>
    %221 = tpu.matmul %218, %219, %cst_157 {dimension_numbers = #tpu.dot_dimension_numbers<[2], [2], [1], [1], [0, 0, 0, 1, 1, 1], [0], [0]>} : vector<8x8x16xf32>, vector<8x8x16xf32>, vector<8x8x8xf32> -> vector<8x8x8xf32>
    "tpu.trace_stop"() : () -> ()
    %cst_158 = arith.constant 2.500000e-01 : f32
    %222 = vector.broadcast %cst_158 : f32 to vector<8x8x8xf32>
    %223 = arith.mulf %221, %222 : vector<8x8x8xf32>
    %224 = vector.broadcast %23 : vector<8x1x8xf32> to vector<8x8x8xf32>
    %225 = arith.addf %223, %224 : vector<8x8x8xf32>
    %cst_159 = arith.constant dense<0xFF800000> : vector<8x8xf32>
    %226 = vector.multi_reduction <maximumf>, %225, %cst_159 [2] : vector<8x8x8xf32> to vector<8x8xf32>
    %227 = vector.shape_cast %226 : vector<8x8xf32> to vector<8x8x1xf32>
    %228 = vector.broadcast %227 : vector<8x8x1xf32> to vector<8x8x8xf32>
    %229 = arith.subf %225, %228 : vector<8x8x8xf32>
    %230 = math.exp %229 : vector<8x8x8xf32>
    %cst_160 = arith.constant dense<0.000000e+00> : vector<8x8xf32>
    %231 = vector.multi_reduction <add>, %230, %cst_160 [2] : vector<8x8x8xf32> to vector<8x8xf32>
    %232 = vector.shape_cast %231 : vector<8x8xf32> to vector<8x8x1xf32>
    %233 = tpu.reciprocal %232 {approx = true} : vector<8x8x1xf32> -> vector<8x8x1xf32>
    %234 = vector.broadcast %233 : vector<8x8x1xf32> to vector<8x8x8xf32>
    %235 = arith.mulf %230, %234 : vector<8x8x8xf32>
    "tpu.trace_start"() <{level = 10 : i32, message = "bqk,bkd->bqd"}> : () -> ()
    %cst_161 = arith.constant dense<0.000000e+00> : vector<8x8x16xf32>
    %236 = tpu.matmul %235, %220, %cst_161 {dimension_numbers = #tpu.dot_dimension_numbers<[2], [1], [1], [2], [0, 0, 0, 1, 1, 2], [0], [0]>} : vector<8x8x8xf32>, vector<8x8x16xf32>, vector<8x8x16xf32> -> vector<8x8x16xf32>
    "tpu.trace_stop"() : () -> ()
    %237 = vector.shape_cast %236 : vector<8x8x16xf32> to vector<64x16xf32>
    %c1_162 = arith.constant 1 : index
    %c0_163 = arith.constant 0 : index
    %c0_164 = arith.constant 0 : index
    %c0_165 = arith.constant 0 : index
    %238 = vector.load %arg11[%c1_162, %c0_163, %c0_164, %c0_165] : memref<2x2x16x32xf32, #tpu.memory_space<vmem>>, vector<1x1x16x32xf32>
    %239 = vector.shape_cast %238 : vector<1x1x16x32xf32> to vector<16x32xf32>
    %cst_166 = arith.constant dense<0.000000e+00> : vector<64x32xf32>
    %240 = tpu.matmul %237, %239, %cst_166 {dimension_numbers = #tpu.dot_dimension_numbers<[1], [0], [0], [1], [0, 0, 1, 1], [], []>} : vector<64x16xf32>, vector<16x32xf32>, vector<64x32xf32> -> vector<64x32xf32>
    %241 = arith.addf %196, %240 : vector<64x32xf32>
    %c1_167 = arith.constant 1 : index
    %c1_168 = arith.constant 1 : index
    %c0_169 = arith.constant 0 : index
    %c0_170 = arith.constant 0 : index
    %242 = vector.load %arg5[%c1_167, %c1_168, %c0_169, %c0_170] : memref<2x2x32x16xf32, #tpu.memory_space<vmem>>, vector<1x1x32x16xf32>
    %243 = vector.shape_cast %242 : vector<1x1x32x16xf32> to vector<32x16xf32>
    %cst_171 = arith.constant dense<0.000000e+00> : vector<64x16xf32>
    %244 = tpu.matmul %195, %243, %cst_171 {dimension_numbers = #tpu.dot_dimension_numbers<[1], [0], [0], [1], [0, 0, 1, 1], [], []>} : vector<64x32xf32>, vector<32x16xf32>, vector<64x16xf32> -> vector<64x16xf32>
    %c1_172 = arith.constant 1 : index
    %c1_173 = arith.constant 1 : index
    %c0_174 = arith.constant 0 : index
    %c0_175 = arith.constant 0 : index
    %245 = vector.load %arg6[%c1_172, %c1_173, %c0_174, %c0_175] : memref<2x2x1x16xf32, #tpu.memory_space<vmem>>, vector<1x1x1x16xf32>
    %246 = vector.shape_cast %245 : vector<1x1x1x16xf32> to vector<1x16xf32>
    %247 = vector.broadcast %246 : vector<1x16xf32> to vector<64x16xf32>
    %248 = arith.addf %244, %247 : vector<64x16xf32>
    %c1_176 = arith.constant 1 : index
    %c1_177 = arith.constant 1 : index
    %c0_178 = arith.constant 0 : index
    %c0_179 = arith.constant 0 : index
    %249 = vector.load %arg7[%c1_176, %c1_177, %c0_178, %c0_179] : memref<2x2x32x16xf32, #tpu.memory_space<vmem>>, vector<1x1x32x16xf32>
    %250 = vector.shape_cast %249 : vector<1x1x32x16xf32> to vector<32x16xf32>
    %cst_180 = arith.constant dense<0.000000e+00> : vector<64x16xf32>
    %251 = tpu.matmul %195, %250, %cst_180 {dimension_numbers = #tpu.dot_dimension_numbers<[1], [0], [0], [1], [0, 0, 1, 1], [], []>} : vector<64x32xf32>, vector<32x16xf32>, vector<64x16xf32> -> vector<64x16xf32>
    %c1_181 = arith.constant 1 : index
    %c1_182 = arith.constant 1 : index
    %c0_183 = arith.constant 0 : index
    %c0_184 = arith.constant 0 : index
    %252 = vector.load %arg8[%c1_181, %c1_182, %c0_183, %c0_184] : memref<2x2x1x16xf32, #tpu.memory_space<vmem>>, vector<1x1x1x16xf32>
    %253 = vector.shape_cast %252 : vector<1x1x1x16xf32> to vector<1x16xf32>
    %254 = vector.broadcast %253 : vector<1x16xf32> to vector<64x16xf32>
    %255 = arith.addf %251, %254 : vector<64x16xf32>
    %c1_185 = arith.constant 1 : index
    %c1_186 = arith.constant 1 : index
    %c0_187 = arith.constant 0 : index
    %c0_188 = arith.constant 0 : index
    %256 = vector.load %arg9[%c1_185, %c1_186, %c0_187, %c0_188] : memref<2x2x32x16xf32, #tpu.memory_space<vmem>>, vector<1x1x32x16xf32>
    %257 = vector.shape_cast %256 : vector<1x1x32x16xf32> to vector<32x16xf32>
    %cst_189 = arith.constant dense<0.000000e+00> : vector<64x16xf32>
    %258 = tpu.matmul %195, %257, %cst_189 {dimension_numbers = #tpu.dot_dimension_numbers<[1], [0], [0], [1], [0, 0, 1, 1], [], []>} : vector<64x32xf32>, vector<32x16xf32>, vector<64x16xf32> -> vector<64x16xf32>
    %c1_190 = arith.constant 1 : index
    %c1_191 = arith.constant 1 : index
    %c0_192 = arith.constant 0 : index
    %c0_193 = arith.constant 0 : index
    %259 = vector.load %arg10[%c1_190, %c1_191, %c0_192, %c0_193] : memref<2x2x1x16xf32, #tpu.memory_space<vmem>>, vector<1x1x1x16xf32>
    %260 = vector.shape_cast %259 : vector<1x1x1x16xf32> to vector<1x16xf32>
    %261 = vector.broadcast %260 : vector<1x16xf32> to vector<64x16xf32>
    %262 = arith.addf %258, %261 : vector<64x16xf32>
    %263 = vector.shape_cast %248 : vector<64x16xf32> to vector<8x8x16xf32>
    %264 = vector.shape_cast %255 : vector<64x16xf32> to vector<8x8x16xf32>
    %265 = vector.shape_cast %262 : vector<64x16xf32> to vector<8x8x16xf32>
    "tpu.trace_start"() <{level = 10 : i32, message = "bqd,bkd->bqk"}> : () -> ()
    %cst_194 = arith.constant dense<0.000000e+00> : vector<8x8x8xf32>
    %266 = tpu.matmul %263, %264, %cst_194 {dimension_numbers = #tpu.dot_dimension_numbers<[2], [2], [1], [1], [0, 0, 0, 1, 1, 1], [0], [0]>} : vector<8x8x16xf32>, vector<8x8x16xf32>, vector<8x8x8xf32> -> vector<8x8x8xf32>
    "tpu.trace_stop"() : () -> ()
    %cst_195 = arith.constant 2.500000e-01 : f32
    %267 = vector.broadcast %cst_195 : f32 to vector<8x8x8xf32>
    %268 = arith.mulf %266, %267 : vector<8x8x8xf32>
    %269 = vector.broadcast %23 : vector<8x1x8xf32> to vector<8x8x8xf32>
    %270 = arith.addf %268, %269 : vector<8x8x8xf32>
    %cst_196 = arith.constant dense<0xFF800000> : vector<8x8xf32>
    %271 = vector.multi_reduction <maximumf>, %270, %cst_196 [2] : vector<8x8x8xf32> to vector<8x8xf32>
    %272 = vector.shape_cast %271 : vector<8x8xf32> to vector<8x8x1xf32>
    %273 = vector.broadcast %272 : vector<8x8x1xf32> to vector<8x8x8xf32>
    %274 = arith.subf %270, %273 : vector<8x8x8xf32>
    %275 = math.exp %274 : vector<8x8x8xf32>
    %cst_197 = arith.constant dense<0.000000e+00> : vector<8x8xf32>
    %276 = vector.multi_reduction <add>, %275, %cst_197 [2] : vector<8x8x8xf32> to vector<8x8xf32>
    %277 = vector.shape_cast %276 : vector<8x8xf32> to vector<8x8x1xf32>
    %278 = tpu.reciprocal %277 {approx = true} : vector<8x8x1xf32> -> vector<8x8x1xf32>
    %279 = vector.broadcast %278 : vector<8x8x1xf32> to vector<8x8x8xf32>
    %280 = arith.mulf %275, %279 : vector<8x8x8xf32>
    "tpu.trace_start"() <{level = 10 : i32, message = "bqk,bkd->bqd"}> : () -> ()
    %cst_198 = arith.constant dense<0.000000e+00> : vector<8x8x16xf32>
    %281 = tpu.matmul %280, %265, %cst_198 {dimension_numbers = #tpu.dot_dimension_numbers<[2], [1], [1], [2], [0, 0, 0, 1, 1, 2], [0], [0]>} : vector<8x8x8xf32>, vector<8x8x16xf32>, vector<8x8x16xf32> -> vector<8x8x16xf32>
    "tpu.trace_stop"() : () -> ()
    %282 = vector.shape_cast %281 : vector<8x8x16xf32> to vector<64x16xf32>
    %c1_199 = arith.constant 1 : index
    %c1_200 = arith.constant 1 : index
    %c0_201 = arith.constant 0 : index
    %c0_202 = arith.constant 0 : index
    %283 = vector.load %arg11[%c1_199, %c1_200, %c0_201, %c0_202] : memref<2x2x16x32xf32, #tpu.memory_space<vmem>>, vector<1x1x16x32xf32>
    %284 = vector.shape_cast %283 : vector<1x1x16x32xf32> to vector<16x32xf32>
    %cst_203 = arith.constant dense<0.000000e+00> : vector<64x32xf32>
    %285 = tpu.matmul %282, %284, %cst_203 {dimension_numbers = #tpu.dot_dimension_numbers<[1], [0], [0], [1], [0, 0, 1, 1], [], []>} : vector<64x16xf32>, vector<16x32xf32>, vector<64x32xf32> -> vector<64x32xf32>
    %286 = arith.addf %241, %285 : vector<64x32xf32>
    %c1_204 = arith.constant 1 : index
    %c0_205 = arith.constant 0 : index
    %c0_206 = arith.constant 0 : index
    %287 = vector.load %arg12[%c1_204, %c0_205, %c0_206] : memref<2x1x32xf32, #tpu.memory_space<vmem>>, vector<1x1x32xf32>
    %288 = vector.shape_cast %287 : vector<1x1x32xf32> to vector<1x32xf32>
    %289 = vector.broadcast %288 : vector<1x32xf32> to vector<64x32xf32>
    %290 = arith.addf %286, %289 : vector<64x32xf32>
    %291 = arith.addf %290, %195 : vector<64x32xf32>
    %c1_207 = arith.constant 1 : index
    %c0_208 = arith.constant 0 : index
    %c0_209 = arith.constant 0 : index
    %292 = vector.load %arg13[%c1_207, %c0_208, %c0_209] : memref<2x1x32xf32, #tpu.memory_space<vmem>>, vector<1x1x32xf32>
    %293 = vector.shape_cast %292 : vector<1x1x32xf32> to vector<1x32xf32>
    %c1_210 = arith.constant 1 : index
    %c0_211 = arith.constant 0 : index
    %c0_212 = arith.constant 0 : index
    %294 = vector.load %arg14[%c1_210, %c0_211, %c0_212] : memref<2x1x32xf32, #tpu.memory_space<vmem>>, vector<1x1x32xf32>
    %295 = vector.shape_cast %294 : vector<1x1x32xf32> to vector<1x32xf32>
    %cst_213 = arith.constant dense<0.000000e+00> : vector<64xf32>
    %296 = vector.multi_reduction <add>, %291, %cst_213 [1] : vector<64x32xf32> to vector<64xf32>
    %297 = vector.shape_cast %296 : vector<64xf32> to vector<64x1xf32>
    %cst_214 = arith.constant 3.200000e+01 : f32
    %298 = vector.broadcast %cst_214 : f32 to vector<64x1xf32>
    %299 = arith.divf %297, %298 : vector<64x1xf32>
    %300 = vector.broadcast %299 : vector<64x1xf32> to vector<64x32xf32>
    %301 = arith.subf %291, %300 : vector<64x32xf32>
    %302 = arith.mulf %301, %301 : vector<64x32xf32>
    %cst_215 = arith.constant dense<0.000000e+00> : vector<64xf32>
    %303 = vector.multi_reduction <add>, %302, %cst_215 [1] : vector<64x32xf32> to vector<64xf32>
    %304 = vector.shape_cast %303 : vector<64xf32> to vector<64x1xf32>
    %cst_216 = arith.constant 3.200000e+01 : f32
    %305 = vector.broadcast %cst_216 : f32 to vector<64x1xf32>
    %306 = arith.divf %304, %305 : vector<64x1xf32>
    %cst_217 = arith.constant 9.99999996E-13 : f32
    %307 = vector.broadcast %cst_217 : f32 to vector<64x1xf32>
    %308 = arith.addf %306, %307 : vector<64x1xf32>
    %309 = math.rsqrt %308 : vector<64x1xf32>
    %310 = vector.broadcast %309 : vector<64x1xf32> to vector<64x32xf32>
    %311 = arith.mulf %301, %310 : vector<64x32xf32>
    %312 = vector.broadcast %293 : vector<1x32xf32> to vector<64x32xf32>
    %313 = arith.mulf %311, %312 : vector<64x32xf32>
    %314 = vector.broadcast %295 : vector<1x32xf32> to vector<64x32xf32>
    %315 = arith.addf %313, %314 : vector<64x32xf32>
    %c1_218 = arith.constant 1 : index
    %c0_219 = arith.constant 0 : index
    %c0_220 = arith.constant 0 : index
    %316 = vector.load %arg15[%c1_218, %c0_219, %c0_220] : memref<2x32x64xf32, #tpu.memory_space<vmem>>, vector<1x32x64xf32>
    %317 = vector.shape_cast %316 : vector<1x32x64xf32> to vector<32x64xf32>
    %cst_221 = arith.constant dense<0.000000e+00> : vector<64x64xf32>
    %318 = tpu.matmul %315, %317, %cst_221 {dimension_numbers = #tpu.dot_dimension_numbers<[1], [0], [0], [1], [0, 0, 1, 1], [], []>} : vector<64x32xf32>, vector<32x64xf32>, vector<64x64xf32> -> vector<64x64xf32>
    %c1_222 = arith.constant 1 : index
    %c0_223 = arith.constant 0 : index
    %c0_224 = arith.constant 0 : index
    %319 = vector.load %arg16[%c1_222, %c0_223, %c0_224] : memref<2x1x64xf32, #tpu.memory_space<vmem>>, vector<1x1x64xf32>
    %320 = vector.shape_cast %319 : vector<1x1x64xf32> to vector<1x64xf32>
    %321 = vector.broadcast %320 : vector<1x64xf32> to vector<64x64xf32>
    %322 = arith.addf %318, %321 : vector<64x64xf32>
    %cst_225 = arith.constant 5.000000e-01 : f32
    %323 = vector.broadcast %cst_225 : f32 to vector<64x64xf32>
    %324 = arith.mulf %323, %322 : vector<64x64xf32>
    %cst_226 = arith.constant 4.471500e-02 : f32
    %325 = vector.broadcast %cst_226 : f32 to vector<64x64xf32>
    %326 = arith.mulf %325, %322 : vector<64x64xf32>
    %327 = arith.mulf %326, %322 : vector<64x64xf32>
    %328 = arith.mulf %327, %322 : vector<64x64xf32>
    %329 = arith.addf %322, %328 : vector<64x64xf32>
    %cst_227 = arith.constant 0.797884583 : f32
    %330 = vector.broadcast %cst_227 : f32 to vector<64x64xf32>
    %331 = arith.mulf %330, %329 : vector<64x64xf32>
    %332 = math.tanh %331 : vector<64x64xf32>
    %cst_228 = arith.constant 1.000000e+00 : f32
    %333 = vector.broadcast %cst_228 : f32 to vector<64x64xf32>
    %334 = arith.addf %333, %332 : vector<64x64xf32>
    %335 = arith.mulf %324, %334 : vector<64x64xf32>
    %c1_229 = arith.constant 1 : index
    %c0_230 = arith.constant 0 : index
    %c0_231 = arith.constant 0 : index
    %336 = vector.load %arg17[%c1_229, %c0_230, %c0_231] : memref<2x64x32xf32, #tpu.memory_space<vmem>>, vector<1x64x32xf32>
    %337 = vector.shape_cast %336 : vector<1x64x32xf32> to vector<64x32xf32>
    %cst_232 = arith.constant dense<0.000000e+00> : vector<64x32xf32>
    %338 = tpu.matmul %335, %337, %cst_232 {dimension_numbers = #tpu.dot_dimension_numbers<[1], [0], [0], [1], [0, 0, 1, 1], [], []>} : vector<64x64xf32>, vector<64x32xf32>, vector<64x32xf32> -> vector<64x32xf32>
    %c1_233 = arith.constant 1 : index
    %c0_234 = arith.constant 0 : index
    %c0_235 = arith.constant 0 : index
    %339 = vector.load %arg18[%c1_233, %c0_234, %c0_235] : memref<2x1x32xf32, #tpu.memory_space<vmem>>, vector<1x1x32xf32>
    %340 = vector.shape_cast %339 : vector<1x1x32xf32> to vector<1x32xf32>
    %341 = vector.broadcast %340 : vector<1x32xf32> to vector<64x32xf32>
    %342 = arith.addf %338, %341 : vector<64x32xf32>
    %343 = arith.addf %342, %315 : vector<64x32xf32>
    %c1_236 = arith.constant 1 : index
    %c0_237 = arith.constant 0 : index
    %c0_238 = arith.constant 0 : index
    %344 = vector.load %arg19[%c1_236, %c0_237, %c0_238] : memref<2x1x32xf32, #tpu.memory_space<vmem>>, vector<1x1x32xf32>
    %345 = vector.shape_cast %344 : vector<1x1x32xf32> to vector<1x32xf32>
    %c1_239 = arith.constant 1 : index
    %c0_240 = arith.constant 0 : index
    %c0_241 = arith.constant 0 : index
    %346 = vector.load %arg20[%c1_239, %c0_240, %c0_241] : memref<2x1x32xf32, #tpu.memory_space<vmem>>, vector<1x1x32xf32>
    %347 = vector.shape_cast %346 : vector<1x1x32xf32> to vector<1x32xf32>
    %cst_242 = arith.constant dense<0.000000e+00> : vector<64xf32>
    %348 = vector.multi_reduction <add>, %343, %cst_242 [1] : vector<64x32xf32> to vector<64xf32>
    %349 = vector.shape_cast %348 : vector<64xf32> to vector<64x1xf32>
    %cst_243 = arith.constant 3.200000e+01 : f32
    %350 = vector.broadcast %cst_243 : f32 to vector<64x1xf32>
    %351 = arith.divf %349, %350 : vector<64x1xf32>
    %352 = vector.broadcast %351 : vector<64x1xf32> to vector<64x32xf32>
    %353 = arith.subf %343, %352 : vector<64x32xf32>
    %354 = arith.mulf %353, %353 : vector<64x32xf32>
    %cst_244 = arith.constant dense<0.000000e+00> : vector<64xf32>
    %355 = vector.multi_reduction <add>, %354, %cst_244 [1] : vector<64x32xf32> to vector<64xf32>
    %356 = vector.shape_cast %355 : vector<64xf32> to vector<64x1xf32>
    %cst_245 = arith.constant 3.200000e+01 : f32
    %357 = vector.broadcast %cst_245 : f32 to vector<64x1xf32>
    %358 = arith.divf %356, %357 : vector<64x1xf32>
    %cst_246 = arith.constant 9.99999996E-13 : f32
    %359 = vector.broadcast %cst_246 : f32 to vector<64x1xf32>
    %360 = arith.addf %358, %359 : vector<64x1xf32>
    %361 = math.rsqrt %360 : vector<64x1xf32>
    %362 = vector.broadcast %361 : vector<64x1xf32> to vector<64x32xf32>
    %363 = arith.mulf %353, %362 : vector<64x32xf32>
    %364 = vector.broadcast %345 : vector<1x32xf32> to vector<64x32xf32>
    %365 = arith.mulf %363, %364 : vector<64x32xf32>
    %366 = vector.broadcast %347 : vector<1x32xf32> to vector<64x32xf32>
    %367 = arith.addf %365, %366 : vector<64x32xf32>
    %c0_247 = arith.constant 0 : index
    %c0_248 = arith.constant 0 : index
    %368 = vector.load %arg26[%c0_247, %c0_248] : memref<64x32xf32, #tpu.memory_space<vmem>>, vector<64x32xf32>
    tpu.vector_store %arg26[%c0_247, %c0_248], %367 {strides = array<i32>} : memref<64x32xf32, #tpu.memory_space<vmem>>, vector<64x32xf32>,
    %c0_249 = arith.constant 0 : index
    %c0_250 = arith.constant 0 : index
    %369 = tpu.strided_load %arg26[%c0_249, %c0_250] {strides = array<i32: 8, 1>} : memref<64x32xf32, #tpu.memory_space<vmem>>, vector<8x32xf32>
    %c0_251 = arith.constant 0 : index
    %c0_252 = arith.constant 0 : index
    %370 = vector.load %arg21[%c0_251, %c0_252] : memref<32x32xf32, #tpu.memory_space<vmem>>, vector<32x32xf32>
    %cst_253 = arith.constant dense<0.000000e+00> : vector<8x32xf32>
    %371 = tpu.matmul %369, %370, %cst_253 {dimension_numbers = #tpu.dot_dimension_numbers<[1], [0], [0], [1], [0, 0, 1, 1], [], []>} : vector<8x32xf32>, vector<32x32xf32>, vector<8x32xf32> -> vector<8x32xf32>
    %c0_254 = arith.constant 0 : index
    %c0_255 = arith.constant 0 : index
    %372 = vector.load %arg22[%c0_254, %c0_255] : memref<1x32xf32, #tpu.memory_space<vmem>>, vector<1x32xf32>
    %373 = vector.broadcast %372 : vector<1x32xf32> to vector<8x32xf32>
    %374 = arith.addf %371, %373 : vector<8x32xf32>
    %375 = math.tanh %374 : vector<8x32xf32>
    %c0_256 = arith.constant 0 : index
    %c0_257 = arith.constant 0 : index
    %376 = vector.load %arg23[%c0_256, %c0_257] : memref<1x32xf32, #tpu.memory_space<vmem>>, vector<1x32xf32>
    %377 = vector.broadcast %376 : vector<1x32xf32> to vector<8x32xf32>
    %378 = arith.mulf %375, %377 : vector<8x32xf32>
    %cst_258 = arith.constant dense<0.000000e+00> : vector<8xf32>
    %379 = vector.multi_reduction <add>, %378, %cst_258 [1] : vector<8x32xf32> to vector<8xf32>
    %380 = vector.shape_cast %379 : vector<8xf32> to vector<8x1xf32>
    %c0_259 = arith.constant 0 : index
    %c0_260 = arith.constant 0 : index
    %381 = vector.load %arg24[%c0_259, %c0_260] : memref<1x1xf32, #tpu.memory_space<vmem>>, vector<1x1xf32>
    %382 = vector.broadcast %381 : vector<1x1xf32> to vector<8x1xf32>
    %383 = arith.addf %380, %382 : vector<8x1xf32>
    %c0_261 = arith.constant 0 : index
    %c0_262 = arith.constant 0 : index
    %384 = vector.load %arg25[%c0_261, %c0_262] : memref<8x1xf32, #tpu.memory_space<vmem>>, vector<8x1xf32>
    tpu.vector_store %arg25[%c0_261, %c0_262], %383 {strides = array<i32>} : memref<8x1xf32, #tpu.memory_space<vmem>>, vector<8x1xf32>,
    return
  }
  func.func @transform_0(%arg0: i32) -> (i32, i32) {
    %c0_i32 = arith.constant 0 : i32
    %c0_i32_0 = arith.constant 0 : i32
    %c0_i32_1 = arith.constant 0 : i32
    return %c0_i32, %c0_i32_0 : i32, i32
  }
  func.func @transform_1(%arg0: i32) -> (i32, i32, i32) {
    %c0_i32 = arith.constant 0 : i32
    %c0_i32_0 = arith.constant 0 : i32
    %c0_i32_1 = arith.constant 0 : i32
    %c0_i32_2 = arith.constant 0 : i32
    return %c0_i32, %c0_i32_0, %c0_i32_1 : i32, i32, i32
  }
  func.func @transform_2(%arg0: i32) -> (i32, i32) {
    %c0_i32 = arith.constant 0 : i32
    %c0_i32_0 = arith.constant 0 : i32
    %c0_i32_1 = arith.constant 0 : i32
    return %c0_i32, %c0_i32_0 : i32, i32
  }
  func.func @transform_3(%arg0: i32) -> (i32, i32) {
    %c0_i32 = arith.constant 0 : i32
    %c0_i32_0 = arith.constant 0 : i32
    %c0_i32_1 = arith.constant 0 : i32
    return %c0_i32, %c0_i32_0 : i32, i32
  }
  func.func @transform_4(%arg0: i32) -> (i32, i32, i32, i32) {
    %c0_i32 = arith.constant 0 : i32
    %c0_i32_0 = arith.constant 0 : i32
    %c0_i32_1 = arith.constant 0 : i32
    %c0_i32_2 = arith.constant 0 : i32
    %c0_i32_3 = arith.constant 0 : i32
    return %c0_i32, %c0_i32_0, %c0_i32_1, %c0_i32_2 : i32, i32, i32, i32
  }
  func.func @transform_5(%arg0: i32) -> (i32, i32, i32, i32) {
    %c0_i32 = arith.constant 0 : i32
    %c0_i32_0 = arith.constant 0 : i32
    %c0_i32_1 = arith.constant 0 : i32
    %c0_i32_2 = arith.constant 0 : i32
    %c0_i32_3 = arith.constant 0 : i32
    return %c0_i32, %c0_i32_0, %c0_i32_1, %c0_i32_2 : i32, i32, i32, i32
  }
  func.func @transform_6(%arg0: i32) -> (i32, i32, i32, i32) {
    %c0_i32 = arith.constant 0 : i32
    %c0_i32_0 = arith.constant 0 : i32
    %c0_i32_1 = arith.constant 0 : i32
    %c0_i32_2 = arith.constant 0 : i32
    %c0_i32_3 = arith.constant 0 : i32
    return %c0_i32, %c0_i32_0, %c0_i32_1, %c0_i32_2 : i32, i32, i32, i32
  }
  func.func @transform_7(%arg0: i32) -> (i32, i32, i32, i32) {
    %c0_i32 = arith.constant 0 : i32
    %c0_i32_0 = arith.constant 0 : i32
    %c0_i32_1 = arith.constant 0 : i32
    %c0_i32_2 = arith.constant 0 : i32
    %c0_i32_3 = arith.constant 0 : i32
    return %c0_i32, %c0_i32_0, %c0_i32_1, %c0_i32_2 : i32, i32, i32, i32
  }
  func.func @transform_8(%arg0: i32) -> (i32, i32, i32, i32) {
    %c0_i32 = arith.constant 0 : i32
    %c0_i32_0 = arith.constant 0 : i32
    %c0_i32_1 = arith.constant 0 : i32
    %c0_i32_2 = arith.constant 0 : i32
    %c0_i32_3 = arith.constant 0 : i32
    return %c0_i32, %c0_i32_0, %c0_i32_1, %c0_i32_2 : i32, i32, i32, i32
  }
  func.func @transform_9(%arg0: i32) -> (i32, i32, i32, i32) {
    %c0_i32 = arith.constant 0 : i32
    %c0_i32_0 = arith.constant 0 : i32
    %c0_i32_1 = arith.constant 0 : i32
    %c0_i32_2 = arith.constant 0 : i32
    %c0_i32_3 = arith.constant 0 : i32
    return %c0_i32, %c0_i32_0, %c0_i32_1, %c0_i32_2 : i32, i32, i32, i32
  }
  func.func @transform_10(%arg0: i32) -> (i32, i32, i32, i32) {
    %c0_i32 = arith.constant 0 : i32
    %c0_i32_0 = arith.constant 0 : i32
    %c0_i32_1 = arith.constant 0 : i32
    %c0_i32_2 = arith.constant 0 : i32
    %c0_i32_3 = arith.constant 0 : i32
    return %c0_i32, %c0_i32_0, %c0_i32_1, %c0_i32_2 : i32, i32, i32, i32
  }
  func.func @transform_11(%arg0: i32) -> (i32, i32, i32) {
    %c0_i32 = arith.constant 0 : i32
    %c0_i32_0 = arith.constant 0 : i32
    %c0_i32_1 = arith.constant 0 : i32
    %c0_i32_2 = arith.constant 0 : i32
    return %c0_i32, %c0_i32_0, %c0_i32_1 : i32, i32, i32
  }
  func.func @transform_12(%arg0: i32) -> (i32, i32, i32) {
    %c0_i32 = arith.constant 0 : i32
    %c0_i32_0 = arith.constant 0 : i32
    %c0_i32_1 = arith.constant 0 : i32
    %c0_i32_2 = arith.constant 0 : i32
    return %c0_i32, %c0_i32_0, %c0_i32_1 : i32, i32, i32
  }
  func.func @transform_13(%arg0: i32) -> (i32, i32, i32) {
    %c0_i32 = arith.constant 0 : i32
    %c0_i32_0 = arith.constant 0 : i32
    %c0_i32_1 = arith.constant 0 : i32
    %c0_i32_2 = arith.constant 0 : i32
    return %c0_i32, %c0_i32_0, %c0_i32_1 : i32, i32, i32
  }
  func.func @transform_14(%arg0: i32) -> (i32, i32, i32) {
    %c0_i32 = arith.constant 0 : i32
    %c0_i32_0 = arith.constant 0 : i32
    %c0_i32_1 = arith.constant 0 : i32
    %c0_i32_2 = arith.constant 0 : i32
    return %c0_i32, %c0_i32_0, %c0_i32_1 : i32, i32, i32
  }
  func.func @transform_15(%arg0: i32) -> (i32, i32, i32) {
    %c0_i32 = arith.constant 0 : i32
    %c0_i32_0 = arith.constant 0 : i32
    %c0_i32_1 = arith.constant 0 : i32
    %c0_i32_2 = arith.constant 0 : i32
    return %c0_i32, %c0_i32_0, %c0_i32_1 : i32, i32, i32
  }
  func.func @transform_16(%arg0: i32) -> (i32, i32, i32) {
    %c0_i32 = arith.constant 0 : i32
    %c0_i32_0 = arith.constant 0 : i32
    %c0_i32_1 = arith.constant 0 : i32
    %c0_i32_2 = arith.constant 0 : i32
    return %c0_i32, %c0_i32_0, %c0_i32_1 : i32, i32, i32
  }
  func.func @transform_17(%arg0: i32) -> (i32, i32, i32) {
    %c0_i32 = arith.constant 0 : i32
    %c0_i32_0 = arith.constant 0 : i32
    %c0_i32_1 = arith.constant 0 : i32
    %c0_i32_2 = arith.constant 0 : i32
    return %c0_i32, %c0_i32_0, %c0_i32_1 : i32, i32, i32
  }
  func.func @transform_18(%arg0: i32) -> (i32, i32, i32) {
    %c0_i32 = arith.constant 0 : i32
    %c0_i32_0 = arith.constant 0 : i32
    %c0_i32_1 = arith.constant 0 : i32
    %c0_i32_2 = arith.constant 0 : i32
    return %c0_i32, %c0_i32_0, %c0_i32_1 : i32, i32, i32
  }
  func.func @transform_19(%arg0: i32) -> (i32, i32, i32) {
    %c0_i32 = arith.constant 0 : i32
    %c0_i32_0 = arith.constant 0 : i32
    %c0_i32_1 = arith.constant 0 : i32
    %c0_i32_2 = arith.constant 0 : i32
    return %c0_i32, %c0_i32_0, %c0_i32_1 : i32, i32, i32
  }
  func.func @transform_20(%arg0: i32) -> (i32, i32) {
    %c0_i32 = arith.constant 0 : i32
    %c0_i32_0 = arith.constant 0 : i32
    %c0_i32_1 = arith.constant 0 : i32
    return %c0_i32, %c0_i32_0 : i32, i32
  }
  func.func @transform_21(%arg0: i32) -> (i32, i32) {
    %c0_i32 = arith.constant 0 : i32
    %c0_i32_0 = arith.constant 0 : i32
    %c0_i32_1 = arith.constant 0 : i32
    return %c0_i32, %c0_i32_0 : i32, i32
  }
  func.func @transform_22(%arg0: i32) -> (i32, i32) {
    %c0_i32 = arith.constant 0 : i32
    %c0_i32_0 = arith.constant 0 : i32
    %c0_i32_1 = arith.constant 0 : i32
    return %c0_i32, %c0_i32_0 : i32, i32
  }
  func.func @transform_23(%arg0: i32) -> (i32, i32) {
    %c0_i32 = arith.constant 0 : i32
    %c0_i32_0 = arith.constant 0 : i32
    %c0_i32_1 = arith.constant 0 : i32
    return %c0_i32, %c0_i32_0 : i32, i32
  }
  func.func @transform_24(%arg0: i32) -> (i32, i32) {
    %c0_i32 = arith.constant 0 : i32
    %c0_i32_0 = arith.constant 0 : i32
    %c0_i32_1 = arith.constant 0 : i32
    return %c0_i32, %c0_i32_0 : i32, i32
  }
}

</mosaic_0001>

<bundles_post_ra>
// kernel: tpu_custom_call.1
= control target key start
LH: loop header
LB: loop body
LE: loop exit
PB: predicated region body
PF: predicated region fallthrough
CT: control target
= control target key end

     0   :  { %vm89_vm0 = vcmask 261120   ;;  %vm10614_vm1 = vmmov 0   ;;  %vm603_vm2 = vcmask 130048   ;;  %vm1276_vm3 = vcmask 64512   ;;  %s12528_s0 = inlined_call_operand.vmem [shape: f32[64,32], index: 0, kind: input, shape index: {}]   ;;  %s12529_s4 = inlined_call_operand.vmem [shape: f32[2,2,32,16], index: 4, kind: input, shape index: {}]   ;;  %s12530_s6 = inlined_call_operand.vmem [shape: f32[2,2,32,16], index: 6, kind: input, shape index: {}]   ;;  %s12531_s8 = inlined_call_operand.vmem [shape: f32[2,2,32,16], index: 8, kind: input, shape index: {}]   ;;  %s12532_s2 = inlined_call_operand.vmem [shape: f32[1,32], index: 2, kind: input, shape index: {}]   ;;  %s12533_s3 = inlined_call_operand.vmem [shape: f32[1,32], index: 3, kind: input, shape index: {}]   ;;  %s12534_s7 = inlined_call_operand.vmem [shape: f32[2,2,1,16], index: 7, kind: input, shape index: {}]   ;;  %s12535_s5 = inlined_call_operand.vmem [shape: f32[2,2,1,16], index: 5, kind: input, shape index: {}]   ;;  %s12536_s9 = inlined_call_operand.vmem [shape: f32[2,2,1,16], index: 9, kind: input, shape index: {}]   ;;  %s12537_s1 = inlined_call_operand.vmem [shape: f32[8,1,8], index: 1, kind: input, shape index: {}]   ;;  %s12538_s10 = inlined_call_operand.vmem [shape: f32[2,2,16,32], index: 10, kind: input, shape index: {}]   ;;  %s12539_s11 = inlined_call_operand.vmem [shape: f32[2,1,32], index: 11, kind: input, shape index: {}]   ;;  %s12540_s14 = inlined_call_operand.vmem [shape: f32[2,32,64], index: 14, kind: input, shape index: {}]   ;;  %s12541_s12 = inlined_call_operand.vmem [shape: f32[2,1,32], index: 12, kind: input, shape index: {}]   ;;  %s12542_s13 = inlined_call_operand.vmem [shape: f32[2,1,32], index: 13, kind: input, shape index: {}]   ;;  %s12543_s16 = inlined_call_operand.vmem [shape: f32[2,64,32], index: 16, kind: input, shape index: {}]   ;;  %s12544_s15 = inlined_call_operand.vmem [shape: f32[2,1,64], index: 15, kind: input, shape index: {}]   ;;  %s12545_s17 = inlined_call_operand.vmem [shape: f32[2,1,32], index: 17, kind: input, shape index: {}]   ;;  %s12546_s18 = inlined_call_operand.vmem [shape: f32[2,1,32], index: 18, kind: input, shape index: {}]   ;;  %s12547_s19 = inlined_call_operand.vmem [shape: f32[2,1,32], index: 19, kind: input, shape index: {}]   ;;  %s12548_s20 = inlined_call_operand.vmem [shape: f32[32,32], index: 20, kind: input, shape index: {}]   ;;  %s12549_s23 = inlined_call_operand.<no memory space> [shape: f32[1,1], index: 23, kind: input, shape index: {}]   ;;  %s12550_s21 = inlined_call_operand.vmem [shape: f32[1,32], index: 21, kind: input, shape index: {}]   ;;  %s12551_s22 = inlined_call_operand.vmem [shape: f32[1,32], index: 22, kind: input, shape index: {}]   ;;  %s12552_s24 = inlined_call_operand.vmem [shape: f32[8,1], index: 24, kind: output, shape index: {}]  }
   0x1   :  { %12560 = sst [smem:[#allocation4_spill]] %s12528_s0  ;;  %vm4246_vm4 = vcmask 523264   ;;  %vm8885_vm5 = vcmask 7168  }
   0x2   :  { %12561 = sst [smem:[#allocation5_spill]] %s12529_s4 }
   0x3   :  { %12562 = sst [smem:[#allocation6_spill]] %s12530_s6 }
   0x4   :  { %12563 = sst [smem:[#allocation7_spill]] %s12531_s8 }
   0x5   :  { %12564 = sst [smem:[#allocation8_spill]] %s12532_s2 }
   0x6   :  { %12565 = sst [smem:[#allocation9_spill]] %s12533_s3 }
   0x7   :  { %12566 = sst [smem:[#allocation10_spill]] %s12534_s7 }
   0x8   :  { %12567 = sst [smem:[#allocation11_spill]] %s12535_s5 }
   0x9   :  { %12568 = sst [smem:[#allocation12_spill]] %s12536_s9 }
   0xa   :  { %s12569_s27 = sld [smem:[#allocation4_spill]] }
   0xb   :  { %s12570_s7 = sld [smem:[#allocation5_spill]] }
   0xc   :  { %s12571_s0 = sld [smem:[#allocation6_spill]] }
   0xd   :  { %s12572_s30 = sld [smem:[#allocation7_spill]] }
   0xe   :  { %s12573_s9 = sld [smem:[#allocation8_spill]] }
   0xf   :  { %s12574_s3 = sld [smem:[#allocation9_spill]] }
  0x10   :  { %v79_v0 = vld [vmem:[%s12569_s27] sm:$0xff]  ;;  %v81_v1 = vld [vmem:[%s12569_s27 + $0x10] sm:$0xff]  ;;  %v80_v2 = vld [vmem:[%s12569_s27 + $0x8] sm:$0xff]  ;;  %s12577_s28 = sld [smem:[#allocation12_spill]] }
  0x11   :  { %v90_v3 = vsel %vm89_vm0, %v79_v0, 0.0  ;;  %v96_v4 = vsel %vm89_vm0, %v81_v1, 0.0  ;;  %v82_v5 = vld [vmem:[%s12569_s27 + $0x18] sm:$0xff]  ;;  %v93_v6 = vsel %vm89_vm0, %v80_v2, 0.0  ;;  %v83_v8 = vld [vmem:[%s12569_s27 + $0x20] sm:$0xff]  ;;  %v84_v9 = vld [vmem:[%s12569_s27 + $0x28] sm:$0xff] }
  0x12   :  { %91 = vadd.xlane.f32.xlu0 %v90_v3  ;;  %97 = vadd.xlane.f32.xlu1 %v96_v4  ;;  %v99_v7 = vsel %vm89_vm0, %v82_v5, 0.0  ;;  %v102_v10 = vsel %vm89_vm0, %v83_v8, 0.0  ;;  %v105_v11 = vsel %vm89_vm0, %v84_v9, 0.0  ;;  %v85_v12 = vld [vmem:[%s12569_s27 + $0x30] sm:$0xff]  ;;  %v86_v13 = vld [vmem:[%s12569_s27 + $0x38] sm:$0xff]  ;;  %v232_v60 = vld [vmem:[%s12570_s7 + $0x8] sm:$0xff] }
  0x13   :  { %v108_v14 = vsel %vm89_vm0, %v85_v12, 0.0  ;;  %v111_v15 = vsel %vm89_vm0, %v86_v13, 0.0  ;;  %v234_v56 = vld [vmem:[%s12570_s7 + $0x18] sm:$0xff]  ;;  %v233_v58 = vld [vmem:[%s12570_s7 + $0x10] sm:$0xff]  ;;  %v372_v61 = vld [vmem:[%s12571_s0 + $0x8] sm:$0xff] }
  0x14   :  { %v374_v57 = vld [vmem:[%s12571_s0 + $0x18] sm:$0xff]  ;;  %9630 = vmatprep.subr.mxu0 %v234_v56  ;;  %v373_v59 = vld [vmem:[%s12571_s0 + $0x10] sm:$0xff]  ;;  %v231_v62 = vld [vmem:[%s12570_s7] sm:$0xff] }
  0x15   :  { %9650 = vmatprep.subr.mxu1 %v374_v57  ;;  %9631 = vmatpush3.msra.mxu0 %v234_v56  ;;  %v371_v63 = vld [vmem:[%s12571_s0] sm:$0xff]  ;;  %v488_v56 = vld [vmem:[%s12572_s30 + $0x8] sm:$0xff] }
  0x16   :  { %94 = vadd.xlane.f32.xlu0 %v93_v6  ;;  %100 = vadd.xlane.f32.xlu1 %v99_v7 }
  0x17   :  { %9651 = vmatpush3.msra.mxu1 %v374_v57  ;;  %9632 = vmatprep.subr.mxu0 %v233_v58 }
  0x18   :  { %9652 = vmatprep.subr.mxu1 %v373_v59  ;;  %9633 = vmatpush3.msra.mxu0 %v233_v58 }
  0x19   :  { %9653 = vmatpush3.msra.mxu1 %v373_v59  ;;  %9634 = vmatprep.subr.mxu0 %v232_v60 }
  0x1a   :  { %103 = vadd.xlane.f32.xlu0 %v102_v10  ;;  %106 = vadd.xlane.f32.xlu1 %v105_v11 }
  0x1b   :  { %9654 = vmatprep.subr.mxu1 %v372_v61  ;;  %9635 = vmatpush3.msra.mxu0 %v232_v60 }
  0x1c   :  { %9655 = vmatpush3.msra.mxu1 %v372_v61  ;;  %9636 = vmatprep.subr.mxu0 %v231_v62  ;;  %v487_v61 = vld [vmem:[%s12572_s30] sm:$0xff] }
  0x1d   :  { %9656 = vmatprep.subr.mxu1 %v371_v63  ;;  %9637 = vmatpush3.msra.mxu0 %v231_v62  ;;  %v10613_v62 = vmov 0.0  }
  0x1e   :  { %109 = vadd.xlane.f32.xlu0 %v108_v14  ;;  %112 = vadd.xlane.f32.xlu1 %v111_v15 }
  0x1f   :  { %9657 = vmatpush3.msra.mxu1 %v371_v63 }
  0x20   :  { %9690 = vmatprep.subr.mxu1 %v10613_v62 }
  0x9b   :  { %v92_v16 = vpop.xlane.xlu0 %91  ;;  %v98_v17 = vpop.xlane.xlu1 %97 }
  0x9c   :  { %v115_v18 = vmul.f32 0.03125, %v92_v16  ;;  %v117_v19 = vmul.f32 0.03125, %v98_v17 }
  0x9e   :  { %v10772_v20 = vsub.f32 %v79_v0, %v115_v18  ;;  %v10774_v21 = vsub.f32 %v81_v1, %v117_v19  ;;  %v10839_v0 = vld [vmem:[%s12572_s30 + $0x18] sm:$0xff] }
  0x9f   :  { %v95_v22 = vpop.xlane.xlu0 %94  ;;  %v101_v23 = vpop.xlane.xlu1 %100  ;;  %9670 = vmatprep.subr.mxu0 %v10839_v0 }
  0xa0   :  { %v116_v24 = vmul.f32 0.03125, %v95_v22  ;;  %v118_v25 = vmul.f32 0.03125, %v101_v23  ;;  %v131_v26 = vmul.f32 %v10772_v20, %v10772_v20  ;;  %v133_v27 = vmul.f32 %v10774_v21, %v10774_v21 }
  0xa2   :  { %v10780_v28 = vsub.f32 %v80_v2, %v116_v24  ;;  %v10782_v29 = vsub.f32 %v82_v5, %v118_v25  ;;  %v139_v30 = vsel %vm89_vm0, %v131_v26, 0.0  ;;  %v145_v33 = vsel %vm89_vm0, %v133_v27, 0.0  ;;  %v8891_v27 = vld [vmem:[%s12573_s9] ss:$0 sm:$0xff]  ;;  %s12575_s9 = sld [smem:[#allocation10_spill]] }
  0xa3   :  { %140 = vadd.xlane.f32.xlu0 %v139_v30  ;;  %v104_v31 = vpop.xlane.xlu0 %103  ;;  %v107_v32 = vpop.xlane.xlu1 %106 }
  0xa4   :  { %v119_v34 = vmul.f32 0.03125, %v104_v31  ;;  %v120_v35 = vmul.f32 0.03125, %v107_v32  ;;  %v132_v36 = vmul.f32 %v10780_v28, %v10780_v28  ;;  %v134_v37 = vmul.f32 %v10782_v29, %v10782_v29  ;;  %v8892_v32 = vld [vmem:[%s12574_s3] ss:$0 sm:$0xff]  ;;  %s12576_s3 = sld [smem:[#allocation11_spill]] }
  0xa6   :  { %v10790_v38 = vsub.f32 %v83_v8, %v119_v34  ;;  %v10792_v39 = vsub.f32 %v84_v9, %v120_v35  ;;  %v142_v40 = vsel %vm89_vm0, %v132_v36, 0.0  ;;  %v148_v43 = vsel %vm89_vm0, %v134_v37, 0.0 }
  0xa7   :  { %146 = vadd.xlane.f32.xlu0 %v145_v33  ;;  %143 = vadd.xlane.f32.xlu1 %v142_v40  ;;  %v110_v41 = vpop.xlane.xlu0 %109  ;;  %v113_v42 = vpop.xlane.xlu1 %112 }
  0xa8   :  { %v121_v44 = vmul.f32 0.03125, %v110_v41  ;;  %v122_v45 = vmul.f32 0.03125, %v113_v42  ;;  %v135_v46 = vmul.f32 %v10790_v38, %v10790_v38  ;;  %v136_v47 = vmul.f32 %v10792_v39, %v10792_v39 }
  0xaa   :  { %v10800_v48 = vsub.f32 %v85_v12, %v121_v44  ;;  %v10802_v49 = vsub.f32 %v86_v13, %v122_v45  ;;  %v151_v50 = vsel %vm89_vm0, %v135_v46, 0.0  ;;  %v154_v51 = vsel %vm89_vm0, %v136_v47, 0.0 }
  0xab   :  { %149 = vadd.xlane.f32.xlu1 %v148_v43  ;;  %152 = vadd.xlane.f32.xlu0 %v151_v50 }
  0xac   :  { %v137_v52 = vmul.f32 %v10800_v48, %v10800_v48  ;;  %v138_v53 = vmul.f32 %v10802_v49, %v10802_v49 }
  0xae   :  { %v157_v54 = vsel %vm89_vm0, %v137_v52, 0.0  ;;  %v160_v55 = vsel %vm89_vm0, %v138_v53, 0.0 }
  0xaf   :  { %155 = vadd.xlane.f32.xlu1 %v154_v51  ;;  %158 = vadd.xlane.f32.xlu0 %v157_v54 }
  0xb3   :  { %161 = vadd.xlane.f32.xlu1 %v160_v55 }
 0x12c   :  { %v141_v1 = vpop.xlane.xlu0 %140 }
 0x12d   :  { %v163_v2 = vmul.f32 0.03125, %v141_v1  ;;  %v10939_v1 = vld [vmem:[%s12575_s9] ss:$0 sm:$0xff] }
 0x12f   :  { %v171_v3 = vadd.f32 1e-12, %v163_v2 }
 0x130   :  { %v144_v4 = vpop.xlane.xlu1 %143  ;;  %v147_v5 = vpop.xlane.xlu0 %146 }
 0x131   :  { %10363 = vrsqrt.f32 %v171_v3  ;;  %v164_v6 = vmul.f32 0.03125, %v144_v4  ;;  %v165_v7 = vmul.f32 0.03125, %v147_v5 }
 0x133   :  { %v172_v8 = vadd.f32 1e-12, %v164_v6  ;;  %v173_v9 = vadd.f32 1e-12, %v165_v7  ;;  %v10945_v7 = vld [vmem:[%s12576_s3] ss:$0 sm:$0xff] }
 0x134   :  { %v150_v10 = vpop.xlane.xlu1 %149  ;;  %v153_v11 = vpop.xlane.xlu0 %152 }
 0x135   :  { %10365 = vrsqrt.f32 %v172_v8  ;;  %v166_v12 = vmul.f32 0.03125, %v150_v10  ;;  %v167_v13 = vmul.f32 0.03125, %v153_v11 }
 0x136   :  { %10367 = vrsqrt.f32 %v173_v9 }
 0x137   :  { %v174_v14 = vadd.f32 1e-12, %v166_v12  ;;  %v175_v15 = vadd.f32 1e-12, %v167_v13 }
 0x138   :  { %v156_v16 = vpop.xlane.xlu1 %155  ;;  %v159_v17 = vpop.xlane.xlu0 %158 }
 0x139   :  { %10369 = vrsqrt.f32 %v174_v14  ;;  %v168_v18 = vmul.f32 0.03125, %v156_v16  ;;  %v169_v19 = vmul.f32 0.03125, %v159_v17 }
 0x13a   :  { %10371 = vrsqrt.f32 %v175_v15 }
 0x13b   :  { %v176_v22 = vadd.f32 1e-12, %v168_v18  ;;  %v177_v23 = vadd.f32 1e-12, %v169_v19 }
 0x13c   :  { %v162_v24 = vpop.xlane.xlu1 %161 }
 0x13d   :  { %10373 = vrsqrt.f32 %v176_v22  ;;  %v170_v25 = vmul.f32 0.03125, %v162_v24 }
 0x13e   :  { %v10364_v26 = vpop.eup %10363  ;;  %10375 = vrsqrt.f32 %v177_v23 }
 0x13f   :  { %v187_v30 = vmul.f32 %v10364_v26, %v10772_v20  ;;  %v178_v31 = vadd.f32 1e-12, %v170_v25 }
 0x141   :  { %v201_v33 = vmul.f32 %v8891_v27, %v187_v30  ;;  %10377 = vrsqrt.f32 %v178_v31 }
 0x142   :  { %v10366_v34 = vpop.eup %10365 }
 0x143   :  { %v10368_v35 = vpop.eup %10367  ;;  %v10849_v36 = vadd.f32 %v8892_v32, %v201_v33  ;;  %v188_v37 = vmul.f32 %v10366_v34, %v10780_v28  ;;  %v10979_v34 = vld [vmem:[%s12577_s28] ss:$0 sm:$0xff] }
 0x144   :  { %v189_v40 = vmul.f32 %v10368_v35, %v10774_v21  ;;  %v489_v21 = vld [vmem:[%s12572_s30 + $0x10] sm:$0xff] }
 0x145   :  { %v202_v41 = vmul.f32 %v8891_v27, %v188_v37  ;;  %9638 = vmatprep.mubr.msk.f32.mxu0 %vm89_vm0, %v10849_v36  ;;  %9658 = vmatprep.mubr.msk.f32.mxu1 %vm89_vm0, %v10849_v36 }
 0x146   :  { %v10370_v20 = vpop.eup %10369  ;;  %v203_v42 = vmul.f32 %v8891_v27, %v189_v40 }
 0x147   :  { %v10372_v43 = vpop.eup %10371  ;;  %v10857_v44 = vadd.f32 %v8892_v32, %v202_v41  ;;  %v190_v45 = vmul.f32 %v10370_v20, %v10782_v29 }
 0x148   :  { %v10860_v46 = vadd.f32 %v8892_v32, %v203_v42  ;;  %v191_v28 = vmul.f32 %v10372_v43, %v10790_v38 }
 0x149   :  { %v204_v47 = vmul.f32 %v8891_v27, %v190_v45  ;;  %9639 = vmatmul.mubr.msk.f32.vlgmr.msra.gmra.mxu0 %vm89_vm0, %v10857_v44  ;;  %9659 = vmatmul.mubr.msk.f32.vlgmr.msra.gmra.mxu1 %vm89_vm0, %v10857_v44 }
 0x14a   :  { %v10374_v50 = vpop.eup %10373  ;;  %v205_v51 = vmul.f32 %v8891_v27, %v191_v28  ;;  %9641 = vmatprep.mubr.msk.f32.mxu0 %vm89_vm0, %v10860_v46  ;;  %9661 = vmatprep.mubr.msk.f32.mxu1 %vm89_vm0, %v10860_v46 }
 0x14b   :  { %v10376_v29 = vpop.eup %10375  ;;  %v10874_v38 = vadd.f32 %v8892_v32, %v204_v47  ;;  %v192_v52 = vmul.f32 %v10374_v50, %v10792_v39  ;;  %9671 = vmatpush3.msra.mxu0 %v10839_v0 }
 0x14c   :  { %v10878_v53 = vadd.f32 %v8892_v32, %v205_v51  ;;  %v193_v54 = vmul.f32 %v10376_v29, %v10800_v48  ;;  %9672 = vmatprep.subr.mxu0 %v489_v21 }
 0x14d   :  { %v206_v55 = vmul.f32 %v8891_v27, %v192_v52  ;;  %9642 = vmatmul.mubr.msk.f32.gmra.mxu0 %vm89_vm0, %v10874_v38  ;;  %9662 = vmatmul.mubr.msk.f32.gmra.mxu1 %vm89_vm0, %v10874_v38 }
 0x14e   :  { %v10378_v57 = vpop.eup %10377  ;;  %v207_v39 = vmul.f32 %v8891_v27, %v193_v54  ;;  %9644 = vmatprep.mubr.msk.f32.mxu0 %vm89_vm0, %v10878_v53  ;;  %9664 = vmatprep.mubr.msk.f32.mxu1 %vm89_vm0, %v10878_v53 }
 0x14f   :  { %v10892_v48 = vadd.f32 %v8892_v32, %v206_v55  ;;  %v194_v58 = vmul.f32 %v10378_v57, %v10802_v49  ;;  %9673 = vmatpush3.msra.mxu0 %v489_v21  ;;  %v11027_v55 = vld [vmem:[%s12537_s1] ss:$0 sm:$0xff] }
 0x150   :  { %v10895_v59 = vadd.f32 %v8892_v32, %v207_v39  ;;  %9674 = vmatprep.subr.mxu0 %v488_v56 }
 0x151   :  { %v208_v60 = vmul.f32 %v8891_v27, %v194_v58  ;;  %9645 = vmatmul.mubr.msk.f32.gmra.mxu0 %vm89_vm0, %v10892_v48  ;;  %9665 = vmatmul.mubr.msk.f32.gmra.mxu1 %vm89_vm0, %v10892_v48 }
 0x152   :  { %9647 = vmatprep.mubr.msk.f32.mxu0 %vm89_vm0, %v10895_v59  ;;  %9667 = vmatprep.mubr.msk.f32.mxu1 %vm89_vm0, %v10895_v59 }
 0x153   :  { %v10908_v49 = vadd.f32 %v8892_v32, %v208_v60  ;;  %9675 = vmatpush3.msra.mxu0 %v488_v56  ;;  %v11033_v60 = vld [vmem:[%s12537_s1 + $0x1] ss:$0 sm:$0xff] }
 0x154   :  { %9676 = vmatprep.subr.mxu0 %v487_v61 }
 0x155   :  { %9648 = vmatmul.mubr.msk.f32.gmra.mxu0 %vm89_vm0, %v10908_v49  ;;  %9668 = vmatmul.mubr.msk.f32.gmra.mxu1 %vm89_vm0, %v10908_v49 }
 0x156   :  { %9678 = vmatprep.mubr.msk.f32.mxu0 %vm89_vm0, %v10849_v36  ;;  %9677 = vmatpush3.msra.mxu0 %v487_v61 }
 0x157   :  { %9710 = vmatprep.subr.mxu0 %v10613_v62  ;;  %9692 = vmatprep.mubr.msk.f32.mxu1 %vm10614_vm1, %v10613_v62 }
 0x159   :  { %9679 = vmatmul.mubr.msk.f32.vlgmr.msra.gmra.mxu0 %vm89_vm0, %v10857_v44 }
 0x15a   :  { %9681 = vmatprep.mubr.msk.f32.mxu0 %vm89_vm0, %v10860_v46 }
 0x15d   :  { %9682 = vmatmul.mubr.msk.f32.gmra.mxu0 %vm89_vm0, %v10874_v38 }
 0x15e   :  { %9684 = vmatprep.mubr.msk.f32.mxu0 %vm89_vm0, %v10878_v53 }
 0x161   :  { %9685 = vmatmul.mubr.msk.f32.gmra.mxu0 %vm89_vm0, %v10892_v48 }
 0x162   :  { %9687 = vmatprep.mubr.msk.f32.mxu0 %vm89_vm0, %v10895_v59 }
 0x165   :  { %9688 = vmatmul.mubr.msk.f32.gmra.mxu0 %vm89_vm0, %v10908_v49 }
 0x166   :  { %9712 = vmatprep.mubr.msk.f32.mxu0 %vm10614_vm1, %v10613_v62 }
 0x209   :  { %v9640_v63 = vpop.f32.mrf.mxu0  ;;  %v9660_v0 = vpop.f32.mrf.mxu1 }
 0x20a   :  { %v454_v11 = vadd.f32 %v9660_v0, %v10939_v1  ;;  %v338_v14 = vadd.f32 %v9640_v63, %v10945_v7 }
 0x20b   :  { %v332_v2 = vpop.f32.mrf.mxu0  ;;  %v448_v3 = vpop.f32.mrf.mxu1 }
 0x20c   :  { %v449_v4 = vadd.f32 %v10939_v1, %v448_v3  ;;  %v333_v8 = vadd.f32 %v10945_v7, %v332_v2 }
 0x20d   :  { %v9643_v5 = vpop.f32.mrf.mxu0  ;;  %v9663_v6 = vpop.f32.mrf.mxu1 }
 0x20e   :  { %9691 = vmatpush3.xpose.msk.msra.mxu1 %vm603_vm2, %v449_v4  ;;  %v464_v27 = vadd.f32 %v9663_v6, %v10939_v1  ;;  %v348_v32 = vadd.f32 %v9643_v5, %v10945_v7  ;;  %v11042_v5 = vld [vmem:[%s12537_s1 + $0x2] ss:$0 sm:$0xff] }
 0x20f   :  { %v342_v9 = vpop.f32.mrf.mxu0  ;;  %v458_v10 = vpop.f32.mrf.mxu1  ;;  %9695 = vmatprep.subr.mxu1 %v10613_v62 }
 0x210   :  { %v459_v17 = vadd.f32 %v10939_v1, %v458_v10  ;;  %v343_v23 = vadd.f32 %v10945_v7, %v342_v9 }
 0x211   :  { %v9646_v12 = vpop.f32.mrf.mxu0  ;;  %v9666_v13 = vpop.f32.mrf.mxu1  ;;  %9693 = vmatmul.mubr.msk.f32.vlgmr.msra.gmra.mxu1 %vm603_vm2, %v333_v8 }
 0x212   :  { %9696 = vmatpush3.xpose.msk.msra.mxu1 %vm603_vm2, %v454_v11  ;;  %9697 = vmatprep.mubr.msk.f32.mxu1 %vm10614_vm1, %v10613_v62  ;;  %v474_v37 = vadd.f32 %v9666_v13, %v10939_v1  ;;  %v358_v42 = vadd.f32 %v9646_v12, %v10945_v7  ;;  %v11048_v11 = vld [vmem:[%s12537_s1 + $0x4] ss:$0 sm:$0xff] }
 0x213   :  { %v352_v15 = vpop.f32.mrf.mxu0  ;;  %v468_v16 = vpop.f32.mrf.mxu1  ;;  %9700 = vmatprep.subr.mxu1 %v10613_v62 }
 0x214   :  { %v469_v18 = vadd.f32 %v10939_v1, %v468_v16  ;;  %v353_v24 = vadd.f32 %v10945_v7, %v352_v15  ;;  %v11054_v15 = vld [vmem:[%s12537_s1 + $0x3] ss:$0 sm:$0xff] }
 0x215   :  { %v9649_v19 = vpop.f32.mrf.mxu0  ;;  %v9669_v22 = vpop.f32.mrf.mxu1  ;;  %9698 = vmatmul.mubr.msk.f32.vlgmr.msra.gmra.mxu1 %vm603_vm2, %v338_v14 }
 0x216   :  { %9701 = vmatpush3.xpose.msk.msra.mxu1 %vm603_vm2, %v459_v17  ;;  %9711 = vmatpush3.xpose.msk.msra.mxu0 %vm603_vm2, %v469_v18  ;;  %v484_v45 = vadd.f32 %v9669_v22, %v10939_v1  ;;  %v368_v21 = vadd.f32 %v9649_v19, %v10945_v7 }
 0x217   :  { %v362_v25 = vpop.f32.mrf.mxu0  ;;  %v478_v26 = vpop.f32.mrf.mxu1  ;;  %9702 = vmatprep.mubr.msk.f32.mxu1 %vm10614_vm1, %v10613_v62  ;;  %9705 = vmatprep.subr.mxu1 %v10613_v62 }
 0x218   :  { %v479_v30 = vadd.f32 %v10939_v1, %v478_v26  ;;  %9720 = vmatprep.subr.mxu0 %v10613_v62  ;;  %v363_v33 = vadd.f32 %v10945_v7, %v362_v25 }
 0x219   :  { %v9680_v31 = vpop.f32.mrf.mxu0  ;;  %9703 = vmatmul.mubr.msk.f32.vlgmr.msra.gmra.mxu1 %vm603_vm2, %v343_v23  ;;  %9713 = vmatmul.mubr.msk.f32.vlgmr.msra.gmra.mxu0 %vm603_vm2, %v353_v24  ;;  %v11061_v24 = vld [vmem:[%s12537_s1 + $0x6] ss:$0 sm:$0xff] }
 0x21a   :  { %9706 = vmatpush3.xpose.msk.msra.mxu1 %vm603_vm2, %v464_v27  ;;  %9721 = vmatpush3.xpose.msk.msra.mxu0 %vm603_vm2, %v479_v30  ;;  %v570_v51 = vadd.f32 %v9680_v31, %v10979_v34  ;;  %v11067_v27 = vld [vmem:[%s12537_s1 + $0x5] ss:$0 sm:$0xff] }
 0x21b   :  { %v564_v35 = vpop.f32.mrf.mxu0  ;;  %9707 = vmatprep.mubr.msk.f32.mxu1 %vm10614_vm1, %v10613_v62  ;;  %9722 = vmatprep.mubr.msk.f32.mxu0 %vm10614_vm1, %v10613_v62 }
 0x21c   :  { %v565_v40 = vadd.f32 %v10979_v34, %v564_v35  ;;  %9715 = vmatprep.subr.mxu1 %v10613_v62  ;;  %9730 = vmatprep.subr.mxu0 %v10613_v62 }
 0x21d   :  { %v9683_v41 = vpop.f32.mrf.mxu0  ;;  %9708 = vmatmul.mubr.msk.f32.vlgmr.msra.gmra.mxu1 %vm603_vm2, %v348_v32  ;;  %9723 = vmatmul.mubr.msk.f32.vlgmr.msra.gmra.mxu0 %vm603_vm2, %v363_v33 }
 0x21e   :  { %v10992_v20 = vadd.f32 %v9683_v41, %v10979_v34  ;;  %9716 = vmatpush3.xpose.msk.msra.mxu1 %vm603_vm2, %v474_v37  ;;  %9731 = vmatpush3.msra.mxu0 %v565_v40  ;;  %v11076_v41 = vld [vmem:[%s12537_s1 + $0x7] ss:$0 sm:$0xff] }
 0x21f   :  { %v10996_v43 = vpop.f32.mrf.mxu0  ;;  %9717 = vmatprep.mubr.msk.f32.mxu1 %vm10614_vm1, %v10613_v62  ;;  %9725 = vmatprep.subr.mxu1 %v10613_v62 }
 0x220   :  { %9732 = vmatprep.mubr.msk.f32.mxu0 %vm10614_vm1, %v10613_v62  ;;  %9740 = vmatprep.subr.mxu0 %v10613_v62 }
 0x221   :  { %v9686_v28 = vpop.f32.mrf.mxu0  ;;  %9718 = vmatmul.mubr.msk.f32.vlgmr.msra.gmra.mxu1 %vm603_vm2, %v358_v42 }
 0x222   :  { %v11007_v47 = vadd.f32 %v9686_v28, %v10979_v34  ;;  %9726 = vmatpush3.xpose.msk.msra.mxu1 %vm603_vm2, %v484_v45  ;;  %9727 = vmatprep.mubr.msk.f32.mxu1 %vm10614_vm1, %v10613_v62 }
 0x223   :  { %v11013_v50 = vpop.f32.mrf.mxu0  ;;  %9735 = vmatprep.subr.mxu1 %v10613_v62 }
 0x225   :  { %v9689_v29 = vpop.f32.mrf.mxu0  ;;  %9728 = vmatmul.mubr.msk.f32.vlgmr.msra.gmra.mxu1 %vm603_vm2, %v368_v21 }
 0x226   :  { %v11019_v52 = vadd.f32 %v9689_v29, %v10979_v34  ;;  %9736 = vmatpush3.msra.mxu1 %v570_v51  ;;  %9737 = vmatprep.mubr.msk.f32.mxu1 %vm10614_vm1, %v10613_v62 }
 0x227   :  { %9745 = vmatprep.subr.mxu1 %v10613_v62  ;;  %v11036_v0 = vpop.f32.mrf.mxu0 }
 0x2d1   :  { %v676_v54 = vpop.f32.mrf.mxu1 }
 0x2d2   :  { %v1212_v56 = vmul.f32 0.25, %v676_v54 }
 0x2d3   :  { %v9694_v57 = vpop.f32.mrf.mxu1 }
 0x2d4   :  { %v1268_v39 = vadd.f32 %v11027_v55, %v1212_v56 }
 0x2d5   :  { %v752_v58 = vpop.f32.mrf.mxu1 }
 0x2d6   :  { %v1213_v61 = vmul.f32 0.25, %v752_v58  ;;  %v1277_v63 = vsel %vm1276_vm3, %v1268_v39, -inf }
 0x2d7   :  { %1278 = vmax.xlane.f32.xlu1 %v1277_v63  ;;  %v9699_v1 = vpop.f32.mrf.mxu1 }
 0x2d8   :  { %v1269_v2 = vadd.f32 %v11033_v60, %v1213_v61 }
 0x2d9   :  { %v828_v3 = vpop.f32.mrf.mxu1  ;;  %v980_v4 = vpop.f32.mrf.mxu0 }
 0x2da   :  { %v1214_v6 = vmul.f32 0.25, %v828_v3  ;;  %v1216_v7 = vmul.f32 0.25, %v980_v4  ;;  %v1280_v8 = vsel %vm1276_vm3, %v1269_v2, -inf }
 0x2db   :  { %1281 = vmax.xlane.f32.xlu0 %v1280_v8  ;;  %v9704_v9 = vpop.f32.mrf.mxu1  ;;  %v9714_v10 = vpop.f32.mrf.mxu0 }
 0x2dc   :  { %v1270_v12 = vadd.f32 %v11042_v5, %v1214_v6  ;;  %v1272_v19 = vadd.f32 %v11048_v11, %v1216_v7 }
 0x2dd   :  { %v904_v13 = vpop.f32.mrf.mxu1  ;;  %v1132_v14 = vpop.f32.mrf.mxu0 }
 0x2de   :  { %v1215_v16 = vmul.f32 0.25, %v904_v13  ;;  %v1218_v17 = vmul.f32 0.25, %v1132_v14  ;;  %v1283_v18 = vsel %vm1276_vm3, %v1270_v12, -inf  ;;  %v1289_v32 = vsel %vm1276_vm3, %v1272_v19, -inf }
 0x2df   :  { %1284 = vmax.xlane.f32.xlu1 %v1283_v18  ;;  %v9709_v22 = vpop.f32.mrf.mxu1  ;;  %v9724_v23 = vpop.f32.mrf.mxu0 }
 0x2e0   :  { %v1271_v25 = vadd.f32 %v11054_v15, %v1215_v16  ;;  %v1274_v33 = vadd.f32 %v11061_v24, %v1218_v17 }
 0x2e1   :  { %v1056_v26 = vpop.f32.mrf.mxu1 }
 0x2e2   :  { %v1217_v30 = vmul.f32 0.25, %v1056_v26  ;;  %v1286_v31 = vsel %vm1276_vm3, %v1271_v25, -inf  ;;  %v1295_v28 = vsel %vm1276_vm3, %v1274_v33, -inf }
 0x2e3   :  { %1287 = vmax.xlane.f32.xlu0 %v1286_v31  ;;  %v9719_v35 = vpop.f32.mrf.mxu1  ;;  %1290 = vmax.xlane.f32.xlu1 %v1289_v32 }
 0x2e4   :  { %v1273_v37 = vadd.f32 %v11067_v27, %v1217_v30 }
 0x2e5   :  { %v1208_v40 = vpop.f32.mrf.mxu1 }
 0x2e6   :  { %v1219_v42 = vmul.f32 0.25, %v1208_v40  ;;  %v1292_v45 = vsel %vm1276_vm3, %v1273_v37, -inf }
 0x2e7   :  { %1293 = vmax.xlane.f32.xlu0 %v1292_v45  ;;  %v9729_v21 = vpop.f32.mrf.mxu1  ;;  %1296 = vmax.xlane.f32.xlu1 %v1295_v28 }
 0x2e8   :  { %v1275_v51 = vadd.f32 %v11076_v41, %v1219_v42 }
 0x2ea   :  { %v1298_v29 = vsel %vm1276_vm3, %v1275_v51, -inf }
 0x2eb   :  { %1299 = vmax.xlane.f32.xlu0 %v1298_v29 }
 0x360   :  { %v1279_v54 = vpop.xlane.xlu1 %1278 }
 0x361   :  { %v1301_v56 = vsub.f32 %v1268_v39, %v1279_v54 }
 0x363   :  { %v1309_v57 = vmul.f32 1.442695, %v1301_v56 }
 0x364   :  { %v1282_v58 = vpop.xlane.xlu0 %1281 }
 0x365   :  { %10379 = vpow2.f32 %v1309_v57  ;;  %v1302_v61 = vsub.f32 %v1269_v2, %v1282_v58 }
 0x367   :  { %v1311_v63 = vmul.f32 1.442695, %v1302_v61 }
 0x368   :  { %v1285_v1 = vpop.xlane.xlu1 %1284 }
 0x369   :  { %10381 = vpow2.f32 %v1311_v63  ;;  %v1303_v3 = vsub.f32 %v1270_v12, %v1285_v1 }
 0x36b   :  { %v1313_v4 = vmul.f32 1.442695, %v1303_v3  ;;  %v575_v3 = vadd.f32 %v10979_v34, %v10996_v43 }
 0x36c   :  { %v1288_v6 = vpop.xlane.xlu0 %1287  ;;  %v1291_v7 = vpop.xlane.xlu1 %1290 }
 0x36d   :  { %10383 = vpow2.f32 %v1313_v4  ;;  %v1304_v8 = vsub.f32 %v1271_v25, %v1288_v6  ;;  %v1305_v9 = vsub.f32 %v1272_v19, %v1291_v7 }
 0x36f   :  { %v1315_v10 = vmul.f32 1.442695, %v1304_v8  ;;  %v1317_v13 = vmul.f32 1.442695, %v1305_v9 }
 0x370   :  { %v1294_v14 = vpop.xlane.xlu0 %1293  ;;  %v1297_v16 = vpop.xlane.xlu1 %1296 }
 0x371   :  { %10385 = vpow2.f32 %v1315_v10  ;;  %v1306_v39 = vsub.f32 %v1273_v37, %v1294_v14  ;;  %v1307_v17 = vsub.f32 %v1274_v33, %v1297_v16 }
 0x372   :  { %v10380_v18 = vpop.eup %10379  ;;  %10387 = vpow2.f32 %v1317_v13  ;;  %v585_v13 = vadd.f32 %v10979_v34, %v11013_v50  ;;  %v8955_v50 = vld [vmem:[%s12570_s7 + $0x38] sm:$0xff] }
 0x373   :  { %v1319_v2 = vmul.f32 1.442695, %v1306_v39  ;;  %v1321_v22 = vmul.f32 1.442695, %v1307_v17  ;;  %v1325_v23 = vsel %vm1276_vm3, %v10380_v18, 0.0  ;;  %v595_v17 = vadd.f32 %v10979_v34, %v11036_v0 }
 0x374   :  { %v1300_v12 = vpop.xlane.xlu0 %1299  ;;  %1326 = vadd.xlane.f32.xlu1 %v1325_v23  ;;  %v8969_v23 = vld [vmem:[%s12571_s0 + $0x38] sm:$0xff] }
 0x375   :  { %10389 = vpow2.f32 %v1319_v2  ;;  %v1308_v26 = vsub.f32 %v1275_v51, %v1300_v12  ;;  %v8953_v12 = vld [vmem:[%s12570_s7 + $0x28] sm:$0xff] }
 0x376   :  { %v10382_v30 = vpop.eup %10381  ;;  %10391 = vpow2.f32 %v1321_v22 }
 0x377   :  { %v1323_v19 = vmul.f32 1.442695, %v1308_v26  ;;  %v1328_v25 = vsel %vm1276_vm3, %v10382_v30, 0.0 }
 0x378   :  { %1329 = vadd.xlane.f32.xlu0 %v1328_v25  ;;  %v8983_v25 = vld [vmem:[%s12572_s30 + $0x38] sm:$0xff] }
 0x379   :  { %10393 = vpow2.f32 %v1323_v19  ;;  %v8967_v19 = vld [vmem:[%s12571_s0 + $0x28] sm:$0xff] }
 0x37a   :  { %v10384_v31 = vpop.eup %10383 }
 0x37b   :  { %v1331_v32 = vsel %vm1276_vm3, %v10384_v31, 0.0 }
 0x37c   :  { %1332 = vadd.xlane.f32.xlu1 %v1331_v32  ;;  %v8982_v32 = vld [vmem:[%s12572_s30 + $0x30] sm:$0xff] }
 0x37e   :  { %v10386_v33 = vpop.eup %10385 }
 0x37f   :  { %v10388_v35 = vpop.eup %10387  ;;  %v1334_v37 = vsel %vm1276_vm3, %v10386_v33, 0.0 }
 0x380   :  { %1335 = vadd.xlane.f32.xlu0 %v1334_v37  ;;  %v1337_v40 = vsel %vm1276_vm3, %v10388_v35, 0.0 }
 0x381   :  { %1338 = vadd.xlane.f32.xlu1 %v1337_v40 }
 0x382   :  { %v10390_v42 = vpop.eup %10389 }
 0x383   :  { %v10392_v45 = vpop.eup %10391  ;;  %v1340_v28 = vsel %vm1276_vm3, %v10390_v42, 0.0 }
 0x384   :  { %1341 = vadd.xlane.f32.xlu0 %v1340_v28  ;;  %v1343_v21 = vsel %vm1276_vm3, %v10392_v45, 0.0 }
 0x385   :  { %1344 = vadd.xlane.f32.xlu1 %v1343_v21 }
 0x386   :  { %v11089_v51 = vpop.eup %10393 }
 0x387   :  { %v1346_v29 = vsel %vm1276_vm3, %v11089_v51, 0.0 }
 0x388   :  { %1347 = vadd.xlane.f32.xlu0 %v1346_v29 }
 0x3fd   :  { %v1327_v54 = vpop.xlane.xlu1 %1326 }
 0x3fe   :  { %10395 = vrcp.f32 %v1327_v54 }
 0x401   :  { %v1330_v56 = vpop.xlane.xlu0 %1329 }
 0x402   :  { %10397 = vrcp.f32 %v1330_v56 }
 0x405   :  { %v1333_v57 = vpop.xlane.xlu1 %1332 }
 0x406   :  { %10399 = vrcp.f32 %v1333_v57 }
 0x409   :  { %v1336_v58 = vpop.xlane.xlu0 %1335 }
 0x40a   :  { %10401 = vrcp.f32 %v1336_v58  ;;  %v1339_v61 = vpop.xlane.xlu1 %1338 }
 0x40b   :  { %v10396_v63 = vpop.eup %10395  ;;  %10403 = vrcp.f32 %v1339_v61 }
 0x40c   :  { %v1357_v1 = vmul.f32 %v10396_v63, %v10380_v18 }
 0x40d   :  { %v1342_v4 = vpop.xlane.xlu0 %1341 }
 0x40e   :  { %10405 = vrcp.f32 %v1342_v4  ;;  %v1345_v6 = vpop.xlane.xlu1 %1344  ;;  %9733 = vmatmul.mubr.msk.f32.vlgmr.msra.gmra.mxu0 %vm1276_vm3, %v1357_v1 }
 0x40f   :  { %v10398_v7 = vpop.eup %10397  ;;  %10407 = vrcp.f32 %v1345_v6  ;;  %9741 = vmatpush3.msra.mxu0 %v575_v3  ;;  %9742 = vmatprep.mubr.msk.f32.mxu0 %vm10614_vm1, %v10613_v62 }
 0x410   :  { %v1358_v8 = vmul.f32 %v10398_v7, %v10382_v30  ;;  %9750 = vmatprep.subr.mxu0 %v10613_v62  ;;  %v8968_v30 = vld [vmem:[%s12571_s0 + $0x30] sm:$0xff] }
 0x411   :  { %v1348_v9 = vpop.xlane.xlu0 %1347 }
 0x412   :  { %10409 = vrcp.f32 %v1348_v9  ;;  %9738 = vmatmul.mubr.msk.f32.vlgmr.msra.gmra.mxu1 %vm1276_vm3, %v1358_v8 }
 0x413   :  { %v10400_v10 = vpop.eup %10399  ;;  %9746 = vmatpush3.msra.mxu1 %v10992_v20  ;;  %9747 = vmatprep.mubr.msk.f32.mxu1 %vm10614_vm1, %v10613_v62 }
 0x414   :  { %v1359_v43 = vmul.f32 %v10400_v10, %v10384_v31  ;;  %9755 = vmatprep.subr.mxu1 %v10613_v62  ;;  %v8966_v31 = vld [vmem:[%s12571_s0 + $0x20] sm:$0xff] }
 0x415   :  { %v11236_v10 = vld [vmem:[%s12575_s9 + $0x1] ss:$0 sm:$0xff] }
 0x416   :  { %9743 = vmatmul.mubr.msk.f32.vlgmr.msra.gmra.mxu0 %vm1276_vm3, %v1359_v43 }
 0x417   :  { %v10402_v14 = vpop.eup %10401  ;;  %9751 = vmatpush3.msra.mxu0 %v585_v13  ;;  %9752 = vmatprep.mubr.msk.f32.mxu0 %vm10614_vm1, %v10613_v62 }
 0x418   :  { %v10404_v16 = vpop.eup %10403  ;;  %9760 = vmatprep.subr.mxu0 %v10613_v62  ;;  %v1360_v20 = vmul.f32 %v10402_v14, %v10386_v33  ;;  %v8981_v33 = vld [vmem:[%s12572_s30 + $0x28] sm:$0xff] }
 0x419   :  { %v1361_v39 = vmul.f32 %v10404_v16, %v10388_v35  ;;  %v8980_v35 = vld [vmem:[%s12572_s30 + $0x20] sm:$0xff] }
 0x41a   :  { %9748 = vmatmul.mubr.msk.f32.vlgmr.msra.gmra.mxu1 %vm1276_vm3, %v1360_v20  ;;  %v11242_v20 = vld [vmem:[%s12576_s3 + $0x1] ss:$0 sm:$0xff] }
 0x41b   :  { %v10406_v18 = vpop.eup %10405  ;;  %9753 = vmatmul.mubr.msk.f32.vlgmr.msra.gmra.mxu0 %vm1276_vm3, %v1361_v39  ;;  %9756 = vmatpush3.msra.mxu1 %v11007_v47  ;;  %v8954_v47 = vld [vmem:[%s12570_s7 + $0x30] sm:$0xff] }
 0x41c   :  { %v10408_v2 = vpop.eup %10407  ;;  %9761 = vmatpush3.msra.mxu0 %v595_v17  ;;  %9757 = vmatprep.mubr.msk.f32.mxu1 %vm10614_vm1, %v10613_v62  ;;  %v1362_v22 = vmul.f32 %v10406_v18, %v10390_v42 }
 0x41d   :  { %9762 = vmatprep.mubr.msk.f32.mxu0 %vm10614_vm1, %v10613_v62  ;;  %9765 = vmatprep.subr.mxu1 %v10613_v62  ;;  %v1363_v34 = vmul.f32 %v10408_v2, %v10392_v45 }
 0x41e   :  { %9770 = vmatprep.subr.mxu0 %v8955_v50  ;;  %9758 = vmatmul.mubr.msk.f32.vlgmr.msra.gmra.mxu1 %vm1276_vm3, %v1362_v22 }
 0x41f   :  { %v10410_v0 = vpop.eup %10409  ;;  %9763 = vmatmul.mubr.msk.f32.vlgmr.msra.gmra.mxu0 %vm1276_vm3, %v1363_v34  ;;  %9766 = vmatpush3.msra.mxu1 %v11019_v52  ;;  %v8952_v52 = vld [vmem:[%s12570_s7 + $0x20] sm:$0xff] }
 0x420   :  { %9771 = vmatpush3.msra.mxu0 %v8955_v50  ;;  %9778 = vmatprep.mubr.msk.f32.mxu0 %vm89_vm0, %v10849_v36  ;;  %v1364_v26 = vmul.f32 %v10410_v0, %v11089_v51 }
 0x421   :  { %9772 = vmatprep.subr.mxu0 %v8954_v47  ;;  %9767 = vmatprep.mubr.msk.f32.mxu1 %vm10614_vm1, %v10613_v62 }
 0x422   :  { %9773 = vmatpush3.msra.mxu0 %v8954_v47  ;;  %9790 = vmatprep.subr.mxu1 %v8969_v23 }
 0x423   :  { %9774 = vmatprep.subr.mxu0 %v8953_v12  ;;  %9768 = vmatmul.mubr.msk.f32.vlgmr.msra.gmra.mxu1 %vm1276_vm3, %v1364_v26 }
 0x424   :  { %9775 = vmatpush3.msra.mxu0 %v8953_v12  ;;  %9791 = vmatpush3.msra.mxu1 %v8969_v23 }
 0x425   :  { %9776 = vmatprep.subr.mxu0 %v8952_v52  ;;  %9792 = vmatprep.subr.mxu1 %v8968_v30 }
 0x426   :  { %9798 = vmatprep.mubr.msk.f32.mxu1 %vm89_vm0, %v10849_v36  ;;  %9777 = vmatpush3.msra.mxu0 %v8952_v52 }
 0x427   :  { %9793 = vmatpush3.msra.mxu1 %v8968_v30  ;;  %9779 = vmatmul.mubr.msk.f32.vlgmr.msra.gmra.mxu0 %vm89_vm0, %v10857_v44 }
 0x428   :  { %9794 = vmatprep.subr.mxu1 %v8967_v19  ;;  %9781 = vmatprep.mubr.msk.f32.mxu0 %vm89_vm0, %v10860_v46 }
 0x429   :  { %9795 = vmatpush3.msra.mxu1 %v8967_v19  ;;  %9810 = vmatprep.subr.mxu0 %v8983_v25 }
 0x42a   :  { %9796 = vmatprep.subr.mxu1 %v8966_v31  ;;  %9811 = vmatpush3.msra.mxu0 %v8983_v25 }
 0x42b   :  { %9797 = vmatpush3.msra.mxu1 %v8966_v31  ;;  %9782 = vmatmul.mubr.msk.f32.gmra.mxu0 %vm89_vm0, %v10874_v38 }
 0x42c   :  { %9799 = vmatmul.mubr.msk.f32.vlgmr.msra.gmra.mxu1 %vm89_vm0, %v10857_v44  ;;  %9784 = vmatprep.mubr.msk.f32.mxu0 %vm89_vm0, %v10878_v53 }
 0x42d   :  { %9801 = vmatprep.mubr.msk.f32.mxu1 %vm89_vm0, %v10860_v46  ;;  %9812 = vmatprep.subr.mxu0 %v8982_v32 }
 0x42e   :  { %9813 = vmatpush3.msra.mxu0 %v8982_v32  ;;  %9830 = vmatprep.subr.mxu1 %v10613_v62 }
 0x42f   :  { %9785 = vmatmul.mubr.msk.f32.gmra.mxu0 %vm89_vm0, %v10892_v48  ;;  %9814 = vmatprep.subr.mxu0 %v8981_v33 }
 0x430   :  { %9802 = vmatmul.mubr.msk.f32.gmra.mxu1 %vm89_vm0, %v10874_v38  ;;  %9787 = vmatprep.mubr.msk.f32.mxu0 %vm89_vm0, %v10895_v59 }
 0x431   :  { %9804 = vmatprep.mubr.msk.f32.mxu1 %vm89_vm0, %v10878_v53  ;;  %9815 = vmatpush3.msra.mxu0 %v8981_v33  ;;  %v11268_v33 = vld [vmem:[%s12577_s28 + $0x1] ss:$0 sm:$0xff] }
 0x432   :  { %9816 = vmatprep.subr.mxu0 %v8980_v35 }
 0x433   :  { %9788 = vmatmul.mubr.msk.f32.gmra.mxu0 %vm89_vm0, %v10908_v49 }
 0x434   :  { %9805 = vmatmul.mubr.msk.f32.gmra.mxu1 %vm89_vm0, %v10892_v48  ;;  %9818 = vmatprep.mubr.msk.f32.mxu0 %vm89_vm0, %v10849_v36 }
 0x435   :  { %9807 = vmatprep.mubr.msk.f32.mxu1 %vm89_vm0, %v10895_v59  ;;  %9817 = vmatpush3.msra.mxu0 %v8980_v35 }
 0x436   :  { %9850 = vmatprep.subr.mxu0 %v10613_v62 }
 0x437   :  { %9819 = vmatmul.mubr.msk.f32.vlgmr.msra.gmra.mxu0 %vm89_vm0, %v10857_v44 }
 0x438   :  { %9808 = vmatmul.mubr.msk.f32.gmra.mxu1 %vm89_vm0, %v10908_v49  ;;  %9821 = vmatprep.mubr.msk.f32.mxu0 %vm89_vm0, %v10860_v46 }
 0x439   :  { %9832 = vmatprep.mubr.msk.f32.mxu1 %vm10614_vm1, %v10613_v62 }
 0x43b   :  { %9822 = vmatmul.mubr.msk.f32.gmra.mxu0 %vm89_vm0, %v10874_v38 }
 0x43c   :  { %9824 = vmatprep.mubr.msk.f32.mxu0 %vm89_vm0, %v10878_v53 }
 0x43f   :  { %9825 = vmatmul.mubr.msk.f32.gmra.mxu0 %vm89_vm0, %v10892_v48 }
 0x440   :  { %9827 = vmatprep.mubr.msk.f32.mxu0 %vm89_vm0, %v10895_v59 }
 0x443   :  { %9828 = vmatmul.mubr.msk.f32.gmra.mxu0 %vm89_vm0, %v10908_v49 }
 0x444   :  { %9852 = vmatprep.mubr.msk.f32.mxu0 %vm10614_vm1, %v10613_v62 }
 0x4ce   :  { %v11217_v37 = vpop.f32.mrf.mxu0 }
 0x4d0   :  { %v9734_v40 = vpop.f32.mrf.mxu0 }
 0x4d2   :  { %v11219_v42 = vpop.f32.mrf.mxu1 }
 0x4d4   :  { %v9739_v45 = vpop.f32.mrf.mxu1 }
 0x4d6   :  { %v11221_v28 = vpop.f32.mrf.mxu0 }
 0x4d8   :  { %v9744_v21 = vpop.f32.mrf.mxu0 }
 0x4da   :  { %v11223_v51 = vpop.f32.mrf.mxu1 }
 0x4db   :  { %v11225_v29 = vpop.f32.mrf.mxu0 }
 0x4dc   :  { %v9749_v54 = vpop.f32.mrf.mxu1 }
 0x4dd   :  { %v9754_v56 = vpop.f32.mrf.mxu0 }
 0x4de   :  { %v11227_v57 = vpop.f32.mrf.mxu1 }
 0x4df   :  { %v11229_v58 = vpop.f32.mrf.mxu0 }
 0x4e0   :  { %v9759_v61 = vpop.f32.mrf.mxu1 }
 0x4e1   :  { %v9764_v63 = vpop.f32.mrf.mxu0 }
 0x4e3   :  { %v11231_v1 = vpop.f32.mrf.mxu1 }
 0x4e5   :  { %v9769_v3 = vpop.f32.mrf.mxu1 }
 0x4e7   :  { %v9780_v4 = vpop.f32.mrf.mxu0 }
 0x4e8   :  { %v2036_v47 = vadd.f32 %v9780_v4, %v11242_v20 }
 0x4e9   :  { %v2030_v6 = vpop.f32.mrf.mxu0 }
 0x4ea   :  { %v2031_v17 = vadd.f32 %v11242_v20, %v2030_v6 }
 0x4eb   :  { %v9783_v7 = vpop.f32.mrf.mxu0 }
 0x4ec   :  { %v9800_v8 = vpop.f32.mrf.mxu1  ;;  %v2046_v54 = vadd.f32 %v9783_v7, %v11242_v20 }
 0x4ed   :  { %v2040_v9 = vpop.f32.mrf.mxu0  ;;  %v2154_v50 = vadd.f32 %v9800_v8, %v11236_v10 }
 0x4ee   :  { %v2148_v43 = vpop.f32.mrf.mxu1  ;;  %v2041_v19 = vadd.f32 %v11242_v20, %v2040_v9 }
 0x4ef   :  { %v2149_v13 = vadd.f32 %v11236_v10, %v2148_v43  ;;  %v9786_v14 = vpop.f32.mrf.mxu0 }
 0x4f0   :  { %v9803_v16 = vpop.f32.mrf.mxu1  ;;  %v2056_v8 = vadd.f32 %v9786_v14, %v11242_v20 }
 0x4f1   :  { %9831 = vmatpush3.xpose.msk.msra.mxu1 %vm603_vm2, %v2149_v13  ;;  %v2050_v39 = vpop.f32.mrf.mxu0  ;;  %v2164_v32 = vadd.f32 %v9803_v16, %v11236_v10 }
 0x4f2   :  { %v2158_v18 = vpop.f32.mrf.mxu1  ;;  %9835 = vmatprep.subr.mxu1 %v10613_v62  ;;  %v2051_v25 = vadd.f32 %v11242_v20, %v2050_v39 }
 0x4f3   :  { %v9789_v2 = vpop.f32.mrf.mxu0  ;;  %v2159_v23 = vadd.f32 %v11236_v10, %v2158_v18 }
 0x4f4   :  { %v9806_v22 = vpop.f32.mrf.mxu1  ;;  %9833 = vmatmul.mubr.msk.f32.vlgmr.msra.gmra.mxu1 %vm603_vm2, %v2031_v17  ;;  %v2066_v14 = vadd.f32 %v9789_v2, %v11242_v20 }
 0x4f5   :  { %9836 = vmatpush3.xpose.msk.msra.mxu1 %vm603_vm2, %v2154_v50  ;;  %v2060_v34 = vpop.f32.mrf.mxu0  ;;  %9837 = vmatprep.mubr.msk.f32.mxu1 %vm10614_vm1, %v10613_v62  ;;  %v2174_v63 = vadd.f32 %v9806_v22, %v11236_v10 }
 0x4f6   :  { %v2168_v0 = vpop.f32.mrf.mxu1  ;;  %9840 = vmatprep.subr.mxu1 %v10613_v62  ;;  %v2061_v56 = vadd.f32 %v11242_v20, %v2060_v34 }
 0x4f7   :  { %v2169_v12 = vadd.f32 %v11236_v10, %v2168_v0  ;;  %v9820_v26 = vpop.f32.mrf.mxu0 }
 0x4f8   :  { %v9809_v52 = vpop.f32.mrf.mxu1  ;;  %9838 = vmatmul.mubr.msk.f32.vlgmr.msra.gmra.mxu1 %vm603_vm2, %v2036_v47 }
 0x4f9   :  { %9841 = vmatpush3.xpose.msk.msra.mxu1 %vm603_vm2, %v2159_v23  ;;  %9851 = vmatpush3.xpose.msk.msra.mxu0 %vm603_vm2, %v2169_v12  ;;  %v2266_v30 = vpop.f32.mrf.mxu0  ;;  %v2184_v43 = vadd.f32 %v9809_v52, %v11236_v10 }
 0x4fa   :  { %v2178_v31 = vpop.f32.mrf.mxu1  ;;  %9842 = vmatprep.mubr.msk.f32.mxu1 %vm10614_vm1, %v10613_v62  ;;  %9845 = vmatprep.subr.mxu1 %v10613_v62  ;;  %v2267_v3 = vadd.f32 %v11268_v33, %v2266_v30 }
 0x4fb   :  { %v2179_v35 = vadd.f32 %v11236_v10, %v2178_v31  ;;  %v9823_v40 = vpop.f32.mrf.mxu0  ;;  %9860 = vmatprep.subr.mxu0 %v10613_v62  ;;  %v2272_v10 = vadd.f32 %v9820_v26, %v11268_v33 }
 0x4fc   :  { %v11273_v45 = vadd.f32 %v9823_v40, %v11268_v33  ;;  %9843 = vmatmul.mubr.msk.f32.vlgmr.msra.gmra.mxu1 %vm603_vm2, %v2041_v19  ;;  %9853 = vmatmul.mubr.msk.f32.vlgmr.msra.gmra.mxu0 %vm603_vm2, %v2051_v25 }
 0x4fd   :  { %9846 = vmatpush3.xpose.msk.msra.mxu1 %vm603_vm2, %v2164_v32  ;;  %9861 = vmatpush3.xpose.msk.msra.mxu0 %vm603_vm2, %v2179_v35  ;;  %v2276_v21 = vpop.f32.mrf.mxu0 }
 0x4fe   :  { %v11282_v61 = vadd.f32 %v11268_v33, %v2276_v21  ;;  %9847 = vmatprep.mubr.msk.f32.mxu1 %vm10614_vm1, %v10613_v62  ;;  %9862 = vmatprep.mubr.msk.f32.mxu0 %vm10614_vm1, %v10613_v62 }
 0x4ff   :  { %v9826_v4 = vpop.f32.mrf.mxu0  ;;  %9855 = vmatprep.subr.mxu1 %v10613_v62  ;;  %9870 = vmatprep.subr.mxu0 %v10613_v62 }
 0x500   :  { %v11293_v6 = vadd.f32 %v9826_v4, %v11268_v33  ;;  %9848 = vmatmul.mubr.msk.f32.vlgmr.msra.gmra.mxu1 %vm603_vm2, %v2046_v54  ;;  %9863 = vmatmul.mubr.msk.f32.vlgmr.msra.gmra.mxu0 %vm603_vm2, %v2061_v56 }
 0x501   :  { %9856 = vmatpush3.xpose.msk.msra.mxu1 %vm603_vm2, %v2174_v63  ;;  %9871 = vmatpush3.msra.mxu0 %v2267_v3  ;;  %v2286_v7 = vpop.f32.mrf.mxu0 }
 0x502   :  { %v11300_v9 = vadd.f32 %v11268_v33, %v2286_v7  ;;  %9857 = vmatprep.mubr.msk.f32.mxu1 %vm10614_vm1, %v10613_v62  ;;  %9865 = vmatprep.subr.mxu1 %v10613_v62 }
 0x503   :  { %v9829_v13 = vpop.f32.mrf.mxu0  ;;  %9872 = vmatprep.mubr.msk.f32.mxu0 %vm10614_vm1, %v10613_v62  ;;  %9880 = vmatprep.subr.mxu0 %v10613_v62 }
 0x504   :  { %v11310_v16 = vadd.f32 %v9829_v13, %v11268_v33  ;;  %9858 = vmatmul.mubr.msk.f32.vlgmr.msra.gmra.mxu1 %vm603_vm2, %v2056_v8 }
 0x505   :  { %9866 = vmatpush3.xpose.msk.msra.mxu1 %vm603_vm2, %v2184_v43  ;;  %9867 = vmatprep.mubr.msk.f32.mxu1 %vm10614_vm1, %v10613_v62  ;;  %v11325_v2 = vpop.f32.mrf.mxu0 }
 0x506   :  { %9875 = vmatprep.subr.mxu1 %v10613_v62 }
 0x508   :  { %9868 = vmatmul.mubr.msk.f32.vlgmr.msra.gmra.mxu1 %vm603_vm2, %v2066_v14 }
 0x509   :  { %9876 = vmatpush3.msra.mxu1 %v2272_v10  ;;  %9877 = vmatprep.mubr.msk.f32.mxu1 %vm10614_vm1, %v10613_v62 }
 0x50a   :  { %9885 = vmatprep.subr.mxu1 %v10613_v62 }
 0x5b4   :  { %v2377_v39 = vpop.f32.mrf.mxu1 }
 0x5b5   :  { %v2913_v17 = vmul.f32 0.25, %v2377_v39 }
 0x5b6   :  { %v9834_v18 = vpop.f32.mrf.mxu1 }
 0x5b7   :  { %v2921_v50 = vadd.f32 %v11027_v55, %v2913_v17 }
 0x5b8   :  { %v2453_v22 = vpop.f32.mrf.mxu1 }
 0x5b9   :  { %v2914_v34 = vmul.f32 0.25, %v2453_v22  ;;  %v2929_v20 = vsel %vm1276_vm3, %v2921_v50, -inf }
 0x5ba   :  { %2930 = vmax.xlane.f32.xlu0 %v2929_v20  ;;  %v9839_v47 = vpop.f32.mrf.mxu1 }
 0x5bb   :  { %v2922_v0 = vadd.f32 %v11033_v60, %v2914_v34 }
 0x5bc   :  { %v2529_v23 = vpop.f32.mrf.mxu1  ;;  %v2681_v12 = vpop.f32.mrf.mxu0 }
 0x5bd   :  { %v2915_v26 = vmul.f32 0.25, %v2529_v23  ;;  %v2917_v52 = vmul.f32 0.25, %v2681_v12  ;;  %v2932_v30 = vsel %vm1276_vm3, %v2922_v0, -inf }
 0x5be   :  { %v9854_v19 = vpop.f32.mrf.mxu0  ;;  %2933 = vmax.xlane.f32.xlu1 %v2932_v30  ;;  %v9844_v25 = vpop.f32.mrf.mxu1 }
 0x5bf   :  { %v2923_v55 = vadd.f32 %v11042_v5, %v2915_v26  ;;  %v2925_v54 = vadd.f32 %v11048_v11, %v2917_v52 }
 0x5c0   :  { %v2605_v31 = vpop.f32.mrf.mxu1  ;;  %v2833_v32 = vpop.f32.mrf.mxu0 }
 0x5c1   :  { %v2916_v35 = vmul.f32 0.25, %v2605_v31  ;;  %v2919_v40 = vmul.f32 0.25, %v2833_v32  ;;  %v2935_v21 = vsel %vm1276_vm3, %v2923_v55, -inf  ;;  %v2941_v7 = vsel %vm1276_vm3, %v2925_v54, -inf }
 0x5c2   :  { %v9864_v60 = vpop.f32.mrf.mxu0  ;;  %2936 = vmax.xlane.f32.xlu0 %v2935_v21  ;;  %v9849_v56 = vpop.f32.mrf.mxu1 }
 0x5c3   :  { %v2924_v63 = vadd.f32 %v11054_v15, %v2916_v35  ;;  %v2927_v5 = vadd.f32 %v11061_v24, %v2919_v40 }
 0x5c4   :  { %v2757_v3 = vpop.f32.mrf.mxu1 }
 0x5c5   :  { %v2918_v4 = vmul.f32 0.25, %v2757_v3  ;;  %v2938_v8 = vsel %vm1276_vm3, %v2924_v63, -inf  ;;  %v2947_v10 = vsel %vm1276_vm3, %v2927_v5, -inf }
 0x5c6   :  { %2942 = vmax.xlane.f32.xlu0 %v2941_v7  ;;  %2939 = vmax.xlane.f32.xlu1 %v2938_v8  ;;  %v9859_v43 = vpop.f32.mrf.mxu1 }
 0x5c7   :  { %v2926_v13 = vadd.f32 %v11067_v27, %v2918_v4 }
 0x5c8   :  { %v2909_v14 = vpop.f32.mrf.mxu1 }
 0x5c9   :  { %v2920_v11 = vmul.f32 0.25, %v2909_v14  ;;  %v2944_v39 = vsel %vm1276_vm3, %v2926_v13, -inf }
 0x5ca   :  { %2948 = vmax.xlane.f32.xlu0 %v2947_v10  ;;  %2945 = vmax.xlane.f32.xlu1 %v2944_v39  ;;  %v9869_v15 = vpop.f32.mrf.mxu1 }
 0x5cb   :  { %v2928_v17 = vadd.f32 %v11076_v41, %v2920_v11 }
 0x5cd   :  { %v2950_v18 = vsel %vm1276_vm3, %v2928_v17, -inf }
 0x5ce   :  { %2951 = vmax.xlane.f32.xlu1 %v2950_v18 }
 0x643   :  { %v2931_v24 = vpop.xlane.xlu0 %2930 }
 0x644   :  { %v2953_v22 = vsub.f32 %v2921_v50, %v2931_v24 }
 0x646   :  { %v2961_v34 = vmul.f32 1.442695, %v2953_v22 }
 0x647   :  { %v2934_v20 = vpop.xlane.xlu1 %2933 }
 0x648   :  { %10411 = vpow2.f32 %v2961_v34  ;;  %v2954_v27 = vsub.f32 %v2922_v0, %v2934_v20 }
 0x64a   :  { %v2963_v47 = vmul.f32 1.442695, %v2954_v27 }
 0x64b   :  { %v2937_v23 = vpop.xlane.xlu0 %2936 }
 0x64c   :  { %10413 = vpow2.f32 %v2963_v47  ;;  %v2955_v12 = vsub.f32 %v2923_v55, %v2937_v23 }
 0x64e   :  { %v2965_v26 = vmul.f32 1.442695, %v2955_v12 }
 0x64f   :  { %v2943_v52 = vpop.xlane.xlu0 %2942  ;;  %v2940_v30 = vpop.xlane.xlu1 %2939 }
 0x650   :  { %10415 = vpow2.f32 %v2965_v26  ;;  %v2957_v19 = vsub.f32 %v2925_v54, %v2943_v52  ;;  %v2956_v25 = vsub.f32 %v2924_v63, %v2940_v30 }
 0x652   :  { %v2969_v41 = vmul.f32 1.442695, %v2957_v19  ;;  %v2967_v31 = vmul.f32 1.442695, %v2956_v25 }
 0x653   :  { %v2949_v32 = vpop.xlane.xlu0 %2948  ;;  %v2946_v35 = vpop.xlane.xlu1 %2945 }
 0x654   :  { %10417 = vpow2.f32 %v2969_v41  ;;  %v2959_v50 = vsub.f32 %v2927_v5, %v2949_v32  ;;  %v2958_v40 = vsub.f32 %v2926_v13, %v2946_v35 }
 0x655   :  { %v10412_v21 = vpop.eup %10411  ;;  %10419 = vpow2.f32 %v2967_v31 }
 0x656   :  { %v2973_v0 = vmul.f32 1.442695, %v2959_v50  ;;  %v2971_v60 = vmul.f32 1.442695, %v2958_v40  ;;  %v2977_v56 = vsel %vm1276_vm3, %v10412_v21, 0.0 }
 0x657   :  { %2978 = vadd.xlane.f32.xlu0 %v2977_v56  ;;  %v2952_v55 = vpop.xlane.xlu1 %2951 }
 0x658   :  { %10421 = vpow2.f32 %v2973_v0  ;;  %v2960_v3 = vsub.f32 %v2928_v17, %v2952_v55  ;;  %v1949_v0 = vld [vmem:[%s12538_s10] sm:$0xff] }
 0x659   :  { %v10414_v4 = vpop.eup %10413  ;;  %10423 = vpow2.f32 %v2971_v60 }
 0x65a   :  { %v2975_v54 = vmul.f32 1.442695, %v2960_v3  ;;  %v2980_v63 = vsel %vm1276_vm3, %v10414_v4, 0.0 }
 0x65b   :  { %2981 = vadd.xlane.f32.xlu1 %v2980_v63 }
 0x65c   :  { %10425 = vpow2.f32 %v2975_v54 }
 0x65d   :  { %v10416_v7 = vpop.eup %10415 }
 0x65e   :  { %v2983_v8 = vsel %vm1276_vm3, %v10416_v7, 0.0 }
 0x65f   :  { %2984 = vadd.xlane.f32.xlu0 %v2983_v8 }
 0x661   :  { %v10418_v5 = vpop.eup %10417 }
 0x662   :  { %v10420_v43 = vpop.eup %10419  ;;  %v2989_v13 = vsel %vm1276_vm3, %v10418_v5, 0.0 }
 0x663   :  { %2990 = vadd.xlane.f32.xlu0 %v2989_v13  ;;  %v2986_v14 = vsel %vm1276_vm3, %v10420_v43, 0.0 }
 0x664   :  { %2987 = vadd.xlane.f32.xlu1 %v2986_v14 }
 0x665   :  { %v10422_v11 = vpop.eup %10421 }
 0x666   :  { %v10424_v10 = vpop.eup %10423  ;;  %v2995_v39 = vsel %vm1276_vm3, %v10422_v11, 0.0 }
 0x667   :  { %2996 = vadd.xlane.f32.xlu0 %v2995_v39  ;;  %v2992_v15 = vsel %vm1276_vm3, %v10424_v10, 0.0 }
 0x668   :  { %2993 = vadd.xlane.f32.xlu1 %v2992_v15 }
 0x669   :  { %v10426_v17 = vpop.eup %10425 }
 0x66a   :  { %v2998_v18 = vsel %vm1276_vm3, %v10426_v17, 0.0 }
 0x66c   :  { %2999 = vadd.xlane.f32.xlu1 %v2998_v18 }
 0x6e0   :  { %v2979_v24 = vpop.xlane.xlu0 %2978 }
 0x6e1   :  { %10427 = vrcp.f32 %v2979_v24 }
 0x6e4   :  { %v2982_v22 = vpop.xlane.xlu1 %2981 }
 0x6e5   :  { %10429 = vrcp.f32 %v2982_v22 }
 0x6e8   :  { %v2985_v34 = vpop.xlane.xlu0 %2984 }
 0x6e9   :  { %10431 = vrcp.f32 %v2985_v34 }
 0x6ec   :  { %v2991_v20 = vpop.xlane.xlu0 %2990 }
 0x6ed   :  { %10433 = vrcp.f32 %v2991_v20  ;;  %v2988_v27 = vpop.xlane.xlu1 %2987 }
 0x6ee   :  { %v10428_v47 = vpop.eup %10427  ;;  %10435 = vrcp.f32 %v2988_v27 }
 0x6ef   :  { %v3009_v23 = vmul.f32 %v10428_v47, %v10412_v21 }
 0x6f0   :  { %v2997_v12 = vpop.xlane.xlu0 %2996 }
 0x6f1   :  { %10437 = vrcp.f32 %v2997_v12  ;;  %v2994_v26 = vpop.xlane.xlu1 %2993  ;;  %9873 = vmatmul.mubr.msk.f32.vlgmr.msra.gmra.mxu0 %vm1276_vm3, %v3009_v23 }
 0x6f2   :  { %v10430_v52 = vpop.eup %10429  ;;  %10439 = vrcp.f32 %v2994_v26  ;;  %9881 = vmatpush3.msra.mxu0 %v11282_v61  ;;  %9882 = vmatprep.mubr.msk.f32.mxu0 %vm10614_vm1, %v10613_v62 }
 0x6f3   :  { %v3010_v30 = vmul.f32 %v10430_v52, %v10414_v4  ;;  %9890 = vmatprep.subr.mxu0 %v10613_v62 }
 0x6f5   :  { %v3000_v19 = vpop.xlane.xlu1 %2999  ;;  %9878 = vmatmul.mubr.msk.f32.vlgmr.msra.gmra.mxu1 %vm1276_vm3, %v3010_v30 }
 0x6f6   :  { %v10432_v25 = vpop.eup %10431  ;;  %10441 = vrcp.f32 %v3000_v19  ;;  %9886 = vmatpush3.msra.mxu1 %v11273_v45  ;;  %9887 = vmatprep.mubr.msk.f32.mxu1 %vm10614_vm1, %v10613_v62  ;;  %v2297_v45 = vadd.f32 %v11268_v33, %v11325_v2  ;;  %v1950_v2 = vld [vmem:[%s12538_s10 + $0x8] sm:$0xff] }
 0x6f7   :  { %v3011_v41 = vmul.f32 %v10432_v25, %v10416_v7  ;;  %9895 = vmatprep.subr.mxu1 %v10613_v62 }
 0x6f9   :  { %9883 = vmatmul.mubr.msk.f32.vlgmr.msra.gmra.mxu0 %vm1276_vm3, %v3011_v41 }
 0x6fa   :  { %v10434_v61 = vpop.eup %10433  ;;  %9891 = vmatpush3.msra.mxu0 %v11300_v9  ;;  %9892 = vmatprep.mubr.msk.f32.mxu0 %vm10614_vm1, %v10613_v62 }
 0x6fb   :  { %v10436_v31 = vpop.eup %10435  ;;  %9900 = vmatprep.subr.mxu0 %v10613_v62  ;;  %v3013_v32 = vmul.f32 %v10434_v61, %v10418_v5 }
 0x6fc   :  { %v3012_v35 = vmul.f32 %v10436_v31, %v10420_v43 }
 0x6fd   :  { %9893 = vmatmul.mubr.msk.f32.vlgmr.msra.gmra.mxu0 %vm1276_vm3, %v3013_v32 }
 0x6fe   :  { %v10438_v50 = vpop.eup %10437  ;;  %9888 = vmatmul.mubr.msk.f32.vlgmr.msra.gmra.mxu1 %vm1276_vm3, %v3012_v35  ;;  %9901 = vmatpush3.msra.mxu0 %v2297_v45 }
 0x6ff   :  { %v10440_v40 = vpop.eup %10439  ;;  %9896 = vmatpush3.msra.mxu1 %v11293_v6  ;;  %9897 = vmatprep.mubr.msk.f32.mxu1 %vm10614_vm1, %v10613_v62  ;;  %v3015_v9 = vmul.f32 %v10438_v50, %v10422_v11  ;;  %v9036_v11 = vld [vmem:[%s12539_s11] ss:$0 sm:$0xff] }
 0x700   :  { %9902 = vmatprep.mubr.msk.f32.mxu0 %vm10614_vm1, %v10613_v62  ;;  %9905 = vmatprep.subr.mxu1 %v10613_v62  ;;  %v3014_v33 = vmul.f32 %v10440_v40, %v10424_v10 }
 0x701   :  { %9903 = vmatmul.mubr.msk.f32.vlgmr.msra.gmra.mxu0 %vm1276_vm3, %v3015_v9 }
 0x702   :  { %9898 = vmatmul.mubr.msk.f32.vlgmr.msra.gmra.mxu1 %vm1276_vm3, %v3014_v33 }
 0x703   :  { %v10442_v21 = vpop.eup %10441  ;;  %9906 = vmatpush3.msra.mxu1 %v11310_v16  ;;  %9907 = vmatprep.mubr.msk.f32.mxu1 %vm10614_vm1, %v10613_v62 }
 0x704   :  { %v3016_v6 = vmul.f32 %v10442_v21, %v10426_v17  ;;  %9926 = vmatprep.subr.mxu1 %v1950_v2 }
 0x706   :  { %9908 = vmatmul.mubr.msk.f32.vlgmr.msra.gmra.mxu1 %vm1276_vm3, %v3016_v6 }
 0x707   :  { %9927 = vmatpush3.msra.mxu1 %v1950_v2  ;;  %9930 = vmatprep.mubr.msk.f32.mxu1 %vm603_vm2, %v11217_v37  ;;  %v9019_v37 = vld [vmem:[%s12538_s10 + $0x18] sm:$0xff] }
 0x708   :  { %9928 = vmatprep.subr.mxu1 %v1949_v0  ;;  %9910 = vmatprep.subr.mxu0 %v9019_v37 }
 0x709   :  { %9929 = vmatpush3.msra.mxu1 %v1949_v0  ;;  %9911 = vmatpush3.msra.mxu0 %v9019_v37 }
 0x70a   :  { %9931 = vmatmul.mubr.msk.f32.vlgmr.msra.gmra.mxu1 %vm603_vm2, %v11219_v42  ;;  %v9018_v42 = vld [vmem:[%s12538_s10 + $0x10] sm:$0xff] }
 0x70b   :  { %9933 = vmatprep.mubr.msk.f32.mxu1 %vm603_vm2, %v11221_v28  ;;  %9912 = vmatprep.subr.mxu0 %v9018_v42 }
 0x70c   :  { %9913 = vmatpush3.msra.mxu0 %v9018_v42 }
 0x70e   :  { %9934 = vmatmul.mubr.msk.f32.gmra.mxu1 %vm603_vm2, %v11223_v51 }
 0x70f   :  { %9936 = vmatprep.mubr.msk.f32.mxu1 %vm603_vm2, %v11225_v29 }
 0x712   :  { %9937 = vmatmul.mubr.msk.f32.gmra.mxu1 %vm603_vm2, %v11227_v57 }
 0x713   :  { %9939 = vmatprep.mubr.msk.f32.mxu1 %vm603_vm2, %v11229_v58 }
 0x716   :  { %9940 = vmatmul.mubr.msk.f32.gmra.mxu1 %vm603_vm2, %v11231_v1 }
 0x7b1   :  { %v3086_v28 = vpop.f32.mrf.mxu0 }
 0x7b2   :  { %9914 = vmatprep.mubr.msk.f32.mxu0 %vm603_vm2, %v3086_v28 }
 0x7b3   :  { %v9874_v51 = vpop.f32.mrf.mxu0 }
 0x7b5   :  { %v3159_v29 = vpop.f32.mrf.mxu1 }
 0x7b6   :  { %9915 = vmatmul.mubr.msk.f32.vlgmr.msra.gmra.mxu0 %vm603_vm2, %v3159_v29 }
 0x7b7   :  { %v9879_v57 = vpop.f32.mrf.mxu1 }
 0x7b9   :  { %v3232_v58 = vpop.f32.mrf.mxu0 }
 0x7ba   :  { %9917 = vmatprep.mubr.msk.f32.mxu0 %vm603_vm2, %v3232_v58 }
 0x7bb   :  { %v9884_v1 = vpop.f32.mrf.mxu0 }
 0x7bd   :  { %v3378_v16 = vpop.f32.mrf.mxu0 }
 0x7be   :  { %v3305_v60 = vpop.f32.mrf.mxu1 }
 0x7bf   :  { %9918 = vmatmul.mubr.msk.f32.gmra.mxu0 %vm603_vm2, %v3305_v60  ;;  %v9894_v56 = vpop.f32.mrf.mxu0 }
 0x7c0   :  { %v9889_v55 = vpop.f32.mrf.mxu1  ;;  %9920 = vmatprep.mubr.msk.f32.mxu0 %vm603_vm2, %v3378_v16 }
 0x7c1   :  { %v3524_v3 = vpop.f32.mrf.mxu0 }
 0x7c2   :  { %v3451_v4 = vpop.f32.mrf.mxu1 }
 0x7c3   :  { %9921 = vmatmul.mubr.msk.f32.gmra.mxu0 %vm603_vm2, %v3451_v4  ;;  %v9904_v54 = vpop.f32.mrf.mxu0 }
 0x7c4   :  { %v9899_v63 = vpop.f32.mrf.mxu1  ;;  %9923 = vmatprep.mubr.msk.f32.mxu0 %vm603_vm2, %v3524_v3 }
 0x7c6   :  { %v3597_v7 = vpop.f32.mrf.mxu1 }
 0x7c7   :  { %9924 = vmatmul.mubr.msk.f32.gmra.mxu0 %vm603_vm2, %v3597_v7 }
 0x7c8   :  { %v9909_v8 = vpop.f32.mrf.mxu1 }
 0x7ca   :  { %v9932_v5 = vpop.f32.mrf.mxu1 }
 0x7cc   :  { %v3823_v43 = vpop.f32.mrf.mxu1 }
 0x7ce   :  { %v9935_v13 = vpop.f32.mrf.mxu1 }
 0x7d0   :  { %v3833_v15 = vpop.f32.mrf.mxu1 }
 0x7d2   :  { %v9938_v34 = vpop.f32.mrf.mxu1 }
 0x7d4   :  { %v3843_v26 = vpop.f32.mrf.mxu1 }
 0x7d6   :  { %v9941_v31 = vpop.f32.mrf.mxu1 }
 0x7d8   :  { %v3853_v6 = vpop.f32.mrf.mxu1 }
 0x876   :  { %v9916_v14 = vpop.f32.mrf.mxu0 }
 0x877   :  { %v3829_v10 = vadd.f32 %v9932_v5, %v9916_v14 }
 0x878   :  { %v3694_v39 = vpop.f32.mrf.mxu0 }
 0x879   :  { %v3870_v17 = vadd.f32 %v9036_v11, %v3829_v10  ;;  %v3824_v18 = vadd.f32 %v3823_v43, %v3694_v39 }
 0x87b   :  { %v3869_v24 = vadd.f32 %v9036_v11, %v3824_v18  ;;  %v3878_v22 = vadd.f32 %v3870_v17, %v10857_v44 }
 0x87d   :  { %v3890_v20 = vsel %vm89_vm0, %v3878_v22, 0.0  ;;  %v3877_v27 = vadd.f32 %v3869_v24, %v10849_v36 }
 0x87e   :  { %3891 = vadd.xlane.f32.xlu1 %v3890_v20 }
 0x87f   :  { %v9919_v47 = vpop.f32.mrf.mxu0  ;;  %v3887_v23 = vsel %vm89_vm0, %v3877_v27, 0.0 }
 0x880   :  { %v3839_v12 = vadd.f32 %v9935_v13, %v9919_v47  ;;  %3888 = vadd.xlane.f32.xlu0 %v3887_v23 }
 0x881   :  { %v3704_v52 = vpop.f32.mrf.mxu0 }
 0x882   :  { %v3872_v30 = vadd.f32 %v9036_v11, %v3839_v12  ;;  %v3834_v19 = vadd.f32 %v3833_v15, %v3704_v52 }
 0x883   :  { %v9922_v25 = vpop.f32.mrf.mxu0 }
 0x884   :  { %v3871_v41 = vadd.f32 %v9036_v11, %v3834_v19  ;;  %v3849_v61 = vadd.f32 %v9938_v34, %v9922_v25  ;;  %v3880_v44 = vadd.f32 %v3872_v30, %v10874_v38 }
 0x885   :  { %v3714_v32 = vpop.f32.mrf.mxu0 }
 0x886   :  { %v3874_v45 = vadd.f32 %v9036_v11, %v3849_v61  ;;  %v3844_v35 = vadd.f32 %v3843_v26, %v3714_v32  ;;  %v3896_v36 = vsel %vm89_vm0, %v3880_v44, 0.0  ;;  %v3879_v50 = vadd.f32 %v3871_v41, %v10860_v46  ;;  %v4021_v32 = vld [vmem:[%s12540_s14 + $0x10] sm:$0xff] }
 0x887   :  { %v9925_v40 = vpop.f32.mrf.mxu0  ;;  %3897 = vadd.xlane.f32.xlu1 %v3896_v36 }
 0x888   :  { %v3873_v9 = vadd.f32 %v9036_v11, %v3844_v35  ;;  %v3859_v33 = vadd.f32 %v9941_v31, %v9925_v40  ;;  %v3893_v2 = vsel %vm89_vm0, %v3879_v50, 0.0  ;;  %v3882_v21 = vadd.f32 %v3874_v45, %v10892_v48  ;;  %v4022_v31 = vld [vmem:[%s12540_s14 + $0x18] sm:$0xff]  ;;  %v4020_v45 = vld [vmem:[%s12540_s14 + $0x8] sm:$0xff]  ;;  %v4019_v35 = vld [vmem:[%s12540_s14] sm:$0xff] }
 0x889   :  { %v3724_v0 = vpop.f32.mrf.mxu0  ;;  %3894 = vadd.xlane.f32.xlu0 %v3893_v2  ;;  %9942 = vmatprep.subr.mxu0 %v4022_v31 }
 0x88a   :  { %v3876_v38 = vadd.f32 %v9036_v11, %v3859_v33  ;;  %v3854_v37 = vadd.f32 %v3853_v6, %v3724_v0  ;;  %v3902_v42 = vsel %vm89_vm0, %v3882_v21, 0.0  ;;  %v3881_v28 = vadd.f32 %v3873_v9, %v10878_v53  ;;  %9943 = vmatpush3.msra.mxu0 %v4022_v31  ;;  %v4237_v31 = vld [vmem:[%s12543_s16 + $0x30] sm:$0xff] }
 0x88b   :  { %3903 = vadd.xlane.f32.xlu1 %v3902_v42  ;;  %9944 = vmatprep.subr.mxu0 %v4021_v32 }
 0x88c   :  { %v3875_v51 = vadd.f32 %v9036_v11, %v3854_v37  ;;  %v3899_v46 = vsel %vm89_vm0, %v3881_v28, 0.0  ;;  %v3884_v29 = vadd.f32 %v3876_v38, %v10908_v49  ;;  %9945 = vmatpush3.msra.mxu0 %v4021_v32  ;;  %v4236_v32 = vld [vmem:[%s12543_s16 + $0x28] sm:$0xff] }
 0x88d   :  { %3900 = vadd.xlane.f32.xlu0 %v3899_v46  ;;  %9946 = vmatprep.subr.mxu0 %v4020_v45 }
 0x88e   :  { %v3908_v57 = vsel %vm89_vm0, %v3884_v29, 0.0  ;;  %v3883_v48 = vadd.f32 %v3875_v51, %v10895_v59  ;;  %9947 = vmatpush3.msra.mxu0 %v4020_v45  ;;  %v4235_v45 = vld [vmem:[%s12543_s16 + $0x20] sm:$0xff] }
 0x88f   :  { %3909 = vadd.xlane.f32.xlu1 %v3908_v57  ;;  %9948 = vmatprep.subr.mxu0 %v4019_v35 }
 0x890   :  { %v3905_v58 = vsel %vm89_vm0, %v3883_v48, 0.0  ;;  %9949 = vmatpush3.msra.mxu0 %v4019_v35  ;;  %v4234_v35 = vld [vmem:[%s12543_s16 + $0x18] sm:$0xff] }
 0x891   :  { %3906 = vadd.xlane.f32.xlu0 %v3905_v58 }
 0x907   :  { %v3892_v1 = vpop.xlane.xlu1 %3891 }
 0x908   :  { %v3912_v16 = vmul.f32 0.03125, %v3892_v1 }
 0x909   :  { %v3889_v60 = vpop.xlane.xlu0 %3888 }
 0x90a   :  { %v11435_v56 = vsub.f32 %v3878_v22, %v3912_v16  ;;  %v3911_v53 = vmul.f32 0.03125, %v3889_v60  ;;  %v9037_v60 = vld [vmem:[%s12541_s12] ss:$0 sm:$0xff] }
 0x90c   :  { %v11437_v55 = vsub.f32 %v3877_v27, %v3911_v53  ;;  %v3928_v49 = vmul.f32 %v11435_v56, %v11435_v56 }
 0x90e   :  { %v3938_v3 = vsel %vm89_vm0, %v3928_v49, 0.0  ;;  %v3927_v59 = vmul.f32 %v11437_v55, %v11437_v55 }
 0x90f   :  { %3939 = vadd.xlane.f32.xlu1 %v3938_v3 }
 0x910   :  { %v3898_v4 = vpop.xlane.xlu1 %3897  ;;  %v3935_v54 = vsel %vm89_vm0, %v3927_v59, 0.0 }
 0x911   :  { %v3914_v63 = vmul.f32 0.03125, %v3898_v4  ;;  %3936 = vadd.xlane.f32.xlu0 %v3935_v54 }
 0x912   :  { %v3895_v7 = vpop.xlane.xlu0 %3894 }
 0x913   :  { %v11445_v8 = vsub.f32 %v3880_v44, %v3914_v63  ;;  %v3913_v5 = vmul.f32 0.03125, %v3895_v7 }
 0x914   :  { %v3904_v43 = vpop.xlane.xlu1 %3903 }
 0x915   :  { %v11447_v13 = vsub.f32 %v3879_v50, %v3913_v5  ;;  %v3916_v14 = vmul.f32 0.03125, %v3904_v43  ;;  %v3930_v11 = vmul.f32 %v11445_v8, %v11445_v8  ;;  %v9038_v5 = vld [vmem:[%s12542_s13] ss:$0 sm:$0xff] }
 0x916   :  { %v3901_v10 = vpop.xlane.xlu0 %3900 }
 0x917   :  { %v11451_v39 = vsub.f32 %v3882_v21, %v3916_v14  ;;  %v3915_v15 = vmul.f32 0.03125, %v3901_v10  ;;  %v3944_v17 = vsel %vm89_vm0, %v3930_v11, 0.0  ;;  %v3929_v18 = vmul.f32 %v11447_v13, %v11447_v13 }
 0x918   :  { %3945 = vadd.xlane.f32.xlu1 %v3944_v17  ;;  %v3910_v24 = vpop.xlane.xlu1 %3909 }
 0x919   :  { %v11456_v22 = vsub.f32 %v3881_v28, %v3915_v15  ;;  %v3918_v34 = vmul.f32 0.03125, %v3910_v24  ;;  %v3941_v20 = vsel %vm89_vm0, %v3929_v18, 0.0  ;;  %v3932_v27 = vmul.f32 %v11451_v39, %v11451_v39 }
 0x91a   :  { %3942 = vadd.xlane.f32.xlu0 %v3941_v20  ;;  %v3907_v47 = vpop.xlane.xlu0 %3906 }
 0x91b   :  { %v11461_v23 = vsub.f32 %v3884_v29, %v3918_v34  ;;  %v3917_v12 = vmul.f32 0.03125, %v3907_v47  ;;  %v3950_v26 = vsel %vm89_vm0, %v3932_v27, 0.0  ;;  %v3931_v52 = vmul.f32 %v11456_v22, %v11456_v22 }
 0x91c   :  { %3951 = vadd.xlane.f32.xlu1 %v3950_v26 }
 0x91d   :  { %v11466_v30 = vsub.f32 %v3883_v48, %v3917_v12  ;;  %v3947_v19 = vsel %vm89_vm0, %v3931_v52, 0.0  ;;  %v3934_v25 = vmul.f32 %v11461_v23, %v11461_v23 }
 0x91e   :  { %3948 = vadd.xlane.f32.xlu0 %v3947_v19 }
 0x91f   :  { %v3956_v41 = vsel %vm89_vm0, %v3934_v25, 0.0  ;;  %v3933_v61 = vmul.f32 %v11466_v30, %v11466_v30 }
 0x920   :  { %3957 = vadd.xlane.f32.xlu1 %v3956_v41 }
 0x921   :  { %v3953_v44 = vsel %vm89_vm0, %v3933_v61, 0.0 }
 0x922   :  { %3954 = vadd.xlane.f32.xlu0 %v3953_v44 }
 0x998   :  { %v3940_v36 = vpop.xlane.xlu1 %3939 }
 0x999   :  { %v3960_v50 = vmul.f32 0.03125, %v3940_v36  ;;  %v4233_v36 = vld [vmem:[%s12543_s16 + $0x10] sm:$0xff] }
 0x99a   :  { %v3937_v40 = vpop.xlane.xlu0 %3936 }
 0x99b   :  { %v3968_v9 = vadd.f32 1e-12, %v3960_v50  ;;  %v3959_v33 = vmul.f32 0.03125, %v3937_v40  ;;  %v4232_v50 = vld [vmem:[%s12543_s16 + $0x8] sm:$0xff]  ;;  %v4231_v40 = vld [vmem:[%s12543_s16] sm:$0xff] }
 0x99d   :  { %10443 = vrsqrt.f32 %v3968_v9  ;;  %v3967_v2 = vadd.f32 1e-12, %v3959_v33  ;;  %v9039_v9 = vld [vmem:[%s12544_s15] ss:$0 sm:$0xff] }
 0x99f   :  { %10445 = vrsqrt.f32 %v3967_v2 }
 0x9a1   :  { %v3946_v21 = vpop.xlane.xlu1 %3945 }
 0x9a2   :  { %v3962_v6 = vmul.f32 0.03125, %v3946_v21 }
 0x9a3   :  { %v3943_v0 = vpop.xlane.xlu0 %3942 }
 0x9a4   :  { %v3970_v38 = vadd.f32 1e-12, %v3962_v6  ;;  %v3961_v37 = vmul.f32 0.03125, %v3943_v0 }
 0x9a5   :  { %v3952_v42 = vpop.xlane.xlu1 %3951 }
 0x9a6   :  { %10447 = vrsqrt.f32 %v3970_v38  ;;  %v3969_v28 = vadd.f32 1e-12, %v3961_v37  ;;  %v3964_v51 = vmul.f32 0.03125, %v3952_v42 }
 0x9a7   :  { %v3949_v46 = vpop.xlane.xlu0 %3948 }
 0x9a8   :  { %10449 = vrsqrt.f32 %v3969_v28  ;;  %v3972_v29 = vadd.f32 1e-12, %v3964_v51  ;;  %v3963_v57 = vmul.f32 0.03125, %v3949_v46 }
 0x9a9   :  { %v3958_v48 = vpop.xlane.xlu1 %3957 }
 0x9aa   :  { %v10444_v58 = vpop.eup %10443  ;;  %10451 = vrsqrt.f32 %v3972_v29  ;;  %v3971_v1 = vadd.f32 1e-12, %v3963_v57  ;;  %v3966_v16 = vmul.f32 0.03125, %v3958_v48 }
 0x9ab   :  { %v3984_v53 = vmul.f32 %v10444_v58, %v11435_v56  ;;  %v3955_v49 = vpop.xlane.xlu0 %3954 }
 0x9ac   :  { %v10446_v3 = vpop.eup %10445  ;;  %10453 = vrsqrt.f32 %v3971_v1  ;;  %v3974_v59 = vadd.f32 1e-12, %v3966_v16  ;;  %v3965_v4 = vmul.f32 0.03125, %v3955_v49 }
 0x9ad   :  { %v3983_v54 = vmul.f32 %v10446_v3, %v11437_v55  ;;  %v3998_v63 = vmul.f32 %v9037_v60, %v3984_v53 }
 0x9ae   :  { %10455 = vrsqrt.f32 %v3974_v59  ;;  %v3973_v7 = vadd.f32 1e-12, %v3965_v4 }
 0x9af   :  { %v3997_v43 = vmul.f32 %v9037_v60, %v3983_v54  ;;  %v11497_v11 = vadd.f32 %v9038_v5, %v3998_v63 }
 0x9b0   :  { %10457 = vrsqrt.f32 %v3973_v7 }
 0x9b1   :  { %v11495_v14 = vadd.f32 %v9038_v5, %v3997_v43 }
 0x9b3   :  { %v10448_v56 = vpop.eup %10447  ;;  %9950 = vmatprep.mubr.msk.f32.mxu0 %vm89_vm0, %v11495_v14 }
 0x9b4   :  { %9951 = vmatmul.mubr.msk.f32.vlgmr.msra.gmra.mxu0 %vm89_vm0, %v11497_v11  ;;  %v3986_v55 = vmul.f32 %v10448_v56, %v11445_v8 }
 0x9b5   :  { %v10450_v10 = vpop.eup %10449 }
 0x9b6   :  { %v3985_v15 = vmul.f32 %v10450_v10, %v11447_v13  ;;  %v4000_v18 = vmul.f32 %v9037_v60, %v3986_v55 }
 0x9b7   :  { %v10452_v17 = vpop.eup %10451 }
 0x9b8   :  { %v3999_v24 = vmul.f32 %v9037_v60, %v3985_v15  ;;  %v3988_v34 = vmul.f32 %v10452_v17, %v11451_v39  ;;  %v11509_v26 = vadd.f32 %v9038_v5, %v4000_v18 }
 0x9b9   :  { %v10454_v20 = vpop.eup %10453 }
 0x9ba   :  { %v11506_v27 = vadd.f32 %v9038_v5, %v3999_v24  ;;  %v3987_v47 = vmul.f32 %v10454_v20, %v11456_v22  ;;  %v4002_v52 = vmul.f32 %v9037_v60, %v3988_v34 }
 0x9bb   :  { %v10456_v12 = vpop.eup %10455 }
 0x9bc   :  { %9953 = vmatprep.mubr.msk.f32.mxu0 %vm89_vm0, %v11506_v27  ;;  %v4001_v8 = vmul.f32 %v9037_v60, %v3987_v47  ;;  %v3990_v13 = vmul.f32 %v10456_v12, %v11461_v23  ;;  %v11519_v41 = vadd.f32 %v9038_v5, %v4002_v52 }
 0x9bd   :  { %v10458_v19 = vpop.eup %10457  ;;  %9954 = vmatmul.mubr.msk.f32.gmra.mxu0 %vm89_vm0, %v11509_v26 }
 0x9be   :  { %v11516_v39 = vadd.f32 %v9038_v5, %v4001_v8  ;;  %v3989_v25 = vmul.f32 %v10458_v19, %v11466_v30  ;;  %v4004_v22 = vmul.f32 %v9037_v60, %v3990_v13  ;;  %v4238_v30 = vld [vmem:[%s12543_s16 + $0x38] sm:$0xff] }
 0x9bf   :  { %9962 = vmatprep.subr.mxu1 %v4238_v30 }
 0x9c0   :  { %9956 = vmatprep.mubr.msk.f32.mxu0 %vm89_vm0, %v11516_v39  ;;  %v4003_v61 = vmul.f32 %v9037_v60, %v3989_v25  ;;  %v11527_v23 = vadd.f32 %v9038_v5, %v4004_v22  ;;  %9963 = vmatpush3.msra.mxu1 %v4238_v30 }
 0x9c1   :  { %9957 = vmatmul.mubr.msk.f32.gmra.mxu0 %vm89_vm0, %v11519_v41  ;;  %9964 = vmatprep.subr.mxu1 %v4237_v31 }
 0x9c2   :  { %v11525_v44 = vadd.f32 %v9038_v5, %v4003_v61  ;;  %9965 = vmatpush3.msra.mxu1 %v4237_v31 }
 0x9c3   :  { %9966 = vmatprep.subr.mxu1 %v4236_v32 }
 0x9c4   :  { %9959 = vmatprep.mubr.msk.f32.mxu0 %vm89_vm0, %v11525_v44  ;;  %9967 = vmatpush3.msra.mxu1 %v4236_v32 }
 0x9c5   :  { %9960 = vmatmul.mubr.msk.f32.gmra.mxu0 %vm89_vm0, %v11527_v23  ;;  %9968 = vmatprep.subr.mxu1 %v4235_v45 }
 0x9c6   :  { %9969 = vmatpush3.msra.mxu1 %v4235_v45 }
 0x9c7   :  { %9970 = vmatprep.subr.mxu1 %v4234_v35 }
 0x9c8   :  { %9971 = vmatpush3.msra.mxu1 %v4234_v35 }
 0x9c9   :  { %9972 = vmatprep.subr.mxu1 %v4233_v36 }
 0x9ca   :  { %9973 = vmatpush3.msra.mxu1 %v4233_v36 }
 0x9cb   :  { %9974 = vmatprep.subr.mxu1 %v4232_v50 }
 0x9cc   :  { %9975 = vmatpush3.msra.mxu1 %v4232_v50 }
 0x9cd   :  { %9976 = vmatprep.subr.mxu1 %v4231_v40 }
 0x9ce   :  { %9977 = vmatpush3.msra.mxu1 %v4231_v40 }
 0xa74   :  { %v9952_v33 = vpop.f32.mrf.mxu0 }
 0xa75   :  { %v11560_v2 = vadd.f32 %v9952_v33, %v9039_v9 }
 0xa76   :  { %v4120_v21 = vpop.f32.mrf.mxu0 }
 0xa77   :  { %v4168_v6 = vmul.f32 0.044715, %v11560_v2  ;;  %v4121_v0 = vadd.f32 %v9039_v9, %v4120_v21 }
 0xa79   :  { %v4176_v38 = vmul.f32 %v4168_v6, %v11560_v2  ;;  %v4167_v37 = vmul.f32 0.044715, %v4121_v0  ;;  %v4159_v6 = vmul.f32 0.5, %v4121_v0 }
 0xa7b   :  { %v4184_v42 = vmul.f32 %v4176_v38, %v11560_v2  ;;  %v4175_v28 = vmul.f32 %v4167_v37, %v4121_v0 }
 0xa7d   :  { %v4192_v51 = vadd.f32 %v4184_v42, %v11560_v2  ;;  %v4183_v46 = vmul.f32 %v4175_v28, %v4121_v0  ;;  %v9955_v29 = vpop.f32.mrf.mxu0  ;;  %v4160_v42 = vmul.f32 0.5, %v11560_v2 }
 0xa7e   :  { %v11566_v57 = vadd.f32 %v9955_v29, %v9039_v9 }
 0xa7f   :  { %v4200_v48 = vmul.f32 0.7978846, %v4192_v51  ;;  %v4191_v58 = vadd.f32 %v4183_v46, %v4121_v0  ;;  %v4130_v1 = vpop.f32.mrf.mxu0 }
 0xa80   :  { %v4170_v16 = vmul.f32 0.044715, %v11566_v57  ;;  %v4131_v60 = vadd.f32 %v9039_v9, %v4130_v1 }
 0xa81   :  { %10459 = vtanh.f32 %v4200_v48  ;;  %v9958_v53 = vpop.f32.mrf.mxu0  ;;  %v4199_v49 = vmul.f32 0.7978846, %v4191_v58 }
 0xa82   :  { %v4178_v3 = vmul.f32 %v4170_v16, %v11566_v57  ;;  %v4169_v59 = vmul.f32 0.044715, %v4131_v60  ;;  %v11570_v4 = vadd.f32 %v9958_v53, %v9039_v9  ;;  %v4161_v1 = vmul.f32 0.5, %v4131_v60 }
 0xa83   :  { %v4140_v54 = vpop.f32.mrf.mxu0  ;;  %10461 = vtanh.f32 %v4199_v49  ;;  %v4162_v53 = vmul.f32 0.5, %v11566_v57 }
 0xa84   :  { %v4186_v63 = vmul.f32 %v4178_v3, %v11566_v57  ;;  %v4177_v7 = vmul.f32 %v4169_v59, %v4131_v60  ;;  %v4172_v5 = vmul.f32 0.044715, %v11570_v4  ;;  %v4141_v43 = vadd.f32 %v9039_v9, %v4140_v54 }
 0xa85   :  { %v9961_v56 = vpop.f32.mrf.mxu0 }
 0xa86   :  { %v4194_v55 = vadd.f32 %v4186_v63, %v11566_v57  ;;  %v4185_v10 = vmul.f32 %v4177_v7, %v4131_v60  ;;  %v4180_v15 = vmul.f32 %v4172_v5, %v11570_v4  ;;  %v4171_v17 = vmul.f32 0.044715, %v4141_v43 }
 0xa87   :  { %v11576_v18 = vadd.f32 %v9961_v56, %v9039_v9  ;;  %v4150_v24 = vpop.f32.mrf.mxu0  ;;  %v4163_v54 = vmul.f32 0.5, %v4141_v43  ;;  %v4164_v7 = vmul.f32 0.5, %v11570_v4 }
 0xa88   :  { %v4193_v34 = vadd.f32 %v4185_v10, %v4131_v60  ;;  %v4188_v20 = vmul.f32 %v4180_v15, %v11570_v4  ;;  %v4179_v47 = vmul.f32 %v4171_v17, %v4141_v43  ;;  %v4151_v12 = vadd.f32 %v9039_v9, %v4150_v24 }
 0xa89   :  { %v4174_v52 = vmul.f32 0.044715, %v11576_v18  ;;  %v4202_v8 = vmul.f32 0.7978846, %v4194_v55  ;;  %v4166_v17 = vmul.f32 0.5, %v11576_v18 }
 0xa8a   :  { %v4196_v13 = vadd.f32 %v4188_v20, %v11570_v4  ;;  %v4187_v19 = vmul.f32 %v4179_v47, %v4141_v43  ;;  %v4173_v25 = vmul.f32 0.044715, %v4151_v12  ;;  %v4201_v22 = vmul.f32 0.7978846, %v4193_v34  ;;  %v9048_v4 = vld [vmem:[%s12545_s17] ss:$0 sm:$0xff] }
 0xa8b   :  { %v4182_v61 = vmul.f32 %v4174_v52, %v11576_v18  ;;  %10463 = vtanh.f32 %v4202_v8  ;;  %v4165_v57 = vmul.f32 0.5, %v4151_v12 }
 0xa8c   :  { %v4195_v30 = vadd.f32 %v4187_v19, %v4141_v43  ;;  %v4181_v31 = vmul.f32 %v4173_v25, %v4151_v12  ;;  %10465 = vtanh.f32 %v4201_v22  ;;  %v4204_v32 = vmul.f32 0.7978846, %v4196_v13 }
 0xa8d   :  { %v4190_v45 = vmul.f32 %v4182_v61, %v11576_v18 }
 0xa8e   :  { %v10460_v35 = vpop.eup %10459  ;;  %v4189_v36 = vmul.f32 %v4181_v31, %v4151_v12  ;;  %v4203_v50 = vmul.f32 0.7978846, %v4195_v30  ;;  %10467 = vtanh.f32 %v4204_v32 }
 0xa8f   :  { %v4198_v40 = vadd.f32 %v4190_v45, %v11576_v18  ;;  %v4216_v33 = vadd.f32 1.0, %v10460_v35 }
 0xa90   :  { %v10462_v9 = vpop.eup %10461  ;;  %v4197_v21 = vadd.f32 %v4189_v36, %v4151_v12  ;;  %10469 = vtanh.f32 %v4203_v50 }
 0xa91   :  { %v4215_v38 = vadd.f32 1.0, %v10462_v9  ;;  %v4206_v37 = vmul.f32 0.7978846, %v4198_v40  ;;  %v4224_v46 = vmul.f32 %v4216_v33, %v4160_v42 }
 0xa92   :  { %v4205_v28 = vmul.f32 0.7978846, %v4197_v21 }
 0xa93   :  { %v4223_v51 = vmul.f32 %v4215_v38, %v4159_v6  ;;  %10471 = vtanh.f32 %v4206_v37 }
 0xa94   :  { %10473 = vtanh.f32 %v4205_v28 }
 0xa95   :  { %9978 = vmatprep.mubr.msk.f32.mxu1 %vm4246_vm4, %v4223_v51 }
 0xa96   :  { %9979 = vmatmul.mubr.msk.f32.vlgmr.msra.gmra.mxu1 %vm4246_vm4, %v4224_v46 }
 0xa98   :  { %v10464_v29 = vpop.eup %10463 }
 0xa99   :  { %v10466_v48 = vpop.eup %10465  ;;  %v4218_v58 = vadd.f32 1.0, %v10464_v29 }
 0xa9a   :  { %v4217_v16 = vadd.f32 1.0, %v10466_v48 }
 0xa9b   :  { %v10468_v0 = vpop.eup %10467  ;;  %v4226_v3 = vmul.f32 %v4218_v58, %v4162_v53 }
 0xa9c   :  { %v4225_v49 = vmul.f32 %v4217_v16, %v4161_v1  ;;  %v4220_v59 = vadd.f32 1.0, %v10468_v0 }
 0xa9d   :  { %v10470_v2 = vpop.eup %10469 }
 0xa9e   :  { %9981 = vmatprep.mubr.msk.f32.mxu1 %vm4246_vm4, %v4225_v49  ;;  %v4219_v63 = vadd.f32 1.0, %v10470_v2  ;;  %v4228_v60 = vmul.f32 %v4220_v59, %v4164_v7 }
 0xa9f   :  { %9982 = vmatmul.mubr.msk.f32.gmra.mxu1 %vm4246_vm4, %v4226_v3 }
 0xaa0   :  { %v10472_v5 = vpop.eup %10471  ;;  %v4227_v56 = vmul.f32 %v4219_v63, %v4163_v54 }
 0xaa1   :  { %v10474_v55 = vpop.eup %10473  ;;  %v4222_v10 = vadd.f32 1.0, %v10472_v5 }
 0xaa2   :  { %9984 = vmatprep.mubr.msk.f32.mxu1 %vm4246_vm4, %v4227_v56  ;;  %v4221_v15 = vadd.f32 1.0, %v10474_v55 }
 0xaa3   :  { %9985 = vmatmul.mubr.msk.f32.gmra.mxu1 %vm4246_vm4, %v4228_v60  ;;  %v4230_v43 = vmul.f32 %v4222_v10, %v4166_v17 }
 0xaa4   :  { %v4229_v24 = vmul.f32 %v4221_v15, %v4165_v57 }
 0xaa6   :  { %9987 = vmatprep.mubr.msk.f32.mxu1 %vm4246_vm4, %v4229_v24 }
 0xaa7   :  { %9988 = vmatmul.mubr.msk.f32.gmra.mxu1 %vm4246_vm4, %v4230_v43 }
 0xb56   :  { %v9980_v34 = vpop.f32.mrf.mxu1 }
 0xb57   :  { %v4343_v20 = vadd.f32 %v9980_v34, %v9048_v4 }
 0xb58   :  { %v4337_v47 = vpop.f32.mrf.mxu1 }
 0xb59   :  { %v4338_v52 = vadd.f32 %v9048_v4, %v4337_v47  ;;  %v4377_v12 = vadd.f32 %v4343_v20, %v11497_v11 }
 0xb5b   :  { %v4389_v8 = vsel %vm89_vm0, %v4377_v12, 0.0  ;;  %v4376_v18 = vadd.f32 %v4338_v52, %v11495_v14 }
 0xb5c   :  { %4390 = vadd.xlane.f32.xlu1 %v4389_v8 }
 0xb5d   :  { %v4386_v13 = vsel %vm89_vm0, %v4376_v18, 0.0 }
 0xb5e   :  { %4387 = vadd.xlane.f32.xlu0 %v4386_v13 }
 0xb5f   :  { %v9983_v19 = vpop.f32.mrf.mxu1 }
 0xb60   :  { %v4353_v25 = vadd.f32 %v9983_v19, %v9048_v4 }
 0xb61   :  { %v4347_v22 = vpop.f32.mrf.mxu1 }
 0xb62   :  { %v4348_v61 = vadd.f32 %v9048_v4, %v4347_v22  ;;  %v4379_v30 = vadd.f32 %v4353_v25, %v11509_v26  ;;  %v9062_v25 = vld [vmem:[%s12570_s7 + $0x58] sm:$0xff] }
 0xb63   :  { %v9986_v31 = vpop.f32.mrf.mxu1  ;;  %v9076_v22 = vld [vmem:[%s12571_s0 + $0x58] sm:$0xff]  ;;  %9990 = vmatprep.subr.mxu0 %v9062_v25 }
 0xb64   :  { %v4363_v32 = vadd.f32 %v9986_v31, %v9048_v4  ;;  %v4395_v45 = vsel %vm89_vm0, %v4379_v30, 0.0  ;;  %v4378_v11 = vadd.f32 %v4348_v61, %v11506_v27  ;;  %10010 = vmatprep.subr.mxu1 %v9076_v22  ;;  %9991 = vmatpush3.msra.mxu0 %v9062_v25  ;;  %v9061_v61 = vld [vmem:[%s12570_s7 + $0x50] sm:$0xff]  ;;  %v9060_v31 = vld [vmem:[%s12570_s7 + $0x48] sm:$0xff] }
 0xb65   :  { %4396 = vadd.xlane.f32.xlu1 %v4395_v45  ;;  %v4357_v35 = vpop.f32.mrf.mxu1  ;;  %10011 = vmatpush3.msra.mxu1 %v9076_v22  ;;  %v9059_v45 = vld [vmem:[%s12570_s7 + $0x40] sm:$0xff] }
 0xb66   :  { %v4358_v36 = vadd.f32 %v9048_v4, %v4357_v35  ;;  %v4392_v14 = vsel %vm89_vm0, %v4378_v11, 0.0  ;;  %v4381_v50 = vadd.f32 %v4363_v32, %v11519_v41  ;;  %9992 = vmatprep.subr.mxu0 %v9061_v61  ;;  %v9074_v32 = vld [vmem:[%s12571_s0 + $0x48] sm:$0xff]  ;;  %v9090_v35 = vld [vmem:[%s12572_s30 + $0x58] sm:$0xff] }
 0xb67   :  { %4393 = vadd.xlane.f32.xlu0 %v4392_v14  ;;  %v9989_v40 = vpop.f32.mrf.mxu1  ;;  %9993 = vmatpush3.msra.mxu0 %v9061_v61 }
 0xb68   :  { %v4373_v9 = vadd.f32 %v9989_v40, %v9048_v4  ;;  %v4401_v33 = vsel %vm89_vm0, %v4381_v50, 0.0  ;;  %v4380_v26 = vadd.f32 %v4358_v36, %v11516_v39  ;;  %9994 = vmatprep.subr.mxu0 %v9060_v31 }
 0xb69   :  { %4402 = vadd.xlane.f32.xlu1 %v4401_v33  ;;  %v4367_v21 = vpop.f32.mrf.mxu1  ;;  %9995 = vmatpush3.msra.mxu0 %v9060_v31 }
 0xb6a   :  { %v4368_v6 = vadd.f32 %v9048_v4, %v4367_v21  ;;  %v4398_v38 = vsel %vm89_vm0, %v4380_v26, 0.0  ;;  %v4383_v27 = vadd.f32 %v4373_v9, %v11527_v23  ;;  %9996 = vmatprep.subr.mxu0 %v9059_v45 }
 0xb6b   :  { %4399 = vadd.xlane.f32.xlu0 %v4398_v38  ;;  %9997 = vmatpush3.msra.mxu0 %v9059_v45 }
 0xb6c   :  { %v4407_v37 = vsel %vm89_vm0, %v4383_v27, 0.0  ;;  %v4382_v42 = vadd.f32 %v4368_v6, %v11525_v44  ;;  %10030 = vmatprep.subr.mxu0 %v9090_v35 }
 0xb6d   :  { %4408 = vadd.xlane.f32.xlu1 %v4407_v37 }
 0xb6e   :  { %v4404_v41 = vsel %vm89_vm0, %v4382_v42, 0.0 }
 0xb6f   :  { %4405 = vadd.xlane.f32.xlu0 %v4404_v41 }
 0xbe5   :  { %v4391_v28 = vpop.xlane.xlu1 %4390 }
 0xbe6   :  { %v4411_v51 = vmul.f32 0.03125, %v4391_v28 }
 0xbe7   :  { %v4388_v46 = vpop.xlane.xlu0 %4387 }
 0xbe8   :  { %v11615_v39 = vsub.f32 %v4377_v12, %v4411_v51  ;;  %v4410_v29 = vmul.f32 0.03125, %v4388_v46 }
 0xbea   :  { %v11617_v48 = vsub.f32 %v4376_v18, %v4410_v29  ;;  %v4427_v23 = vmul.f32 %v11615_v39, %v11615_v39 }
 0xbec   :  { %v4437_v58 = vsel %vm89_vm0, %v4427_v23, 0.0  ;;  %v4426_v44 = vmul.f32 %v11617_v48, %v11617_v48 }
 0xbed   :  { %4438 = vadd.xlane.f32.xlu1 %v4437_v58 }
 0xbee   :  { %v4397_v1 = vpop.xlane.xlu1 %4396  ;;  %v4434_v16 = vsel %vm89_vm0, %v4426_v44, 0.0 }
 0xbef   :  { %v4413_v0 = vmul.f32 0.03125, %v4397_v1  ;;  %4435 = vadd.xlane.f32.xlu0 %v4434_v16  ;;  %v9057_v1 = vld [vmem:[%s12546_s18] ss:$0 sm:$0xff] }
 0xbf0   :  { %v4394_v53 = vpop.xlane.xlu0 %4393 }
 0xbf1   :  { %v11625_v49 = vsub.f32 %v4379_v30, %v4413_v0  ;;  %v4412_v2 = vmul.f32 0.03125, %v4394_v53  ;;  %v9075_v30 = vld [vmem:[%s12571_s0 + $0x50] sm:$0xff] }
 0xbf2   :  { %v4403_v3 = vpop.xlane.xlu1 %4402  ;;  %10012 = vmatprep.subr.mxu1 %v9075_v30 }
 0xbf3   :  { %v11627_v59 = vsub.f32 %v4378_v11, %v4412_v2  ;;  %v4415_v54 = vmul.f32 0.03125, %v4403_v3  ;;  %v4429_v63 = vmul.f32 %v11625_v49, %v11625_v49  ;;  %10013 = vmatpush3.msra.mxu1 %v9075_v30  ;;  %v9073_v11 = vld [vmem:[%s12571_s0 + $0x40] sm:$0xff] }
 0xbf4   :  { %v4400_v7 = vpop.xlane.xlu0 %4399  ;;  %10014 = vmatprep.subr.mxu1 %v9074_v32 }
 0xbf5   :  { %v11631_v5 = vsub.f32 %v4381_v50, %v4415_v54  ;;  %v4414_v56 = vmul.f32 0.03125, %v4400_v7  ;;  %v4443_v55 = vsel %vm89_vm0, %v4429_v63, 0.0  ;;  %v4428_v60 = vmul.f32 %v11627_v59, %v11627_v59  ;;  %10015 = vmatpush3.msra.mxu1 %v9074_v32 }
 0xbf6   :  { %4444 = vadd.xlane.f32.xlu1 %v4443_v55  ;;  %v4409_v10 = vpop.xlane.xlu1 %4408  ;;  %10016 = vmatprep.subr.mxu1 %v9073_v11 }
 0xbf7   :  { %v11636_v57 = vsub.f32 %v4380_v26, %v4414_v56  ;;  %v4417_v15 = vmul.f32 0.03125, %v4409_v10  ;;  %v4440_v17 = vsel %vm89_vm0, %v4428_v60, 0.0  ;;  %v4431_v24 = vmul.f32 %v11631_v5, %v11631_v5  ;;  %10017 = vmatpush3.msra.mxu1 %v9073_v11  ;;  %v9058_v56 = vld [vmem:[%s12547_s19] ss:$0 sm:$0xff] }
 0xbf8   :  { %4441 = vadd.xlane.f32.xlu0 %v4440_v17  ;;  %v4406_v43 = vpop.xlane.xlu0 %4405  ;;  %10050 = vmatprep.subr.mxu1 %v10613_v62 }
 0xbf9   :  { %v11641_v4 = vsub.f32 %v4383_v27, %v4417_v15  ;;  %v4416_v34 = vmul.f32 0.03125, %v4406_v43  ;;  %v4449_v20 = vsel %vm89_vm0, %v4431_v24, 0.0  ;;  %v4430_v47 = vmul.f32 %v11636_v57, %v11636_v57  ;;  %v9088_v24 = vld [vmem:[%s12572_s30 + $0x48] sm:$0xff] }
 0xbfa   :  { %4450 = vadd.xlane.f32.xlu1 %v4449_v20 }
 0xbfb   :  { %v11646_v52 = vsub.f32 %v4382_v42, %v4416_v34  ;;  %v4446_v12 = vsel %vm89_vm0, %v4430_v47, 0.0  ;;  %v4433_v8 = vmul.f32 %v11641_v4, %v11641_v4 }
 0xbfc   :  { %4447 = vadd.xlane.f32.xlu0 %v4446_v12 }
 0xbfd   :  { %v4455_v18 = vsel %vm89_vm0, %v4433_v8, 0.0  ;;  %v4432_v13 = vmul.f32 %v11646_v52, %v11646_v52 }
 0xbfe   :  { %4456 = vadd.xlane.f32.xlu1 %v4455_v18 }
 0xbff   :  { %v4452_v19 = vsel %vm89_vm0, %v4432_v13, 0.0 }
 0xc00   :  { %4453 = vadd.xlane.f32.xlu0 %v4452_v19 }
 0xc76   :  { %v4439_v36 = vpop.xlane.xlu1 %4438 }
 0xc77   :  { %v4459_v14 = vmul.f32 0.03125, %v4439_v36  ;;  %v9078_v36 = vld [vmem:[%s12575_s9 + $0x2] ss:$0 sm:$0xff] }
 0xc78   :  { %v4436_v50 = vpop.xlane.xlu0 %4435 }
 0xc79   :  { %v4467_v40 = vadd.f32 1e-12, %v4459_v14  ;;  %v4458_v9 = vmul.f32 0.03125, %v4436_v50 }
 0xc7b   :  { %10475 = vrsqrt.f32 %v4467_v40  ;;  %v4466_v33 = vadd.f32 1e-12, %v4458_v9  ;;  %v9064_v9 = vld [vmem:[%s12576_s3 + $0x2] ss:$0 sm:$0xff] }
 0xc7d   :  { %10477 = vrsqrt.f32 %v4466_v33 }
 0xc7f   :  { %v4445_v26 = vpop.xlane.xlu1 %4444 }
 0xc80   :  { %v4461_v21 = vmul.f32 0.03125, %v4445_v26 }
 0xc81   :  { %v4442_v6 = vpop.xlane.xlu0 %4441 }
 0xc82   :  { %v4469_v38 = vadd.f32 1e-12, %v4461_v21  ;;  %v4460_v27 = vmul.f32 0.03125, %v4442_v6 }
 0xc83   :  { %v4451_v37 = vpop.xlane.xlu1 %4450 }
 0xc84   :  { %10479 = vrsqrt.f32 %v4469_v38  ;;  %v4468_v42 = vadd.f32 1e-12, %v4460_v27  ;;  %v4463_v41 = vmul.f32 0.03125, %v4451_v37 }
 0xc85   :  { %v4448_v28 = vpop.xlane.xlu0 %4447 }
 0xc86   :  { %10481 = vrsqrt.f32 %v4468_v42  ;;  %v4471_v51 = vadd.f32 1e-12, %v4463_v41  ;;  %v4462_v46 = vmul.f32 0.03125, %v4448_v28 }
 0xc87   :  { %v4457_v29 = vpop.xlane.xlu1 %4456 }
 0xc88   :  { %v10476_v23 = vpop.eup %10475  ;;  %10483 = vrsqrt.f32 %v4471_v51  ;;  %v4470_v58 = vadd.f32 1e-12, %v4462_v46  ;;  %v4465_v44 = vmul.f32 0.03125, %v4457_v29 }
 0xc89   :  { %v4483_v16 = vmul.f32 %v10476_v23, %v11615_v39  ;;  %v4454_v0 = vpop.xlane.xlu0 %4453 }
 0xc8a   :  { %v10478_v53 = vpop.eup %10477  ;;  %10485 = vrsqrt.f32 %v4470_v58  ;;  %v4473_v2 = vadd.f32 1e-12, %v4465_v44  ;;  %v4464_v3 = vmul.f32 0.03125, %v4454_v0 }
 0xc8b   :  { %v4482_v54 = vmul.f32 %v10478_v53, %v11617_v48  ;;  %v4497_v63 = vmul.f32 %v9057_v1, %v4483_v16  ;;  %v9089_v48 = vld [vmem:[%s12572_s30 + $0x50] sm:$0xff] }
 0xc8c   :  { %10487 = vrsqrt.f32 %v4473_v2  ;;  %v4472_v7 = vadd.f32 1e-12, %v4464_v3 }
 0xc8d   :  { %v4496_v55 = vmul.f32 %v9057_v1, %v4482_v54  ;;  %v11693_v10 = vadd.f32 %v9058_v56, %v4497_v63 }
 0xc8e   :  { %10489 = vrsqrt.f32 %v4472_v7 }
 0xc8f   :  { %v11691_v60 = vadd.f32 %v9058_v56, %v4496_v55  ;;  %v11807_v55 = vld [vmem:[%s12577_s28 + $0x2] ss:$0 sm:$0xff] }
 0xc91   :  { %v10480_v39 = vpop.eup %10479  ;;  %9998 = vmatprep.mubr.msk.f32.mxu0 %vm89_vm0, %v11691_v60  ;;  %10018 = vmatprep.mubr.msk.f32.mxu1 %vm89_vm0, %v11691_v60 }
 0xc92   :  { %v4485_v15 = vmul.f32 %v10480_v39, %v11625_v49  ;;  %9999 = vmatmul.mubr.msk.f32.vlgmr.msra.gmra.mxu0 %vm89_vm0, %v11693_v10  ;;  %10019 = vmatmul.mubr.msk.f32.vlgmr.msra.gmra.mxu1 %vm89_vm0, %v11693_v10  ;;  %v9087_v49 = vld [vmem:[%s12572_s30 + $0x40] sm:$0xff] }
 0xc93   :  { %v10482_v17 = vpop.eup %10481  ;;  %10031 = vmatpush3.msra.mxu0 %v9090_v35 }
 0xc94   :  { %v4484_v43 = vmul.f32 %v10482_v17, %v11627_v59  ;;  %10032 = vmatprep.subr.mxu0 %v9089_v48  ;;  %v4499_v20 = vmul.f32 %v9057_v1, %v4485_v15 }
 0xc95   :  { %v10484_v34 = vpop.eup %10483  ;;  %10033 = vmatpush3.msra.mxu0 %v9089_v48 }
 0xc96   :  { %v4498_v47 = vmul.f32 %v9057_v1, %v4484_v43  ;;  %v4487_v12 = vmul.f32 %v10484_v34, %v11631_v5  ;;  %10034 = vmatprep.subr.mxu0 %v9088_v24  ;;  %v11718_v19 = vadd.f32 %v9058_v56, %v4499_v20 }
 0xc97   :  { %v10486_v8 = vpop.eup %10485  ;;  %10035 = vmatpush3.msra.mxu0 %v9088_v24 }
 0xc98   :  { %v11715_v18 = vadd.f32 %v9058_v56, %v4498_v47  ;;  %v4486_v13 = vmul.f32 %v10486_v8, %v11636_v57  ;;  %10036 = vmatprep.subr.mxu0 %v9087_v49  ;;  %v4501_v25 = vmul.f32 %v9057_v1, %v4487_v12 }
 0xc99   :  { %v10488_v59 = vpop.eup %10487  ;;  %10037 = vmatpush3.msra.mxu0 %v9087_v49 }
 0xc9a   :  { %v4500_v22 = vmul.f32 %v9057_v1, %v4486_v13  ;;  %v4489_v61 = vmul.f32 %v10488_v59, %v11641_v4  ;;  %10001 = vmatprep.mubr.msk.f32.mxu0 %vm89_vm0, %v11715_v18  ;;  %10021 = vmatprep.mubr.msk.f32.mxu1 %vm89_vm0, %v11715_v18  ;;  %v11733_v4 = vadd.f32 %v9058_v56, %v4501_v25 }
 0xc9b   :  { %v10490_v5 = vpop.eup %10489  ;;  %10002 = vmatmul.mubr.msk.f32.gmra.mxu0 %vm89_vm0, %v11718_v19  ;;  %10022 = vmatmul.mubr.msk.f32.gmra.mxu1 %vm89_vm0, %v11718_v19 }
 0xc9c   :  { %v11729_v57 = vadd.f32 %v9058_v56, %v4500_v22  ;;  %v4488_v30 = vmul.f32 %v10490_v5, %v11646_v52  ;;  %10070 = vmatprep.subr.mxu0 %v10613_v62  ;;  %v4503_v31 = vmul.f32 %v9057_v1, %v4489_v61 }
 0xc9e   :  { %v4502_v32 = vmul.f32 %v9057_v1, %v4488_v30  ;;  %10004 = vmatprep.mubr.msk.f32.mxu0 %vm89_vm0, %v11729_v57  ;;  %10024 = vmatprep.mubr.msk.f32.mxu1 %vm89_vm0, %v11729_v57  ;;  %v11745_v52 = vadd.f32 %v9058_v56, %v4503_v31  ;;  %v11848_v30 = vld [vmem:[%s12537_s1] ss:$0 sm:$0xff] }
 0xc9f   :  { %10005 = vmatmul.mubr.msk.f32.gmra.mxu0 %vm89_vm0, %v11733_v4  ;;  %10025 = vmatmul.mubr.msk.f32.gmra.mxu1 %vm89_vm0, %v11733_v4 }
 0xca0   :  { %v11743_v45 = vadd.f32 %v9058_v56, %v4502_v32 }
 0xca2   :  { %10007 = vmatprep.mubr.msk.f32.mxu0 %vm89_vm0, %v11743_v45  ;;  %10027 = vmatprep.mubr.msk.f32.mxu1 %vm89_vm0, %v11743_v45 }
 0xca3   :  { %10008 = vmatmul.mubr.msk.f32.gmra.mxu0 %vm89_vm0, %v11745_v52  ;;  %10028 = vmatmul.mubr.msk.f32.gmra.mxu1 %vm89_vm0, %v11745_v52 }
 0xca4   :  { %10038 = vmatprep.mubr.msk.f32.mxu0 %vm89_vm0, %v11691_v60  ;;  %10052 = vmatprep.mubr.msk.f32.mxu1 %vm10614_vm1, %v10613_v62 }
 0xca7   :  { %10039 = vmatmul.mubr.msk.f32.vlgmr.msra.gmra.mxu0 %vm89_vm0, %v11693_v10 }
 0xca8   :  { %10041 = vmatprep.mubr.msk.f32.mxu0 %vm89_vm0, %v11715_v18 }
 0xcab   :  { %10042 = vmatmul.mubr.msk.f32.gmra.mxu0 %vm89_vm0, %v11718_v19 }
 0xcac   :  { %10044 = vmatprep.mubr.msk.f32.mxu0 %vm89_vm0, %v11729_v57 }
 0xcaf   :  { %10045 = vmatmul.mubr.msk.f32.gmra.mxu0 %vm89_vm0, %v11733_v4 }
 0xcb0   :  { %10047 = vmatprep.mubr.msk.f32.mxu0 %vm89_vm0, %v11743_v45 }
 0xcb3   :  { %10048 = vmatmul.mubr.msk.f32.gmra.mxu0 %vm89_vm0, %v11745_v52 }
 0xcb4   :  { %10072 = vmatprep.mubr.msk.f32.mxu0 %vm10614_vm1, %v10613_v62 }
 0xd52   :  { %v10000_v11 = vpop.f32.mrf.mxu0  ;;  %v10020_v35 = vpop.f32.mrf.mxu1 }
 0xd53   :  { %v4745_v26 = vadd.f32 %v10020_v35, %v9078_v36  ;;  %v4627_v38 = vadd.f32 %v10000_v11, %v9064_v9 }
 0xd54   :  { %v4739_v14 = vpop.f32.mrf.mxu1  ;;  %v4621_v50 = vpop.f32.mrf.mxu0 }
 0xd55   :  { %v4740_v40 = vadd.f32 %v9078_v36, %v4739_v14  ;;  %v4622_v33 = vadd.f32 %v9064_v9, %v4621_v50  ;;  %v11855_v14 = vld [vmem:[%s12537_s1 + $0x1] ss:$0 sm:$0xff] }
 0xd57   :  { %10051 = vmatpush3.xpose.msk.msra.mxu1 %vm603_vm2, %v4740_v40 }
 0xd58   :  { %10055 = vmatprep.subr.mxu1 %v10613_v62 }
 0xd5a   :  { %10053 = vmatmul.mubr.msk.f32.vlgmr.msra.gmra.mxu1 %vm603_vm2, %v4622_v33 }
 0xd5b   :  { %v10003_v21 = vpop.f32.mrf.mxu0  ;;  %v10023_v6 = vpop.f32.mrf.mxu1  ;;  %10056 = vmatpush3.xpose.msk.msra.mxu1 %vm603_vm2, %v4745_v26  ;;  %10057 = vmatprep.mubr.msk.f32.mxu1 %vm10614_vm1, %v10613_v62 }
 0xd5c   :  { %10060 = vmatprep.subr.mxu1 %v10613_v62  ;;  %v4755_v23 = vadd.f32 %v10023_v6, %v9078_v36  ;;  %v4637_v16 = vadd.f32 %v10003_v21, %v9064_v9  ;;  %v11864_v6 = vld [vmem:[%s12537_s1 + $0x2] ss:$0 sm:$0xff] }
 0xd5d   :  { %v4631_v27 = vpop.f32.mrf.mxu0  ;;  %v4749_v37 = vpop.f32.mrf.mxu1 }
 0xd5e   :  { %v4750_v42 = vadd.f32 %v9078_v36, %v4749_v37  ;;  %10058 = vmatmul.mubr.msk.f32.vlgmr.msra.gmra.mxu1 %vm603_vm2, %v4627_v38  ;;  %v4632_v51 = vadd.f32 %v9064_v9, %v4631_v27 }
 0xd5f   :  { %v10006_v41 = vpop.f32.mrf.mxu0  ;;  %v10026_v28 = vpop.f32.mrf.mxu1  ;;  %10062 = vmatprep.mubr.msk.f32.mxu1 %vm10614_vm1, %v10613_v62 }
 0xd60   :  { %10061 = vmatpush3.xpose.msk.msra.mxu1 %vm603_vm2, %v4750_v42  ;;  %v4765_v3 = vadd.f32 %v10026_v28, %v9078_v36  ;;  %v4647_v7 = vadd.f32 %v10006_v41, %v9064_v9 }
 0xd61   :  { %v4641_v46 = vpop.f32.mrf.mxu0  ;;  %v4759_v29 = vpop.f32.mrf.mxu1  ;;  %10065 = vmatprep.subr.mxu1 %v10613_v62 }
 0xd62   :  { %v4760_v58 = vadd.f32 %v9078_v36, %v4759_v29  ;;  %v4642_v0 = vadd.f32 %v9064_v9, %v4641_v46  ;;  %v11871_v29 = vld [vmem:[%s12537_s1 + $0x3] ss:$0 sm:$0xff] }
 0xd63   :  { %v10009_v44 = vpop.f32.mrf.mxu0  ;;  %v10029_v1 = vpop.f32.mrf.mxu1  ;;  %10063 = vmatmul.mubr.msk.f32.vlgmr.msra.gmra.mxu1 %vm603_vm2, %v4632_v51 }
 0xd64   :  { %10066 = vmatpush3.xpose.msk.msra.mxu1 %vm603_vm2, %v4755_v23  ;;  %10071 = vmatpush3.xpose.msk.msra.mxu0 %vm603_vm2, %v4760_v58  ;;  %v4775_v48 = vadd.f32 %v10029_v1, %v9078_v36  ;;  %v4657_v43 = vadd.f32 %v10009_v44, %v9064_v9  ;;  %v11877_v58 = vld [vmem:[%s12537_s1 + $0x4] ss:$0 sm:$0xff] }
 0xd65   :  { %v4651_v53 = vpop.f32.mrf.mxu0  ;;  %v4769_v2 = vpop.f32.mrf.mxu1  ;;  %10067 = vmatprep.mubr.msk.f32.mxu1 %vm10614_vm1, %v10613_v62  ;;  %10075 = vmatprep.subr.mxu1 %v10613_v62 }
 0xd66   :  { %v4770_v54 = vadd.f32 %v9078_v36, %v4769_v2  ;;  %10080 = vmatprep.subr.mxu0 %v10613_v62  ;;  %v4652_v56 = vadd.f32 %v9064_v9, %v4651_v53 }
 0xd67   :  { %v10040_v63 = vpop.f32.mrf.mxu0  ;;  %10068 = vmatmul.mubr.msk.f32.vlgmr.msra.gmra.mxu1 %vm603_vm2, %v4637_v16  ;;  %10073 = vmatmul.mubr.msk.f32.vlgmr.msra.gmra.mxu0 %vm603_vm2, %v4642_v0 }
 0xd68   :  { %10076 = vmatpush3.xpose.msk.msra.mxu1 %vm603_vm2, %v4765_v3  ;;  %10081 = vmatpush3.xpose.msk.msra.mxu0 %vm603_vm2, %v4770_v54  ;;  %v4863_v20 = vadd.f32 %v10040_v63, %v11807_v55 }
 0xd69   :  { %v4857_v39 = vpop.f32.mrf.mxu0  ;;  %10077 = vmatprep.mubr.msk.f32.mxu1 %vm10614_vm1, %v10613_v62  ;;  %10082 = vmatprep.mubr.msk.f32.mxu0 %vm10614_vm1, %v10613_v62 }
 0xd6a   :  { %v4858_v15 = vadd.f32 %v11807_v55, %v4857_v39  ;;  %10085 = vmatprep.subr.mxu1 %v10613_v62  ;;  %10090 = vmatprep.subr.mxu0 %v10613_v62  ;;  %v11891_v39 = vld [vmem:[%s12537_s1 + $0x6] ss:$0 sm:$0xff] }
 0xd6b   :  { %v10043_v17 = vpop.f32.mrf.mxu0  ;;  %10078 = vmatmul.mubr.msk.f32.vlgmr.msra.gmra.mxu1 %vm603_vm2, %v4647_v7  ;;  %10083 = vmatmul.mubr.msk.f32.vlgmr.msra.gmra.mxu0 %vm603_vm2, %v4652_v56  ;;  %v11885_v7 = vld [vmem:[%s12537_s1 + $0x5] ss:$0 sm:$0xff] }
 0xd6c   :  { %v11819_v24 = vadd.f32 %v10043_v17, %v11807_v55  ;;  %10086 = vmatpush3.xpose.msk.msra.mxu1 %vm603_vm2, %v4775_v48  ;;  %10091 = vmatpush3.msra.mxu0 %v4858_v15 }
 0xd6d   :  { %v4867_v34 = vpop.f32.mrf.mxu0  ;;  %10087 = vmatprep.mubr.msk.f32.mxu1 %vm10614_vm1, %v10613_v62  ;;  %10095 = vmatprep.subr.mxu1 %v10613_v62 }
 0xd6e   :  { %v11827_v49 = vadd.f32 %v11807_v55, %v4867_v34  ;;  %10092 = vmatprep.mubr.msk.f32.mxu0 %vm10614_vm1, %v10613_v62  ;;  %10100 = vmatprep.subr.mxu0 %v10613_v62 }
 0xd6f   :  { %v10046_v47 = vpop.f32.mrf.mxu0  ;;  %10088 = vmatmul.mubr.msk.f32.vlgmr.msra.gmra.mxu1 %vm603_vm2, %v4657_v43 }
 0xd70   :  { %v11834_v12 = vadd.f32 %v10046_v47, %v11807_v55  ;;  %10096 = vmatpush3.msra.mxu1 %v4863_v20  ;;  %10097 = vmatprep.mubr.msk.f32.mxu1 %vm10614_vm1, %v10613_v62  ;;  %v11899_v47 = vld [vmem:[%s12537_s1 + $0x7] ss:$0 sm:$0xff] }
 0xd71   :  { %v4877_v8 = vpop.f32.mrf.mxu0  ;;  %10105 = vmatprep.subr.mxu1 %v10613_v62 }
 0xd72   :  { %v11840_v13 = vadd.f32 %v11807_v55, %v4877_v8 }
 0xd73   :  { %v10049_v59 = vpop.f32.mrf.mxu0 }
 0xd74   :  { %v11843_v25 = vadd.f32 %v10049_v59, %v11807_v55 }
 0xd75   :  { %v11859_v26 = vpop.f32.mrf.mxu0 }
 0xe1a   :  { %v4968_v22 = vpop.f32.mrf.mxu1 }
 0xe1b   :  { %v5504_v61 = vmul.f32 0.25, %v4968_v22 }
 0xe1c   :  { %v10054_v5 = vpop.f32.mrf.mxu1 }
 0xe1d   :  { %v5512_v31 = vadd.f32 %v11848_v30, %v5504_v61 }
 0xe1e   :  { %v5044_v32 = vpop.f32.mrf.mxu1 }
 0xe1f   :  { %v5505_v11 = vmul.f32 0.25, %v5044_v32  ;;  %v5520_v35 = vsel %vm1276_vm3, %v5512_v31, -inf }
 0xe20   :  { %5521 = vmax.xlane.f32.xlu1 %v5520_v35  ;;  %v10059_v36 = vpop.f32.mrf.mxu1 }
 0xe21   :  { %v5513_v50 = vadd.f32 %v11855_v14, %v5505_v11 }
 0xe23   :  { %v5120_v40 = vpop.f32.mrf.mxu1  ;;  %v5523_v9 = vsel %vm1276_vm3, %v5513_v50, -inf }
 0xe24   :  { %v5506_v33 = vmul.f32 0.25, %v5120_v40  ;;  %5524 = vmax.xlane.f32.xlu0 %v5523_v9 }
 0xe25   :  { %v10064_v21 = vpop.f32.mrf.mxu1 }
 0xe26   :  { %v5514_v38 = vadd.f32 %v11864_v6, %v5506_v33 }
 0xe27   :  { %v5196_v27 = vpop.f32.mrf.mxu1  ;;  %v5272_v37 = vpop.f32.mrf.mxu0 }
 0xe28   :  { %v5507_v42 = vmul.f32 0.25, %v5196_v27  ;;  %v5508_v41 = vmul.f32 0.25, %v5272_v37  ;;  %v5526_v28 = vsel %vm1276_vm3, %v5514_v38, -inf }
 0xe29   :  { %5527 = vmax.xlane.f32.xlu1 %v5526_v28  ;;  %v10069_v51 = vpop.f32.mrf.mxu1  ;;  %v10074_v46 = vpop.f32.mrf.mxu0 }
 0xe2a   :  { %v5515_v23 = vadd.f32 %v11871_v29, %v5507_v42  ;;  %v5516_v44 = vadd.f32 %v11877_v58, %v5508_v41 }
 0xe2b   :  { %v5348_v1 = vpop.f32.mrf.mxu1  ;;  %v5424_v16 = vpop.f32.mrf.mxu0 }
 0xe2c   :  { %v5509_v0 = vmul.f32 0.25, %v5348_v1  ;;  %v5510_v53 = vmul.f32 0.25, %v5424_v16  ;;  %v5529_v2 = vsel %vm1276_vm3, %v5515_v23, -inf  ;;  %v5532_v3 = vsel %vm1276_vm3, %v5516_v44, -inf }
 0xe2d   :  { %5530 = vmax.xlane.f32.xlu0 %v5529_v2  ;;  %v10079_v54 = vpop.f32.mrf.mxu1  ;;  %5533 = vmax.xlane.f32.xlu1 %v5532_v3  ;;  %v10084_v63 = vpop.f32.mrf.mxu0 }
 0xe2e   :  { %v5517_v56 = vadd.f32 %v11885_v7, %v5509_v0  ;;  %v5518_v48 = vadd.f32 %v11891_v39, %v5510_v53 }
 0xe2f   :  { %v5500_v15 = vpop.f32.mrf.mxu1 }
 0xe30   :  { %v5511_v17 = vmul.f32 0.25, %v5500_v15  ;;  %v5535_v43 = vsel %vm1276_vm3, %v5517_v56, -inf  ;;  %v5538_v34 = vsel %vm1276_vm3, %v5518_v48, -inf }
 0xe31   :  { %5536 = vmax.xlane.f32.xlu0 %v5535_v43  ;;  %v10089_v20 = vpop.f32.mrf.mxu1  ;;  %5539 = vmax.xlane.f32.xlu1 %v5538_v34 }
 0xe32   :  { %v5519_v8 = vadd.f32 %v11899_v47, %v5511_v17 }
 0xe34   :  { %v5541_v59 = vsel %vm1276_vm3, %v5519_v8, -inf }
 0xe35   :  { %5542 = vmax.xlane.f32.xlu0 %v5541_v59 }
 0xea9   :  { %v5522_v22 = vpop.xlane.xlu1 %5521 }
 0xeaa   :  { %v5544_v61 = vsub.f32 %v5512_v31, %v5522_v22 }
 0xeac   :  { %v5552_v5 = vmul.f32 1.442695, %v5544_v61 }
 0xead   :  { %v5525_v32 = vpop.xlane.xlu0 %5524 }
 0xeae   :  { %10491 = vpow2.f32 %v5552_v5  ;;  %v5545_v11 = vsub.f32 %v5513_v50, %v5525_v32 }
 0xeb0   :  { %v5554_v35 = vmul.f32 1.442695, %v5545_v11 }
 0xeb2   :  { %10493 = vpow2.f32 %v5554_v35  ;;  %v5528_v36 = vpop.xlane.xlu1 %5527 }
 0xeb3   :  { %v5546_v40 = vsub.f32 %v5514_v38, %v5528_v36 }
 0xeb5   :  { %v5556_v9 = vmul.f32 1.442695, %v5546_v40 }
 0xeb6   :  { %v5531_v33 = vpop.xlane.xlu0 %5530  ;;  %v5534_v21 = vpop.xlane.xlu1 %5533 }
 0xeb7   :  { %10495 = vpow2.f32 %v5556_v9  ;;  %v5547_v27 = vsub.f32 %v5515_v23, %v5531_v33  ;;  %v5548_v37 = vsub.f32 %v5516_v44, %v5534_v21 }
 0xeb9   :  { %v5558_v42 = vmul.f32 1.442695, %v5547_v27  ;;  %v5560_v41 = vmul.f32 1.442695, %v5548_v37 }
 0xeba   :  { %v5537_v28 = vpop.xlane.xlu0 %5536  ;;  %v5540_v51 = vpop.xlane.xlu1 %5539 }
 0xebb   :  { %v10492_v46 = vpop.eup %10491  ;;  %10497 = vpow2.f32 %v5558_v42  ;;  %v5549_v31 = vsub.f32 %v5517_v56, %v5537_v28  ;;  %v5550_v1 = vsub.f32 %v5518_v48, %v5540_v51  ;;  %v4888_v51 = vadd.f32 %v11807_v55, %v11859_v26 }
 0xebc   :  { %10499 = vpow2.f32 %v5560_v41  ;;  %v5568_v50 = vsel %vm1276_vm3, %v10492_v46, 0.0 }
 0xebd   :  { %v5562_v16 = vmul.f32 1.442695, %v5549_v31  ;;  %v5564_v0 = vmul.f32 1.442695, %v5550_v1  ;;  %5569 = vadd.xlane.f32.xlu1 %v5568_v50  ;;  %v9144_v50 = vld [vmem:[%s12571_s0 + $0x78] sm:$0xff] }
 0xebe   :  { %v5543_v38 = vpop.xlane.xlu0 %5542 }
 0xebf   :  { %v10494_v53 = vpop.eup %10493  ;;  %10501 = vpow2.f32 %v5562_v16  ;;  %v5551_v2 = vsub.f32 %v5519_v8, %v5543_v38  ;;  %v9128_v16 = vld [vmem:[%s12570_s7 + $0x68] sm:$0xff]  ;;  %v9143_v38 = vld [vmem:[%s12571_s0 + $0x70] sm:$0xff] }
 0xec0   :  { %10503 = vpow2.f32 %v5564_v0  ;;  %v5571_v23 = vsel %vm1276_vm3, %v10494_v53, 0.0 }
 0xec1   :  { %v5566_v44 = vmul.f32 1.442695, %v5551_v2  ;;  %5572 = vadd.xlane.f32.xlu0 %v5571_v23  ;;  %v9158_v2 = vld [vmem:[%s12572_s30 + $0x78] sm:$0xff]  ;;  %v9141_v23 = vld [vmem:[%s12571_s0 + $0x60] sm:$0xff] }
 0xec3   :  { %10505 = vpow2.f32 %v5566_v44  ;;  %v9157_v44 = vld [vmem:[%s12572_s30 + $0x70] sm:$0xff] }
 0xec4   :  { %v10496_v3 = vpop.eup %10495 }
 0xec5   :  { %v5574_v54 = vsel %vm1276_vm3, %v10496_v3, 0.0 }
 0xec6   :  { %5575 = vadd.xlane.f32.xlu1 %v5574_v54  ;;  %v9155_v54 = vld [vmem:[%s12572_s30 + $0x60] sm:$0xff] }
 0xec8   :  { %v10498_v63 = vpop.eup %10497 }
 0xec9   :  { %v10500_v56 = vpop.eup %10499  ;;  %v5577_v48 = vsel %vm1276_vm3, %v10498_v63, 0.0 }
 0xeca   :  { %5578 = vadd.xlane.f32.xlu0 %v5577_v48  ;;  %v5580_v15 = vsel %vm1276_vm3, %v10500_v56, 0.0 }
 0xecb   :  { %5581 = vadd.xlane.f32.xlu1 %v5580_v15 }
 0xecc   :  { %v10502_v17 = vpop.eup %10501 }
 0xecd   :  { %v10504_v43 = vpop.eup %10503  ;;  %v5583_v34 = vsel %vm1276_vm3, %v10502_v17, 0.0 }
 0xece   :  { %5584 = vadd.xlane.f32.xlu0 %v5583_v34  ;;  %v5586_v20 = vsel %vm1276_vm3, %v10504_v43, 0.0 }
 0xecf   :  { %5587 = vadd.xlane.f32.xlu1 %v5586_v20 }
 0xed0   :  { %v11910_v8 = vpop.eup %10505 }
 0xed1   :  { %v5589_v59 = vsel %vm1276_vm3, %v11910_v8, 0.0 }
 0xed2   :  { %5590 = vadd.xlane.f32.xlu0 %v5589_v59 }
 0xf46   :  { %v5570_v22 = vpop.xlane.xlu1 %5569 }
 0xf47   :  { %10507 = vrcp.f32 %v5570_v22 }
 0xf4a   :  { %v5573_v61 = vpop.xlane.xlu0 %5572 }
 0xf4b   :  { %10509 = vrcp.f32 %v5573_v61 }
 0xf4f   :  { %v5576_v5 = vpop.xlane.xlu1 %5575 }
 0xf50   :  { %10511 = vrcp.f32 %v5576_v5 }
 0xf53   :  { %v5579_v32 = vpop.xlane.xlu0 %5578 }
 0xf54   :  { %v10508_v11 = vpop.eup %10507  ;;  %10513 = vrcp.f32 %v5579_v32  ;;  %v5582_v35 = vpop.xlane.xlu1 %5581 }
 0xf55   :  { %10515 = vrcp.f32 %v5582_v35  ;;  %v5600_v36 = vmul.f32 %v10508_v11, %v10492_v46 }
 0xf57   :  { %v5585_v40 = vpop.xlane.xlu0 %5584  ;;  %10093 = vmatmul.mubr.msk.f32.vlgmr.msra.gmra.mxu0 %vm1276_vm3, %v5600_v36 }
 0xf58   :  { %v10510_v9 = vpop.eup %10509  ;;  %10517 = vrcp.f32 %v5585_v40  ;;  %v5588_v33 = vpop.xlane.xlu1 %5587  ;;  %10101 = vmatpush3.msra.mxu0 %v11827_v49  ;;  %10102 = vmatprep.mubr.msk.f32.mxu0 %vm10614_vm1, %v10613_v62 }
 0xf59   :  { %10519 = vrcp.f32 %v5588_v33  ;;  %v5601_v21 = vmul.f32 %v10510_v9, %v10494_v53  ;;  %10110 = vmatprep.subr.mxu0 %v10613_v62  ;;  %v9142_v53 = vld [vmem:[%s12571_s0 + $0x68] sm:$0xff] }
 0xf5b   :  { %v5591_v27 = vpop.xlane.xlu0 %5590  ;;  %10098 = vmatmul.mubr.msk.f32.vlgmr.msra.gmra.mxu1 %vm1276_vm3, %v5601_v21 }
 0xf5c   :  { %10521 = vrcp.f32 %v5591_v27  ;;  %10106 = vmatpush3.msra.mxu1 %v11819_v24  ;;  %10107 = vmatprep.mubr.msk.f32.mxu1 %vm10614_vm1, %v10613_v62  ;;  %v12055_v27 = vld [vmem:[%s12575_s9 + $0x3] ss:$0 sm:$0xff] }
 0xf5d   :  { %v10512_v37 = vpop.eup %10511  ;;  %10115 = vmatprep.subr.mxu1 %v10613_v62 }
 0xf5e   :  { %v5602_v49 = vmul.f32 %v10512_v37, %v10496_v3  ;;  %v9156_v3 = vld [vmem:[%s12572_s30 + $0x68] sm:$0xff] }
 0xf60   :  { %10103 = vmatmul.mubr.msk.f32.vlgmr.msra.gmra.mxu0 %vm1276_vm3, %v5602_v49 }
 0xf61   :  { %v10514_v42 = vpop.eup %10513  ;;  %10111 = vmatpush3.msra.mxu0 %v11840_v13  ;;  %10112 = vmatprep.mubr.msk.f32.mxu0 %vm10614_vm1, %v10613_v62  ;;  %v9130_v13 = vld [vmem:[%s12570_s7 + $0x78] sm:$0xff] }
 0xf62   :  { %v10516_v41 = vpop.eup %10515  ;;  %10120 = vmatprep.subr.mxu0 %v10613_v62  ;;  %v5603_v28 = vmul.f32 %v10514_v42, %v10498_v63 }
 0xf63   :  { %v5604_v24 = vmul.f32 %v10516_v41, %v10500_v56 }
 0xf64   :  { %10108 = vmatmul.mubr.msk.f32.vlgmr.msra.gmra.mxu1 %vm1276_vm3, %v5603_v28  ;;  %v12061_v28 = vld [vmem:[%s12576_s3 + $0x3] ss:$0 sm:$0xff] }
 0xf65   :  { %v10518_v46 = vpop.eup %10517  ;;  %10113 = vmatmul.mubr.msk.f32.vlgmr.msra.gmra.mxu0 %vm1276_vm3, %v5604_v24  ;;  %10116 = vmatpush3.msra.mxu1 %v11834_v12  ;;  %v9129_v12 = vld [vmem:[%s12570_s7 + $0x70] sm:$0xff] }
 0xf66   :  { %v10520_v31 = vpop.eup %10519  ;;  %10121 = vmatpush3.msra.mxu0 %v4888_v51  ;;  %10117 = vmatprep.mubr.msk.f32.mxu1 %vm10614_vm1, %v10613_v62  ;;  %v5605_v1 = vmul.f32 %v10518_v46, %v10502_v17 }
 0xf67   :  { %10122 = vmatprep.mubr.msk.f32.mxu0 %vm10614_vm1, %v10613_v62  ;;  %10125 = vmatprep.subr.mxu1 %v10613_v62  ;;  %v5606_v55 = vmul.f32 %v10520_v31, %v10504_v43 }
 0xf68   :  { %10130 = vmatprep.subr.mxu0 %v9130_v13  ;;  %10118 = vmatmul.mubr.msk.f32.vlgmr.msra.gmra.mxu1 %vm1276_vm3, %v5605_v1 }
 0xf69   :  { %v10522_v26 = vpop.eup %10521  ;;  %10123 = vmatmul.mubr.msk.f32.vlgmr.msra.gmra.mxu0 %vm1276_vm3, %v5606_v55  ;;  %10126 = vmatpush3.msra.mxu1 %v11843_v25  ;;  %v9127_v25 = vld [vmem:[%s12570_s7 + $0x60] sm:$0xff] }
 0xf6a   :  { %10131 = vmatpush3.msra.mxu0 %v9130_v13  ;;  %10138 = vmatprep.mubr.msk.f32.mxu0 %vm89_vm0, %v11691_v60  ;;  %v5607_v0 = vmul.f32 %v10522_v26, %v11910_v8 }
 0xf6b   :  { %10132 = vmatprep.subr.mxu0 %v9129_v12  ;;  %10127 = vmatprep.mubr.msk.f32.mxu1 %vm10614_vm1, %v10613_v62 }
 0xf6c   :  { %10133 = vmatpush3.msra.mxu0 %v9129_v12  ;;  %10150 = vmatprep.subr.mxu1 %v9144_v50 }
 0xf6d   :  { %10134 = vmatprep.subr.mxu0 %v9128_v16  ;;  %10128 = vmatmul.mubr.msk.f32.vlgmr.msra.gmra.mxu1 %vm1276_vm3, %v5607_v0 }
 0xf6e   :  { %10135 = vmatpush3.msra.mxu0 %v9128_v16  ;;  %10151 = vmatpush3.msra.mxu1 %v9144_v50 }
 0xf6f   :  { %10136 = vmatprep.subr.mxu0 %v9127_v25  ;;  %10152 = vmatprep.subr.mxu1 %v9143_v38 }
 0xf70   :  { %10158 = vmatprep.mubr.msk.f32.mxu1 %vm89_vm0, %v11691_v60  ;;  %10137 = vmatpush3.msra.mxu0 %v9127_v25 }
 0xf71   :  { %10153 = vmatpush3.msra.mxu1 %v9143_v38  ;;  %10139 = vmatmul.mubr.msk.f32.vlgmr.msra.gmra.mxu0 %vm89_vm0, %v11693_v10 }
 0xf72   :  { %10154 = vmatprep.subr.mxu1 %v9142_v53  ;;  %10141 = vmatprep.mubr.msk.f32.mxu0 %vm89_vm0, %v11715_v18 }
 0xf73   :  { %10155 = vmatpush3.msra.mxu1 %v9142_v53  ;;  %10170 = vmatprep.subr.mxu0 %v9158_v2 }
 0xf74   :  { %10156 = vmatprep.subr.mxu1 %v9141_v23  ;;  %10171 = vmatpush3.msra.mxu0 %v9158_v2 }
 0xf75   :  { %10157 = vmatpush3.msra.mxu1 %v9141_v23  ;;  %10142 = vmatmul.mubr.msk.f32.gmra.mxu0 %vm89_vm0, %v11718_v19 }
 0xf76   :  { %10159 = vmatmul.mubr.msk.f32.vlgmr.msra.gmra.mxu1 %vm89_vm0, %v11693_v10  ;;  %10144 = vmatprep.mubr.msk.f32.mxu0 %vm89_vm0, %v11729_v57 }
 0xf77   :  { %10161 = vmatprep.mubr.msk.f32.mxu1 %vm89_vm0, %v11715_v18  ;;  %10172 = vmatprep.subr.mxu0 %v9157_v44 }
 0xf78   :  { %10173 = vmatpush3.msra.mxu0 %v9157_v44  ;;  %10190 = vmatprep.subr.mxu1 %v10613_v62 }
 0xf79   :  { %10145 = vmatmul.mubr.msk.f32.gmra.mxu0 %vm89_vm0, %v11733_v4  ;;  %10174 = vmatprep.subr.mxu0 %v9156_v3 }
 0xf7a   :  { %10162 = vmatmul.mubr.msk.f32.gmra.mxu1 %vm89_vm0, %v11718_v19  ;;  %10147 = vmatprep.mubr.msk.f32.mxu0 %vm89_vm0, %v11743_v45 }
 0xf7b   :  { %10164 = vmatprep.mubr.msk.f32.mxu1 %vm89_vm0, %v11729_v57  ;;  %10175 = vmatpush3.msra.mxu0 %v9156_v3  ;;  %v12087_v3 = vld [vmem:[%s12577_s28 + $0x3] ss:$0 sm:$0xff] }
 0xf7c   :  { %10176 = vmatprep.subr.mxu0 %v9155_v54 }
 0xf7d   :  { %10148 = vmatmul.mubr.msk.f32.gmra.mxu0 %vm89_vm0, %v11745_v52 }
 0xf7e   :  { %10165 = vmatmul.mubr.msk.f32.gmra.mxu1 %vm89_vm0, %v11733_v4  ;;  %10178 = vmatprep.mubr.msk.f32.mxu0 %vm89_vm0, %v11691_v60 }
 0xf7f   :  { %10167 = vmatprep.mubr.msk.f32.mxu1 %vm89_vm0, %v11743_v45  ;;  %10177 = vmatpush3.msra.mxu0 %v9155_v54 }
 0xf80   :  { %10210 = vmatprep.subr.mxu0 %v10613_v62 }
 0xf81   :  { %10179 = vmatmul.mubr.msk.f32.vlgmr.msra.gmra.mxu0 %vm89_vm0, %v11693_v10 }
 0xf82   :  { %10168 = vmatmul.mubr.msk.f32.gmra.mxu1 %vm89_vm0, %v11745_v52  ;;  %10181 = vmatprep.mubr.msk.f32.mxu0 %vm89_vm0, %v11715_v18 }
 0xf83   :  { %10192 = vmatprep.mubr.msk.f32.mxu1 %vm10614_vm1, %v10613_v62 }
 0xf85   :  { %10182 = vmatmul.mubr.msk.f32.gmra.mxu0 %vm89_vm0, %v11718_v19 }
 0xf86   :  { %10184 = vmatprep.mubr.msk.f32.mxu0 %vm89_vm0, %v11729_v57 }
 0xf89   :  { %10185 = vmatmul.mubr.msk.f32.gmra.mxu0 %vm89_vm0, %v11733_v4 }
 0xf8a   :  { %10187 = vmatprep.mubr.msk.f32.mxu0 %vm89_vm0, %v11743_v45 }
 0xf8d   :  { %10188 = vmatmul.mubr.msk.f32.gmra.mxu0 %vm89_vm0, %v11745_v52 }
 0xf8e   :  { %10212 = vmatprep.mubr.msk.f32.mxu0 %vm10614_vm1, %v10613_v62 }
0x1017   :  { %v12036_v63 = vpop.f32.mrf.mxu0 }
0x1019   :  { %v10094_v56 = vpop.f32.mrf.mxu0 }
0x101b   :  { %v12038_v48 = vpop.f32.mrf.mxu1 }
0x101d   :  { %v10099_v15 = vpop.f32.mrf.mxu1 }
0x1020   :  { %v12040_v17 = vpop.f32.mrf.mxu0 }
0x1022   :  { %v10104_v43 = vpop.f32.mrf.mxu0 }
0x1024   :  { %v12042_v34 = vpop.f32.mrf.mxu1 }
0x1025   :  { %v12044_v20 = vpop.f32.mrf.mxu0 }
0x1026   :  { %v10109_v8 = vpop.f32.mrf.mxu1 }
0x1027   :  { %v10114_v59 = vpop.f32.mrf.mxu0 }
0x1028   :  { %v12046_v22 = vpop.f32.mrf.mxu1 }
0x1029   :  { %v12048_v61 = vpop.f32.mrf.mxu0 }
0x102a   :  { %v10119_v5 = vpop.f32.mrf.mxu1 }
0x102b   :  { %v10124_v32 = vpop.f32.mrf.mxu0 }
0x102d   :  { %v12050_v11 = vpop.f32.mrf.mxu1 }
0x102f   :  { %v10129_v35 = vpop.f32.mrf.mxu1 }
0x1031   :  { %v10140_v36 = vpop.f32.mrf.mxu0 }
0x1032   :  { %v6280_v12 = vadd.f32 %v10140_v36, %v12061_v28 }
0x1033   :  { %v6274_v40 = vpop.f32.mrf.mxu0 }
0x1034   :  { %v6275_v51 = vadd.f32 %v12061_v28, %v6274_v40 }
0x1035   :  { %v10143_v9 = vpop.f32.mrf.mxu0 }
0x1036   :  { %v10160_v33 = vpop.f32.mrf.mxu1  ;;  %v6290_v8 = vadd.f32 %v10143_v9, %v12061_v28 }
0x1037   :  { %v6284_v21 = vpop.f32.mrf.mxu0  ;;  %v6398_v13 = vadd.f32 %v10160_v33, %v12055_v27 }
0x1038   :  { %v6392_v37 = vpop.f32.mrf.mxu1  ;;  %v6285_v53 = vadd.f32 %v12061_v28, %v6284_v21 }
0x1039   :  { %v6393_v49 = vadd.f32 %v12055_v27, %v6392_v37  ;;  %v10146_v42 = vpop.f32.mrf.mxu0 }
0x103a   :  { %v10163_v41 = vpop.f32.mrf.mxu1  ;;  %v6300_v33 = vadd.f32 %v10146_v42, %v12061_v28 }
0x103b   :  { %10191 = vmatpush3.xpose.msk.msra.mxu1 %vm603_vm2, %v6393_v49  ;;  %v6294_v24 = vpop.f32.mrf.mxu0  ;;  %v6408_v44 = vadd.f32 %v10163_v41, %v12055_v27 }
0x103c   :  { %v6402_v46 = vpop.f32.mrf.mxu1  ;;  %10195 = vmatprep.subr.mxu1 %v10613_v62  ;;  %v6295_v2 = vadd.f32 %v12061_v28, %v6294_v24 }
0x103d   :  { %v10149_v31 = vpop.f32.mrf.mxu0  ;;  %v6403_v50 = vadd.f32 %v12055_v27, %v6402_v46 }
0x103e   :  { %v10166_v1 = vpop.f32.mrf.mxu1  ;;  %10193 = vmatmul.mubr.msk.f32.vlgmr.msra.gmra.mxu1 %vm603_vm2, %v6275_v51  ;;  %v6310_v42 = vadd.f32 %v10149_v31, %v12061_v28 }
0x103f   :  { %10196 = vmatpush3.xpose.msk.msra.mxu1 %vm603_vm2, %v6398_v13  ;;  %v6304_v55 = vpop.f32.mrf.mxu0  ;;  %10197 = vmatprep.mubr.msk.f32.mxu1 %vm10614_vm1, %v10613_v62  ;;  %v6418_v32 = vadd.f32 %v10166_v1, %v12055_v27 }
0x1040   :  { %v6412_v26 = vpop.f32.mrf.mxu1  ;;  %10200 = vmatprep.subr.mxu1 %v10613_v62  ;;  %v6305_v59 = vadd.f32 %v12061_v28, %v6304_v55 }
0x1041   :  { %v6413_v16 = vadd.f32 %v12055_v27, %v6412_v26  ;;  %v10180_v0 = vpop.f32.mrf.mxu0 }
0x1042   :  { %v10169_v25 = vpop.f32.mrf.mxu1  ;;  %10198 = vmatmul.mubr.msk.f32.vlgmr.msra.gmra.mxu1 %vm603_vm2, %v6280_v12 }
0x1043   :  { %10201 = vmatpush3.xpose.msk.msra.mxu1 %vm603_vm2, %v6403_v50  ;;  %10211 = vmatpush3.xpose.msk.msra.mxu0 %vm603_vm2, %v6413_v16  ;;  %v6510_v38 = vpop.f32.mrf.mxu0  ;;  %v6428_v37 = vadd.f32 %v10169_v25, %v12055_v27 }
0x1044   :  { %v6422_v23 = vpop.f32.mrf.mxu1  ;;  %10202 = vmatprep.mubr.msk.f32.mxu1 %vm10614_vm1, %v10613_v62  ;;  %10205 = vmatprep.subr.mxu1 %v10613_v62  ;;  %v6511_v35 = vadd.f32 %v12087_v3, %v6510_v38 }
0x1045   :  { %v6423_v54 = vadd.f32 %v12055_v27, %v6422_v23  ;;  %v10183_v56 = vpop.f32.mrf.mxu0  ;;  %10220 = vmatprep.subr.mxu0 %v10613_v62  ;;  %v6516_v27 = vadd.f32 %v10180_v0, %v12087_v3 }
0x1046   :  { %v12092_v15 = vadd.f32 %v10183_v56, %v12087_v3  ;;  %10203 = vmatmul.mubr.msk.f32.vlgmr.msra.gmra.mxu1 %vm603_vm2, %v6285_v53  ;;  %10213 = vmatmul.mubr.msk.f32.vlgmr.msra.gmra.mxu0 %vm603_vm2, %v6295_v2 }
0x1047   :  { %10206 = vmatpush3.xpose.msk.msra.mxu1 %vm603_vm2, %v6408_v44  ;;  %10221 = vmatpush3.xpose.msk.msra.mxu0 %vm603_vm2, %v6423_v54  ;;  %v6520_v43 = vpop.f32.mrf.mxu0 }
0x1048   :  { %v12101_v5 = vadd.f32 %v12087_v3, %v6520_v43  ;;  %10207 = vmatprep.mubr.msk.f32.mxu1 %vm10614_vm1, %v10613_v62  ;;  %10222 = vmatprep.mubr.msk.f32.mxu0 %vm10614_vm1, %v10613_v62 }
0x1049   :  { %v10186_v36 = vpop.f32.mrf.mxu0  ;;  %10215 = vmatprep.subr.mxu1 %v10613_v62  ;;  %10230 = vmatprep.subr.mxu0 %v10613_v62 }
0x104a   :  { %v12112_v40 = vadd.f32 %v10186_v36, %v12087_v3  ;;  %10208 = vmatmul.mubr.msk.f32.vlgmr.msra.gmra.mxu1 %vm603_vm2, %v6290_v8  ;;  %10223 = vmatmul.mubr.msk.f32.vlgmr.msra.gmra.mxu0 %vm603_vm2, %v6305_v59 }
0x104b   :  { %10216 = vmatpush3.xpose.msk.msra.mxu1 %vm603_vm2, %v6418_v32  ;;  %10231 = vmatpush3.msra.mxu0 %v6511_v35  ;;  %v6530_v9 = vpop.f32.mrf.mxu0 }
0x104c   :  { %v12119_v21 = vadd.f32 %v12087_v3, %v6530_v9  ;;  %10217 = vmatprep.mubr.msk.f32.mxu1 %vm10614_vm1, %v10613_v62  ;;  %10225 = vmatprep.subr.mxu1 %v10613_v62 }
0x104d   :  { %v10189_v49 = vpop.f32.mrf.mxu0  ;;  %10232 = vmatprep.mubr.msk.f32.mxu0 %vm10614_vm1, %v10613_v62  ;;  %10240 = vmatprep.subr.mxu0 %v10613_v62 }
0x104e   :  { %v12129_v41 = vadd.f32 %v10189_v49, %v12087_v3  ;;  %10218 = vmatmul.mubr.msk.f32.vlgmr.msra.gmra.mxu1 %vm603_vm2, %v6300_v33 }
0x104f   :  { %10226 = vmatpush3.xpose.msk.msra.mxu1 %vm603_vm2, %v6428_v37  ;;  %10227 = vmatprep.mubr.msk.f32.mxu1 %vm10614_vm1, %v10613_v62  ;;  %v12144_v31 = vpop.f32.mrf.mxu0 }
0x1050   :  { %10235 = vmatprep.subr.mxu1 %v10613_v62 }
0x1052   :  { %10228 = vmatmul.mubr.msk.f32.vlgmr.msra.gmra.mxu1 %vm603_vm2, %v6310_v42 }
0x1053   :  { %10236 = vmatpush3.msra.mxu1 %v6516_v27  ;;  %10237 = vmatprep.mubr.msk.f32.mxu1 %vm10614_vm1, %v10613_v62 }
0x1054   :  { %10245 = vmatprep.subr.mxu1 %v10613_v62 }
0x10fe   :  { %v6621_v24 = vpop.f32.mrf.mxu1 }
0x10ff   :  { %v7157_v51 = vmul.f32 0.25, %v6621_v24 }
0x1100   :  { %v10194_v46 = vpop.f32.mrf.mxu1 }
0x1101   :  { %v7165_v13 = vadd.f32 %v11848_v30, %v7157_v51 }
0x1102   :  { %v6697_v1 = vpop.f32.mrf.mxu1 }
0x1103   :  { %v7158_v55 = vmul.f32 0.25, %v6697_v1  ;;  %v7173_v28 = vsel %vm1276_vm3, %v7165_v13, -inf }
0x1104   :  { %7174 = vmax.xlane.f32.xlu0 %v7173_v28  ;;  %v10199_v12 = vpop.f32.mrf.mxu1 }
0x1105   :  { %v7166_v26 = vadd.f32 %v11855_v14, %v7158_v55 }
0x1106   :  { %v6773_v50 = vpop.f32.mrf.mxu1  ;;  %v6925_v16 = vpop.f32.mrf.mxu0 }
0x1107   :  { %v7159_v0 = vmul.f32 0.25, %v6773_v50  ;;  %v7161_v25 = vmul.f32 0.25, %v6925_v16  ;;  %v7176_v38 = vsel %vm1276_vm3, %v7166_v26, -inf }
0x1108   :  { %v10214_v53 = vpop.f32.mrf.mxu0  ;;  %7177 = vmax.xlane.f32.xlu1 %v7176_v38  ;;  %v10204_v2 = vpop.f32.mrf.mxu1 }
0x1109   :  { %v7167_v30 = vadd.f32 %v11864_v6, %v7159_v0  ;;  %v7169_v54 = vadd.f32 %v11877_v58, %v7161_v25 }
0x110a   :  { %v6849_v23 = vpop.f32.mrf.mxu1  ;;  %v7077_v44 = vpop.f32.mrf.mxu0 }
0x110b   :  { %v7160_v56 = vmul.f32 0.25, %v6849_v23  ;;  %v7163_v43 = vmul.f32 0.25, %v7077_v44  ;;  %v7179_v8 = vsel %vm1276_vm3, %v7167_v30, -inf  ;;  %v7185_v33 = vsel %vm1276_vm3, %v7169_v54, -inf }
0x110c   :  { %v10224_v14 = vpop.f32.mrf.mxu0  ;;  %7180 = vmax.xlane.f32.xlu0 %v7179_v8  ;;  %v10209_v59 = vpop.f32.mrf.mxu1 }
0x110d   :  { %v7168_v32 = vadd.f32 %v11871_v29, %v7160_v56  ;;  %v7171_v36 = vadd.f32 %v11891_v39, %v7163_v43 }
0x110e   :  { %v7001_v35 = vpop.f32.mrf.mxu1 }
0x110f   :  { %v7162_v9 = vmul.f32 0.25, %v7001_v35  ;;  %v7182_v6 = vsel %vm1276_vm3, %v7168_v32, -inf  ;;  %v7191_v27 = vsel %vm1276_vm3, %v7171_v36, -inf }
0x1110   :  { %7186 = vmax.xlane.f32.xlu0 %v7185_v33  ;;  %7183 = vmax.xlane.f32.xlu1 %v7182_v6  ;;  %v10219_v58 = vpop.f32.mrf.mxu1 }
0x1111   :  { %v7170_v37 = vadd.f32 %v11885_v7, %v7162_v9 }
0x1112   :  { %v7153_v49 = vpop.f32.mrf.mxu1 }
0x1113   :  { %v7164_v42 = vmul.f32 0.25, %v7153_v49  ;;  %v7188_v24 = vsel %vm1276_vm3, %v7170_v37, -inf }
0x1114   :  { %7192 = vmax.xlane.f32.xlu0 %v7191_v27  ;;  %7189 = vmax.xlane.f32.xlu1 %v7188_v24  ;;  %v10229_v29 = vpop.f32.mrf.mxu1 }
0x1115   :  { %v7172_v39 = vadd.f32 %v11899_v47, %v7164_v42 }
0x1117   :  { %v7194_v51 = vsel %vm1276_vm3, %v7172_v39, -inf }
0x1118   :  { %7195 = vmax.xlane.f32.xlu1 %v7194_v51 }
0x118d   :  { %v7175_v46 = vpop.xlane.xlu0 %7174 }
0x118e   :  { %v7197_v1 = vsub.f32 %v7165_v13, %v7175_v46 }
0x1190   :  { %v7205_v55 = vmul.f32 1.442695, %v7197_v1 }
0x1191   :  { %v7178_v28 = vpop.xlane.xlu1 %7177 }
0x1192   :  { %10523 = vpow2.f32 %v7205_v55  ;;  %v7198_v7 = vsub.f32 %v7166_v26, %v7178_v28 }
0x1194   :  { %v7207_v12 = vmul.f32 1.442695, %v7198_v7 }
0x1195   :  { %v7181_v50 = vpop.xlane.xlu0 %7180 }
0x1196   :  { %10525 = vpow2.f32 %v7207_v12  ;;  %v7199_v16 = vsub.f32 %v7167_v30, %v7181_v50 }
0x1198   :  { %v7209_v0 = vmul.f32 1.442695, %v7199_v16 }
0x1199   :  { %v7187_v25 = vpop.xlane.xlu0 %7186  ;;  %v7184_v38 = vpop.xlane.xlu1 %7183 }
0x119a   :  { %10527 = vpow2.f32 %v7209_v0  ;;  %v7201_v53 = vsub.f32 %v7169_v54, %v7187_v25  ;;  %v7200_v2 = vsub.f32 %v7168_v32, %v7184_v38 }
0x119c   :  { %v7213_v47 = vmul.f32 1.442695, %v7201_v53  ;;  %v7211_v23 = vmul.f32 1.442695, %v7200_v2 }
0x119d   :  { %v7193_v44 = vpop.xlane.xlu0 %7192  ;;  %v7190_v56 = vpop.xlane.xlu1 %7189 }
0x119e   :  { %10529 = vpow2.f32 %v7213_v47  ;;  %v7203_v13 = vsub.f32 %v7171_v36, %v7193_v44  ;;  %v7202_v43 = vsub.f32 %v7170_v37, %v7190_v56 }
0x119f   :  { %v10524_v8 = vpop.eup %10523  ;;  %10531 = vpow2.f32 %v7211_v23 }
0x11a0   :  { %v7217_v26 = vmul.f32 1.442695, %v7203_v13  ;;  %v7215_v14 = vmul.f32 1.442695, %v7202_v43  ;;  %v7221_v59 = vsel %vm1276_vm3, %v10524_v8, 0.0 }
0x11a1   :  { %7222 = vadd.xlane.f32.xlu0 %v7221_v59  ;;  %v7196_v30 = vpop.xlane.xlu1 %7195 }
0x11a2   :  { %10533 = vpow2.f32 %v7217_v26  ;;  %v7204_v35 = vsub.f32 %v7172_v39, %v7196_v30  ;;  %v9125_v26 = vld [vmem:[%s12538_s10 + $0x20] sm:$0xff] }
0x11a3   :  { %v10526_v9 = vpop.eup %10525  ;;  %10535 = vpow2.f32 %v7215_v14 }
0x11a4   :  { %v7219_v54 = vmul.f32 1.442695, %v7204_v35  ;;  %v7224_v32 = vsel %vm1276_vm3, %v10526_v9, 0.0 }
0x11a5   :  { %7225 = vadd.xlane.f32.xlu1 %v7224_v32 }
0x11a6   :  { %10537 = vpow2.f32 %v7219_v54 }
0x11a7   :  { %v10528_v33 = vpop.eup %10527 }
0x11a8   :  { %v7227_v36 = vsel %vm1276_vm3, %v10528_v33, 0.0 }
0x11a9   :  { %7228 = vadd.xlane.f32.xlu0 %v7227_v36 }
0x11ab   :  { %v10530_v6 = vpop.eup %10529 }
0x11ac   :  { %v10532_v58 = vpop.eup %10531  ;;  %v7233_v37 = vsel %vm1276_vm3, %v10530_v6, 0.0 }
0x11ad   :  { %7234 = vadd.xlane.f32.xlu0 %v7233_v37  ;;  %v7230_v49 = vsel %vm1276_vm3, %v10532_v58, 0.0 }
0x11ae   :  { %7231 = vadd.xlane.f32.xlu1 %v7230_v49 }
0x11af   :  { %v10534_v42 = vpop.eup %10533 }
0x11b0   :  { %v10536_v27 = vpop.eup %10535  ;;  %v7239_v24 = vsel %vm1276_vm3, %v10534_v42, 0.0 }
0x11b1   :  { %7240 = vadd.xlane.f32.xlu0 %v7239_v24  ;;  %v7236_v29 = vsel %vm1276_vm3, %v10536_v27, 0.0 }
0x11b2   :  { %7237 = vadd.xlane.f32.xlu1 %v7236_v29 }
0x11b3   :  { %v10538_v39 = vpop.eup %10537 }
0x11b4   :  { %v7242_v51 = vsel %vm1276_vm3, %v10538_v39, 0.0 }
0x11b6   :  { %7243 = vadd.xlane.f32.xlu1 %v7242_v51 }
0x122a   :  { %v7223_v46 = vpop.xlane.xlu0 %7222 }
0x122b   :  { %10539 = vrcp.f32 %v7223_v46 }
0x122e   :  { %v7226_v1 = vpop.xlane.xlu1 %7225 }
0x122f   :  { %10541 = vrcp.f32 %v7226_v1 }
0x1232   :  { %v7229_v55 = vpop.xlane.xlu0 %7228 }
0x1233   :  { %10543 = vrcp.f32 %v7229_v55 }
0x1236   :  { %v7235_v28 = vpop.xlane.xlu0 %7234 }
0x1237   :  { %10545 = vrcp.f32 %v7235_v28  ;;  %v7232_v7 = vpop.xlane.xlu1 %7231 }
0x1238   :  { %v10540_v12 = vpop.eup %10539  ;;  %10547 = vrcp.f32 %v7232_v7 }
0x1239   :  { %v7253_v50 = vmul.f32 %v10540_v12, %v10524_v8 }
0x123a   :  { %v7241_v16 = vpop.xlane.xlu0 %7240 }
0x123b   :  { %10549 = vrcp.f32 %v7241_v16  ;;  %v7238_v0 = vpop.xlane.xlu1 %7237  ;;  %10233 = vmatmul.mubr.msk.f32.vlgmr.msra.gmra.mxu0 %vm1276_vm3, %v7253_v50 }
0x123c   :  { %v10542_v25 = vpop.eup %10541  ;;  %10551 = vrcp.f32 %v7238_v0  ;;  %10241 = vmatpush3.msra.mxu0 %v12101_v5  ;;  %10242 = vmatprep.mubr.msk.f32.mxu0 %vm10614_vm1, %v10613_v62 }
0x123d   :  { %v7254_v38 = vmul.f32 %v10542_v25, %v10526_v9  ;;  %10250 = vmatprep.subr.mxu0 %v10613_v62 }
0x123f   :  { %v7244_v53 = vpop.xlane.xlu1 %7243  ;;  %10238 = vmatmul.mubr.msk.f32.vlgmr.msra.gmra.mxu1 %vm1276_vm3, %v7254_v38 }
0x1240   :  { %v10544_v2 = vpop.eup %10543  ;;  %10553 = vrcp.f32 %v7244_v53  ;;  %10246 = vmatpush3.msra.mxu1 %v12092_v15  ;;  %10247 = vmatprep.mubr.msk.f32.mxu1 %vm10614_vm1, %v10613_v62  ;;  %v6541_v15 = vadd.f32 %v12087_v3, %v12144_v31  ;;  %v9126_v3 = vld [vmem:[%s12538_s10 + $0x28] sm:$0xff] }
0x1241   :  { %v7255_v47 = vmul.f32 %v10544_v2, %v10528_v33  ;;  %10255 = vmatprep.subr.mxu1 %v10613_v62 }
0x1243   :  { %10243 = vmatmul.mubr.msk.f32.vlgmr.msra.gmra.mxu0 %vm1276_vm3, %v7255_v47 }
0x1244   :  { %v10546_v5 = vpop.eup %10545  ;;  %10251 = vmatpush3.msra.mxu0 %v12119_v21  ;;  %10252 = vmatprep.mubr.msk.f32.mxu0 %vm10614_vm1, %v10613_v62 }
0x1245   :  { %v10548_v23 = vpop.eup %10547  ;;  %v7257_v44 = vmul.f32 %v10546_v5, %v10530_v6  ;;  %10260 = vmatprep.subr.mxu0 %v10613_v62 }
0x1246   :  { %v7256_v56 = vmul.f32 %v10548_v23, %v10532_v58 }
0x1247   :  { %10253 = vmatmul.mubr.msk.f32.vlgmr.msra.gmra.mxu0 %vm1276_vm3, %v7257_v44 }
0x1248   :  { %v10550_v13 = vpop.eup %10549  ;;  %10248 = vmatmul.mubr.msk.f32.vlgmr.msra.gmra.mxu1 %vm1276_vm3, %v7256_v56  ;;  %10261 = vmatpush3.msra.mxu0 %v6541_v15 }
0x1249   :  { %v10552_v43 = vpop.eup %10551  ;;  %v7259_v8 = vmul.f32 %v10550_v13, %v10534_v42  ;;  %10256 = vmatpush3.msra.mxu1 %v12112_v40  ;;  %10257 = vmatprep.mubr.msk.f32.mxu1 %vm10614_vm1, %v10613_v62  ;;  %v9212_v42 = vld [vmem:[%s12539_s11 + $0x1] ss:$0 sm:$0xff] }
0x124a   :  { %v7258_v21 = vmul.f32 %v10552_v43, %v10536_v27  ;;  %10262 = vmatprep.mubr.msk.f32.mxu0 %vm10614_vm1, %v10613_v62  ;;  %10265 = vmatprep.subr.mxu1 %v10613_v62 }
0x124b   :  { %10263 = vmatmul.mubr.msk.f32.vlgmr.msra.gmra.mxu0 %vm1276_vm3, %v7259_v8 }
0x124c   :  { %10258 = vmatmul.mubr.msk.f32.vlgmr.msra.gmra.mxu1 %vm1276_vm3, %v7258_v21 }
0x124d   :  { %v10554_v31 = vpop.eup %10553  ;;  %10266 = vmatpush3.msra.mxu1 %v12129_v41  ;;  %10267 = vmatprep.mubr.msk.f32.mxu1 %vm10614_vm1, %v10613_v62 }
0x124e   :  { %v7260_v40 = vmul.f32 %v10554_v31, %v10538_v39  ;;  %10286 = vmatprep.subr.mxu1 %v9126_v3 }
0x1250   :  { %10268 = vmatmul.mubr.msk.f32.vlgmr.msra.gmra.mxu1 %vm1276_vm3, %v7260_v40 }
0x1251   :  { %10287 = vmatpush3.msra.mxu1 %v9126_v3  ;;  %10290 = vmatprep.mubr.msk.f32.mxu1 %vm603_vm2, %v12036_v63  ;;  %v9194_v63 = vld [vmem:[%s12538_s10 + $0x38] sm:$0xff] }
0x1252   :  { %10288 = vmatprep.subr.mxu1 %v9125_v26  ;;  %10270 = vmatprep.subr.mxu0 %v9194_v63 }
0x1253   :  { %10289 = vmatpush3.msra.mxu1 %v9125_v26  ;;  %10271 = vmatpush3.msra.mxu0 %v9194_v63 }
0x1254   :  { %10291 = vmatmul.mubr.msk.f32.vlgmr.msra.gmra.mxu1 %vm603_vm2, %v12038_v48  ;;  %v9193_v48 = vld [vmem:[%s12538_s10 + $0x30] sm:$0xff] }
0x1255   :  { %10293 = vmatprep.mubr.msk.f32.mxu1 %vm603_vm2, %v12040_v17  ;;  %10272 = vmatprep.subr.mxu0 %v9193_v48 }
0x1256   :  { %10273 = vmatpush3.msra.mxu0 %v9193_v48 }
0x1258   :  { %10294 = vmatmul.mubr.msk.f32.gmra.mxu1 %vm603_vm2, %v12042_v34 }
0x1259   :  { %10296 = vmatprep.mubr.msk.f32.mxu1 %vm603_vm2, %v12044_v20 }
0x125c   :  { %10297 = vmatmul.mubr.msk.f32.gmra.mxu1 %vm603_vm2, %v12046_v22 }
0x125d   :  { %10299 = vmatprep.mubr.msk.f32.mxu1 %vm603_vm2, %v12048_v61 }
0x1260   :  { %10300 = vmatmul.mubr.msk.f32.gmra.mxu1 %vm603_vm2, %v12050_v11 }
0x12fb   :  { %v7330_v17 = vpop.f32.mrf.mxu0 }
0x12fc   :  { %10274 = vmatprep.mubr.msk.f32.mxu0 %vm603_vm2, %v7330_v17 }
0x12fd   :  { %v10234_v34 = vpop.f32.mrf.mxu0 }
0x12ff   :  { %v7403_v20 = vpop.f32.mrf.mxu1 }
0x1300   :  { %10275 = vmatmul.mubr.msk.f32.vlgmr.msra.gmra.mxu0 %vm603_vm2, %v7403_v20 }
0x1301   :  { %v10239_v22 = vpop.f32.mrf.mxu1 }
0x1303   :  { %v7476_v61 = vpop.f32.mrf.mxu0 }
0x1304   :  { %10277 = vmatprep.mubr.msk.f32.mxu0 %vm603_vm2, %v7476_v61 }
0x1305   :  { %v10244_v11 = vpop.f32.mrf.mxu0 }
0x1307   :  { %v7622_v41 = vpop.f32.mrf.mxu0 }
0x1308   :  { %v7549_v14 = vpop.f32.mrf.mxu1 }
0x1309   :  { %10278 = vmatmul.mubr.msk.f32.gmra.mxu0 %vm603_vm2, %v7549_v14  ;;  %v10254_v59 = vpop.f32.mrf.mxu0 }
0x130a   :  { %v10249_v30 = vpop.f32.mrf.mxu1  ;;  %10280 = vmatprep.mubr.msk.f32.mxu0 %vm603_vm2, %v7622_v41 }
0x130b   :  { %v7768_v35 = vpop.f32.mrf.mxu0 }
0x130c   :  { %v7695_v9 = vpop.f32.mrf.mxu1 }
0x130d   :  { %10281 = vmatmul.mubr.msk.f32.gmra.mxu0 %vm603_vm2, %v7695_v9  ;;  %v10264_v54 = vpop.f32.mrf.mxu0 }
0x130e   :  { %v10259_v32 = vpop.f32.mrf.mxu1  ;;  %10283 = vmatprep.mubr.msk.f32.mxu0 %vm603_vm2, %v7768_v35 }
0x1310   :  { %v7841_v33 = vpop.f32.mrf.mxu1 }
0x1311   :  { %10284 = vmatmul.mubr.msk.f32.gmra.mxu0 %vm603_vm2, %v7841_v33 }
0x1312   :  { %v10269_v36 = vpop.f32.mrf.mxu1 }
0x1314   :  { %v10292_v6 = vpop.f32.mrf.mxu1 }
0x1316   :  { %v8067_v58 = vpop.f32.mrf.mxu1 }
0x1318   :  { %v10295_v37 = vpop.f32.mrf.mxu1 }
0x131a   :  { %v8077_v29 = vpop.f32.mrf.mxu1 }
0x131c   :  { %v10298_v55 = vpop.f32.mrf.mxu1 }
0x131e   :  { %v8087_v0 = vpop.f32.mrf.mxu1 }
0x1320   :  { %v10301_v23 = vpop.f32.mrf.mxu1 }
0x1322   :  { %v8097_v40 = vpop.f32.mrf.mxu1 }
0x13c0   :  { %v10276_v49 = vpop.f32.mrf.mxu0 }
0x13c1   :  { %v8073_v27 = vadd.f32 %v10292_v6, %v10276_v49 }
0x13c2   :  { %v7938_v24 = vpop.f32.mrf.mxu0 }
0x13c3   :  { %v8115_v39 = vadd.f32 %v9212_v42, %v8073_v27  ;;  %v8068_v51 = vadd.f32 %v8067_v58, %v7938_v24 }
0x13c5   :  { %v8114_v46 = vadd.f32 %v9212_v42, %v8068_v51  ;;  %v8123_v1 = vadd.f32 %v8115_v39, %v11693_v10 }
0x13c7   :  { %v8137_v28 = vsel %vm89_vm0, %v8123_v1, 0.0  ;;  %v8122_v7 = vadd.f32 %v8114_v46, %v11691_v60 }
0x13c8   :  { %8138 = vadd.xlane.f32.xlu1 %v8137_v28 }
0x13c9   :  { %v10279_v12 = vpop.f32.mrf.mxu0  ;;  %v8134_v50 = vsel %vm89_vm0, %v8122_v7, 0.0 }
0x13ca   :  { %v8083_v16 = vadd.f32 %v10295_v37, %v10279_v12  ;;  %8135 = vadd.xlane.f32.xlu0 %v8134_v50 }
0x13cb   :  { %v7948_v25 = vpop.f32.mrf.mxu0 }
0x13cc   :  { %v8117_v38 = vadd.f32 %v9212_v42, %v8083_v16  ;;  %v8078_v53 = vadd.f32 %v8077_v29, %v7948_v25 }
0x13cd   :  { %v10282_v2 = vpop.f32.mrf.mxu0 }
0x13ce   :  { %v8116_v47 = vadd.f32 %v9212_v42, %v8078_v53  ;;  %v8093_v5 = vadd.f32 %v10298_v55, %v10282_v2  ;;  %v8125_v10 = vadd.f32 %v8117_v38, %v11718_v19 }
0x13cf   :  { %v7958_v44 = vpop.f32.mrf.mxu0 }
0x13d0   :  { %v8119_v15 = vadd.f32 %v9212_v42, %v8093_v5  ;;  %v8088_v56 = vadd.f32 %v8087_v0, %v7958_v44  ;;  %v8143_v60 = vsel %vm89_vm0, %v8125_v10, 0.0  ;;  %v8124_v13 = vadd.f32 %v8116_v47, %v11715_v18  ;;  %v9219_v44 = vld [vmem:[%s12540_s14 + $0x30] sm:$0xff] }
0x13d1   :  { %v10285_v43 = vpop.f32.mrf.mxu0  ;;  %8144 = vadd.xlane.f32.xlu1 %v8143_v60 }
0x13d2   :  { %v8118_v8 = vadd.f32 %v9212_v42, %v8088_v56  ;;  %v8103_v21 = vadd.f32 %v10301_v23, %v10285_v43  ;;  %v8140_v3 = vsel %vm89_vm0, %v8124_v13, 0.0  ;;  %v8127_v31 = vadd.f32 %v8119_v15, %v11733_v4  ;;  %v9220_v23 = vld [vmem:[%s12540_s14 + $0x38] sm:$0xff]  ;;  %v9218_v15 = vld [vmem:[%s12540_s14 + $0x28] sm:$0xff]  ;;  %v9217_v56 = vld [vmem:[%s12540_s14 + $0x20] sm:$0xff] }
0x13d3   :  { %v7968_v26 = vpop.f32.mrf.mxu0  ;;  %8141 = vadd.xlane.f32.xlu0 %v8140_v3  ;;  %10302 = vmatprep.subr.mxu0 %v9220_v23 }
0x13d4   :  { %v8121_v19 = vadd.f32 %v9212_v42, %v8103_v21  ;;  %v8098_v63 = vadd.f32 %v8097_v40, %v7968_v26  ;;  %v8149_v48 = vsel %vm89_vm0, %v8127_v31, 0.0  ;;  %v8126_v17 = vadd.f32 %v8118_v8, %v11729_v57  ;;  %10303 = vmatpush3.msra.mxu0 %v9220_v23  ;;  %v9237_v23 = vld [vmem:[%s12543_s16 + $0x70] sm:$0xff] }
0x13d5   :  { %8150 = vadd.xlane.f32.xlu1 %v8149_v48  ;;  %10304 = vmatprep.subr.mxu0 %v9219_v44 }
0x13d6   :  { %v8120_v34 = vadd.f32 %v9212_v42, %v8098_v63  ;;  %v8146_v18 = vsel %vm89_vm0, %v8126_v17, 0.0  ;;  %v8129_v20 = vadd.f32 %v8121_v19, %v11745_v52  ;;  %10305 = vmatpush3.msra.mxu0 %v9219_v44  ;;  %v9236_v44 = vld [vmem:[%s12543_s16 + $0x68] sm:$0xff] }
0x13d7   :  { %8147 = vadd.xlane.f32.xlu0 %v8146_v18  ;;  %10306 = vmatprep.subr.mxu0 %v9218_v15 }
0x13d8   :  { %v8155_v22 = vsel %vm89_vm0, %v8129_v20, 0.0  ;;  %v8128_v4 = vadd.f32 %v8120_v34, %v11743_v45  ;;  %10307 = vmatpush3.msra.mxu0 %v9218_v15  ;;  %v9235_v15 = vld [vmem:[%s12543_s16 + $0x60] sm:$0xff] }
0x13d9   :  { %8156 = vadd.xlane.f32.xlu1 %v8155_v22  ;;  %10308 = vmatprep.subr.mxu0 %v9217_v56 }
0x13da   :  { %v8152_v61 = vsel %vm89_vm0, %v8128_v4, 0.0  ;;  %10309 = vmatpush3.msra.mxu0 %v9217_v56  ;;  %v9234_v56 = vld [vmem:[%s12543_s16 + $0x58] sm:$0xff] }
0x13db   :  { %8153 = vadd.xlane.f32.xlu0 %v8152_v61  ;;  %10350 = vmatprep.subr.mxu0 %v10613_v62 }
0x1451   :  { %v8139_v11 = vpop.xlane.xlu1 %8138 }
0x1452   :  { %v8159_v41 = vmul.f32 0.03125, %v8139_v11 }
0x1453   :  { %v8136_v14 = vpop.xlane.xlu0 %8135 }
0x1454   :  { %v12254_v59 = vsub.f32 %v8123_v1, %v8159_v41  ;;  %v8158_v57 = vmul.f32 0.03125, %v8136_v14  ;;  %v9215_v14 = vld [vmem:[%s12541_s12 + $0x1] ss:$0 sm:$0xff] }
0x1456   :  { %v12256_v30 = vsub.f32 %v8122_v7, %v8158_v57  ;;  %v8175_v52 = vmul.f32 %v12254_v59, %v12254_v59 }
0x1458   :  { %v8185_v35 = vsel %vm89_vm0, %v8175_v52, 0.0  ;;  %v8174_v45 = vmul.f32 %v12256_v30, %v12256_v30 }
0x1459   :  { %8186 = vadd.xlane.f32.xlu1 %v8185_v35 }
0x145a   :  { %v8145_v9 = vpop.xlane.xlu1 %8144  ;;  %v8182_v54 = vsel %vm89_vm0, %v8174_v45, 0.0 }
0x145b   :  { %v8161_v32 = vmul.f32 0.03125, %v8145_v9  ;;  %8183 = vadd.xlane.f32.xlu0 %v8182_v54 }
0x145c   :  { %v8142_v33 = vpop.xlane.xlu0 %8141 }
0x145d   :  { %v12264_v36 = vsub.f32 %v8125_v10, %v8161_v32  ;;  %v8160_v6 = vmul.f32 0.03125, %v8142_v33 }
0x145e   :  { %v8151_v58 = vpop.xlane.xlu1 %8150 }
0x145f   :  { %v12266_v37 = vsub.f32 %v8124_v13, %v8160_v6  ;;  %v8163_v49 = vmul.f32 0.03125, %v8151_v58  ;;  %v8177_v42 = vmul.f32 %v12264_v36, %v12264_v36  ;;  %v9216_v6 = vld [vmem:[%s12542_s13 + $0x1] ss:$0 sm:$0xff] }
0x1460   :  { %v8148_v27 = vpop.xlane.xlu0 %8147 }
0x1461   :  { %v12270_v24 = vsub.f32 %v8127_v31, %v8163_v49  ;;  %v8162_v29 = vmul.f32 0.03125, %v8148_v27  ;;  %v8191_v39 = vsel %vm89_vm0, %v8177_v42, 0.0  ;;  %v8176_v51 = vmul.f32 %v12266_v37, %v12266_v37 }
0x1462   :  { %8192 = vadd.xlane.f32.xlu1 %v8191_v39  ;;  %v8157_v46 = vpop.xlane.xlu1 %8156 }
0x1463   :  { %v12275_v1 = vsub.f32 %v8126_v17, %v8162_v29  ;;  %v8165_v55 = vmul.f32 0.03125, %v8157_v46  ;;  %v8188_v28 = vsel %vm89_vm0, %v8176_v51, 0.0  ;;  %v8179_v7 = vmul.f32 %v12270_v24, %v12270_v24 }
0x1464   :  { %8189 = vadd.xlane.f32.xlu0 %v8188_v28  ;;  %v8154_v12 = vpop.xlane.xlu0 %8153 }
0x1465   :  { %v12280_v50 = vsub.f32 %v8129_v20, %v8165_v55  ;;  %v8164_v16 = vmul.f32 0.03125, %v8154_v12  ;;  %v8197_v0 = vsel %vm89_vm0, %v8179_v7, 0.0  ;;  %v8178_v25 = vmul.f32 %v12275_v1, %v12275_v1 }
0x1466   :  { %8198 = vadd.xlane.f32.xlu1 %v8197_v0 }
0x1467   :  { %v12285_v38 = vsub.f32 %v8128_v4, %v8164_v16  ;;  %v8194_v53 = vsel %vm89_vm0, %v8178_v25, 0.0  ;;  %v8181_v2 = vmul.f32 %v12280_v50, %v12280_v50 }
0x1468   :  { %8195 = vadd.xlane.f32.xlu0 %v8194_v53 }
0x1469   :  { %v8203_v47 = vsel %vm89_vm0, %v8181_v2, 0.0  ;;  %v8180_v5 = vmul.f32 %v12285_v38, %v12285_v38 }
0x146a   :  { %8204 = vadd.xlane.f32.xlu1 %v8203_v47 }
0x146b   :  { %v8200_v10 = vsel %vm89_vm0, %v8180_v5, 0.0 }
0x146c   :  { %8201 = vadd.xlane.f32.xlu0 %v8200_v10 }
0x14e2   :  { %v8187_v60 = vpop.xlane.xlu1 %8186 }
0x14e3   :  { %v8207_v13 = vmul.f32 0.03125, %v8187_v60  ;;  %v9233_v60 = vld [vmem:[%s12543_s16 + $0x50] sm:$0xff] }
0x14e4   :  { %v8184_v43 = vpop.xlane.xlu0 %8183 }
0x14e5   :  { %v8215_v8 = vadd.f32 1e-12, %v8207_v13  ;;  %v8206_v21 = vmul.f32 0.03125, %v8184_v43  ;;  %v9232_v13 = vld [vmem:[%s12543_s16 + $0x48] sm:$0xff]  ;;  %v9231_v43 = vld [vmem:[%s12543_s16 + $0x40] sm:$0xff] }
0x14e7   :  { %10555 = vrsqrt.f32 %v8215_v8  ;;  %v8214_v3 = vadd.f32 1e-12, %v8206_v21  ;;  %v9222_v8 = vld [vmem:[%s12544_s15 + $0x1] ss:$0 sm:$0xff] }
0x14e9   :  { %10557 = vrsqrt.f32 %v8214_v3 }
0x14eb   :  { %v8193_v31 = vpop.xlane.xlu1 %8192 }
0x14ec   :  { %v8209_v40 = vmul.f32 0.03125, %v8193_v31 }
0x14ed   :  { %v8190_v26 = vpop.xlane.xlu0 %8189 }
0x14ee   :  { %v8217_v19 = vadd.f32 1e-12, %v8209_v40  ;;  %v8208_v63 = vmul.f32 0.03125, %v8190_v26 }
0x14ef   :  { %v8199_v48 = vpop.xlane.xlu1 %8198 }
0x14f0   :  { %10559 = vrsqrt.f32 %v8217_v19  ;;  %v8216_v17 = vadd.f32 1e-12, %v8208_v63  ;;  %v8211_v34 = vmul.f32 0.03125, %v8199_v48 }
0x14f1   :  { %v8196_v18 = vpop.xlane.xlu0 %8195 }
0x14f2   :  { %10561 = vrsqrt.f32 %v8216_v17  ;;  %v8219_v20 = vadd.f32 1e-12, %v8211_v34  ;;  %v8210_v22 = vmul.f32 0.03125, %v8196_v18 }
0x14f3   :  { %v8205_v4 = vpop.xlane.xlu1 %8204 }
0x14f4   :  { %v10556_v61 = vpop.eup %10555  ;;  %10563 = vrsqrt.f32 %v8219_v20  ;;  %v8218_v11 = vadd.f32 1e-12, %v8210_v22  ;;  %v8213_v41 = vmul.f32 0.03125, %v8205_v4 }
0x14f5   :  { %v8231_v57 = vmul.f32 %v10556_v61, %v12254_v59  ;;  %v8202_v52 = vpop.xlane.xlu0 %8201 }
0x14f6   :  { %v10558_v35 = vpop.eup %10557  ;;  %10565 = vrsqrt.f32 %v8218_v11  ;;  %v8221_v45 = vadd.f32 1e-12, %v8213_v41  ;;  %v8212_v9 = vmul.f32 0.03125, %v8202_v52 }
0x14f7   :  { %v8230_v54 = vmul.f32 %v10558_v35, %v12256_v30  ;;  %v8245_v32 = vmul.f32 %v9215_v14, %v8231_v57 }
0x14f8   :  { %10567 = vrsqrt.f32 %v8221_v45  ;;  %v8220_v33 = vadd.f32 1e-12, %v8212_v9 }
0x14f9   :  { %v8244_v58 = vmul.f32 %v9215_v14, %v8230_v54  ;;  %v12317_v42 = vadd.f32 %v9216_v6, %v8245_v32 }
0x14fa   :  { %10569 = vrsqrt.f32 %v8220_v33 }
0x14fb   :  { %v12315_v49 = vadd.f32 %v9216_v6, %v8244_v58 }
0x14fd   :  { %v10560_v59 = vpop.eup %10559  ;;  %10310 = vmatprep.mubr.msk.f32.mxu0 %vm89_vm0, %v12315_v49 }
0x14fe   :  { %v8233_v27 = vmul.f32 %v10560_v59, %v12264_v36  ;;  %10311 = vmatmul.mubr.msk.f32.vlgmr.msra.gmra.mxu0 %vm89_vm0, %v12317_v42 }
0x14ff   :  { %v10562_v30 = vpop.eup %10561 }
0x1500   :  { %v8232_v29 = vmul.f32 %v10562_v30, %v12266_v37  ;;  %v8247_v51 = vmul.f32 %v9215_v14, %v8233_v27 }
0x1501   :  { %v10564_v39 = vpop.eup %10563 }
0x1502   :  { %v8235_v46 = vmul.f32 %v10564_v39, %v12270_v24  ;;  %v8246_v55 = vmul.f32 %v9215_v14, %v8232_v29  ;;  %v12329_v0 = vadd.f32 %v9216_v6, %v8247_v51 }
0x1503   :  { %v10566_v28 = vpop.eup %10565 }
0x1504   :  { %v12326_v7 = vadd.f32 %v9216_v6, %v8246_v55  ;;  %v8234_v12 = vmul.f32 %v10566_v28, %v12275_v1  ;;  %v8249_v36 = vmul.f32 %v9215_v14, %v8235_v46 }
0x1505   :  { %v10568_v16 = vpop.eup %10567 }
0x1506   :  { %v8237_v25 = vmul.f32 %v10568_v16, %v12280_v50  ;;  %10313 = vmatprep.mubr.msk.f32.mxu0 %vm89_vm0, %v12326_v7  ;;  %v8248_v37 = vmul.f32 %v9215_v14, %v8234_v12  ;;  %v12339_v47 = vadd.f32 %v9216_v6, %v8249_v36 }
0x1507   :  { %v10570_v53 = vpop.eup %10569  ;;  %10314 = vmatmul.mubr.msk.f32.gmra.mxu0 %vm89_vm0, %v12329_v0 }
0x1508   :  { %v12336_v24 = vadd.f32 %v9216_v6, %v8248_v37  ;;  %v8236_v2 = vmul.f32 %v10570_v53, %v12285_v38  ;;  %v8251_v1 = vmul.f32 %v9215_v14, %v8237_v25  ;;  %v9238_v38 = vld [vmem:[%s12543_s16 + $0x78] sm:$0xff] }
0x1509   :  { %10322 = vmatprep.subr.mxu1 %v9238_v38 }
0x150a   :  { %10316 = vmatprep.mubr.msk.f32.mxu0 %vm89_vm0, %v12336_v24  ;;  %v8250_v5 = vmul.f32 %v9215_v14, %v8236_v2  ;;  %v12347_v10 = vadd.f32 %v9216_v6, %v8251_v1  ;;  %10323 = vmatpush3.msra.mxu1 %v9238_v38 }
0x150b   :  { %10317 = vmatmul.mubr.msk.f32.gmra.mxu0 %vm89_vm0, %v12339_v47  ;;  %10324 = vmatprep.subr.mxu1 %v9237_v23 }
0x150c   :  { %v12345_v50 = vadd.f32 %v9216_v6, %v8250_v5  ;;  %10325 = vmatpush3.msra.mxu1 %v9237_v23 }
0x150d   :  { %10326 = vmatprep.subr.mxu1 %v9236_v44 }
0x150e   :  { %10319 = vmatprep.mubr.msk.f32.mxu0 %vm89_vm0, %v12345_v50  ;;  %10327 = vmatpush3.msra.mxu1 %v9236_v44 }
0x150f   :  { %10320 = vmatmul.mubr.msk.f32.gmra.mxu0 %vm89_vm0, %v12347_v10  ;;  %10328 = vmatprep.subr.mxu1 %v9235_v15 }
0x1510   :  { %10358 = vmatprep.mubr.msk.f32.mxu0 %vm10614_vm1, %v10613_v62  ;;  %10329 = vmatpush3.msra.mxu1 %v9235_v15 }
0x1511   :  { %10330 = vmatprep.subr.mxu1 %v9234_v56 }
0x1512   :  { %10331 = vmatpush3.msra.mxu1 %v9234_v56 }
0x1513   :  { %10332 = vmatprep.subr.mxu1 %v9233_v60 }
0x1514   :  { %10333 = vmatpush3.msra.mxu1 %v9233_v60 }
0x1515   :  { %10334 = vmatprep.subr.mxu1 %v9232_v13 }
0x1516   :  { %10335 = vmatpush3.msra.mxu1 %v9232_v13 }
0x1517   :  { %10336 = vmatprep.subr.mxu1 %v9231_v43 }
0x1518   :  { %10337 = vmatpush3.msra.mxu1 %v9231_v43 }
0x15be   :  { %v10312_v21 = vpop.f32.mrf.mxu0 }
0x15bf   :  { %v12382_v3 = vadd.f32 %v10312_v21, %v9222_v8 }
0x15c0   :  { %v8369_v31 = vpop.f32.mrf.mxu0 }
0x15c1   :  { %v8417_v40 = vmul.f32 0.044715, %v12382_v3  ;;  %v8370_v26 = vadd.f32 %v9222_v8, %v8369_v31 }
0x15c3   :  { %v8425_v19 = vmul.f32 %v8417_v40, %v12382_v3  ;;  %v8416_v63 = vmul.f32 0.044715, %v8370_v26 }
0x15c5   :  { %v8433_v48 = vmul.f32 %v8425_v19, %v12382_v3  ;;  %v8424_v17 = vmul.f32 %v8416_v63, %v8370_v26  ;;  %v8408_v19 = vmul.f32 0.5, %v8370_v26 }
0x15c7   :  { %v8441_v34 = vadd.f32 %v8433_v48, %v12382_v3  ;;  %v8432_v18 = vmul.f32 %v8424_v17, %v8370_v26  ;;  %v10315_v20 = vpop.f32.mrf.mxu0  ;;  %v8409_v48 = vmul.f32 0.5, %v12382_v3 }
0x15c8   :  { %v12388_v22 = vadd.f32 %v10315_v20, %v9222_v8 }
0x15c9   :  { %v8449_v4 = vmul.f32 0.7978846, %v8441_v34  ;;  %v8440_v61 = vadd.f32 %v8432_v18, %v8370_v26  ;;  %v8379_v11 = vpop.f32.mrf.mxu0 }
0x15ca   :  { %v8419_v41 = vmul.f32 0.044715, %v12388_v22  ;;  %v8380_v14 = vadd.f32 %v9222_v8, %v8379_v11  ;;  %v8411_v26 = vmul.f32 0.5, %v12388_v22 }
0x15cb   :  { %10571 = vtanh.f32 %v8449_v4  ;;  %v10318_v57 = vpop.f32.mrf.mxu0  ;;  %v8448_v52 = vmul.f32 0.7978846, %v8440_v61 }
0x15cc   :  { %v8427_v35 = vmul.f32 %v8419_v41, %v12388_v22  ;;  %v8418_v45 = vmul.f32 0.044715, %v8380_v14  ;;  %v12392_v9 = vadd.f32 %v10318_v57, %v9222_v8  ;;  %v8410_v11 = vmul.f32 0.5, %v8380_v14 }
0x15cd   :  { %v8389_v54 = vpop.f32.mrf.mxu0  ;;  %10573 = vtanh.f32 %v8448_v52 }
0x15ce   :  { %v8435_v32 = vmul.f32 %v8427_v35, %v12388_v22  ;;  %v8426_v33 = vmul.f32 %v8418_v45, %v8380_v14  ;;  %v8421_v6 = vmul.f32 0.044715, %v12392_v9  ;;  %v8390_v58 = vadd.f32 %v9222_v8, %v8389_v54 }
0x15cf   :  { %v10321_v59 = vpop.f32.mrf.mxu0 }
0x15d0   :  { %v8443_v27 = vadd.f32 %v8435_v32, %v12388_v22  ;;  %v8434_v30 = vmul.f32 %v8426_v33, %v8380_v14  ;;  %v8429_v29 = vmul.f32 %v8421_v6, %v12392_v9  ;;  %v12398_v39 = vadd.f32 %v10321_v59, %v9222_v8 }
0x15d1   :  { %v8420_v51 = vmul.f32 0.044715, %v8390_v58  ;;  %v8399_v46 = vpop.f32.mrf.mxu0  ;;  %v8412_v32 = vmul.f32 0.5, %v8390_v58  ;;  %v8413_v6 = vmul.f32 0.5, %v12392_v9 }
0x15d2   :  { %v8451_v55 = vmul.f32 0.7978846, %v8443_v27  ;;  %v8442_v28 = vadd.f32 %v8434_v30, %v8380_v14  ;;  %v8437_v12 = vmul.f32 %v8429_v29, %v12392_v9  ;;  %v8423_v36 = vmul.f32 0.044715, %v12398_v39 }
0x15d3   :  { %v8428_v16 = vmul.f32 %v8420_v51, %v8390_v58  ;;  %v8400_v25 = vadd.f32 %v9222_v8, %v8399_v46  ;;  %v8415_v51 = vmul.f32 0.5, %v12398_v39 }
0x15d4   :  { %10575 = vtanh.f32 %v8451_v55  ;;  %v8445_v37 = vadd.f32 %v8437_v12, %v12392_v9  ;;  %v8450_v53 = vmul.f32 0.7978846, %v8442_v28  ;;  %v8431_v1 = vmul.f32 %v8423_v36, %v12398_v39  ;;  %v9240_v9 = vld [vmem:[%s12545_s17 + $0x1] ss:$0 sm:$0xff] }
0x15d5   :  { %v8436_v2 = vmul.f32 %v8428_v16, %v8390_v58  ;;  %v8422_v5 = vmul.f32 0.044715, %v8400_v25  ;;  %v8414_v30 = vmul.f32 0.5, %v8400_v25 }
0x15d6   :  { %v8453_v38 = vmul.f32 0.7978846, %v8445_v37  ;;  %10577 = vtanh.f32 %v8450_v53  ;;  %v8439_v44 = vmul.f32 %v8431_v1, %v12398_v39 }
0x15d7   :  { %v8444_v23 = vadd.f32 %v8436_v2, %v8390_v58  ;;  %v8430_v15 = vmul.f32 %v8422_v5, %v8400_v25 }
0x15d8   :  { %v10572_v56 = vpop.eup %10571  ;;  %10579 = vtanh.f32 %v8453_v38  ;;  %v8447_v60 = vadd.f32 %v8439_v44, %v12398_v39 }
0x15d9   :  { %v8438_v13 = vmul.f32 %v8430_v15, %v8400_v25  ;;  %v8452_v43 = vmul.f32 0.7978846, %v8444_v23  ;;  %v8465_v21 = vadd.f32 1.0, %v10572_v56 }
0x15da   :  { %v10574_v8 = vpop.eup %10573  ;;  %v8455_v31 = vmul.f32 0.7978846, %v8447_v60 }
0x15db   :  { %v8446_v40 = vadd.f32 %v8438_v13, %v8400_v25  ;;  %v8464_v63 = vadd.f32 1.0, %v10574_v8  ;;  %10581 = vtanh.f32 %v8452_v43  ;;  %v8473_v18 = vmul.f32 %v8465_v21, %v8409_v48 }
0x15dc   :  { %10583 = vtanh.f32 %v8455_v31 }
0x15dd   :  { %v8472_v17 = vmul.f32 %v8464_v63, %v8408_v19  ;;  %v8454_v34 = vmul.f32 0.7978846, %v8446_v40 }
0x15df   :  { %10338 = vmatprep.mubr.msk.f32.mxu1 %vm4246_vm4, %v8472_v17  ;;  %10585 = vtanh.f32 %v8454_v34 }
0x15e0   :  { %10339 = vmatmul.mubr.msk.f32.vlgmr.msra.gmra.mxu1 %vm4246_vm4, %v8473_v18 }
0x15e1   :  { %v10576_v20 = vpop.eup %10575 }
0x15e2   :  { %v8467_v61 = vadd.f32 1.0, %v10576_v20 }
0x15e3   :  { %v10578_v4 = vpop.eup %10577 }
0x15e4   :  { %v8466_v41 = vadd.f32 1.0, %v10578_v4  ;;  %v8475_v3 = vmul.f32 %v8467_v61, %v8411_v26 }
0x15e5   :  { %v10580_v57 = vpop.eup %10579 }
0x15e6   :  { %v8474_v52 = vmul.f32 %v8466_v41, %v8410_v11  ;;  %v8469_v45 = vadd.f32 1.0, %v10580_v57 }
0x15e8   :  { %10341 = vmatprep.mubr.msk.f32.mxu1 %vm4246_vm4, %v8474_v52  ;;  %v10582_v35 = vpop.eup %10581  ;;  %v8477_v14 = vmul.f32 %v8469_v45, %v8413_v6 }
0x15e9   :  { %10342 = vmatmul.mubr.msk.f32.gmra.mxu1 %vm4246_vm4, %v8475_v3  ;;  %v10584_v54 = vpop.eup %10583  ;;  %v8468_v33 = vadd.f32 1.0, %v10582_v35 }
0x15ea   :  { %v8471_v22 = vadd.f32 1.0, %v10584_v54 }
0x15eb   :  { %v8476_v27 = vmul.f32 %v8468_v33, %v8412_v32 }
0x15ec   :  { %v10586_v59 = vpop.eup %10585  ;;  %v8479_v55 = vmul.f32 %v8471_v22, %v8415_v51 }
0x15ed   :  { %v8470_v29 = vadd.f32 1.0, %v10586_v59  ;;  %10344 = vmatprep.mubr.msk.f32.mxu1 %vm4246_vm4, %v8476_v27 }
0x15ee   :  { %10345 = vmatmul.mubr.msk.f32.gmra.mxu1 %vm4246_vm4, %v8477_v14 }
0x15ef   :  { %v8478_v46 = vmul.f32 %v8470_v29, %v8414_v30 }
0x15f1   :  { %10347 = vmatprep.mubr.msk.f32.mxu1 %vm4246_vm4, %v8478_v46 }
0x15f2   :  { %10348 = vmatmul.mubr.msk.f32.gmra.mxu1 %vm4246_vm4, %v8479_v55 }
0x16a0   :  { %v10340_v58 = vpop.f32.mrf.mxu1 }
0x16a1   :  { %v8593_v28 = vadd.f32 %v10340_v58, %v9240_v9 }
0x16a2   :  { %v8587_v12 = vpop.f32.mrf.mxu1 }
0x16a3   :  { %v8627_v16 = vadd.f32 %v8593_v28, %v12317_v42  ;;  %v8588_v36 = vadd.f32 %v9240_v9, %v8587_v12 }
0x16a5   :  { %v8626_v39 = vadd.f32 %v8588_v36, %v12315_v49  ;;  %v8641_v25 = vsel %vm89_vm0, %v8627_v16, 0.0 }
0x16a6   :  { %8642 = vadd.xlane.f32.xlu1 %v8641_v25 }
0x16a7   :  { %v8638_v37 = vsel %vm89_vm0, %v8626_v39, 0.0 }
0x16a8   :  { %8639 = vadd.xlane.f32.xlu0 %v8638_v37 }
0x16a9   :  { %v10343_v53 = vpop.f32.mrf.mxu1 }
0x16aa   :  { %v8603_v2 = vadd.f32 %v10343_v53, %v9240_v9 }
0x16ab   :  { %v8597_v1 = vpop.f32.mrf.mxu1 }
0x16ac   :  { %v8629_v5 = vadd.f32 %v8603_v2, %v12329_v0  ;;  %v8598_v38 = vadd.f32 %v9240_v9, %v8597_v1  ;;  %v8784_v2 = vld [vmem:[%s12548_s20 + $0x18] sm:$0xff]  ;;  %v8783_v1 = vld [vmem:[%s12548_s20 + $0x10] sm:$0xff] }
0x16ad   :  { %10351 = vmatpush3.msra.mxu0 %v8784_v2 }
0x16ae   :  { %v8628_v23 = vadd.f32 %v8598_v38, %v12326_v7  ;;  %v8647_v44 = vsel %vm89_vm0, %v8629_v5, 0.0  ;;  %v10346_v42 = vpop.f32.mrf.mxu1  ;;  %10352 = vmatprep.subr.mxu0 %v10613_v62  ;;  %v8781_v38 = vld [vmem:[%s12548_s20] sm:$0xff] }
0x16af   :  { %8648 = vadd.xlane.f32.xlu1 %v8647_v44  ;;  %v8613_v15 = vadd.f32 %v10346_v42, %v9240_v9  ;;  %10353 = vmatpush3.msra.mxu0 %v8783_v1 }
0x16b0   :  { %v8644_v49 = vsel %vm89_vm0, %v8628_v23, 0.0  ;;  %v8607_v56 = vpop.f32.mrf.mxu1  ;;  %10354 = vmatprep.subr.mxu0 %v10613_v62 }
0x16b1   :  { %8645 = vadd.xlane.f32.xlu0 %v8644_v49  ;;  %v8631_v60 = vadd.f32 %v8613_v15, %v12339_v47  ;;  %v8608_v13 = vadd.f32 %v9240_v9, %v8607_v56 }
0x16b2   :  { %v10349_v43 = vpop.f32.mrf.mxu1 }
0x16b3   :  { %v8630_v8 = vadd.f32 %v8608_v13, %v12336_v24  ;;  %v8623_v21 = vadd.f32 %v10349_v43, %v9240_v9  ;;  %v8653_v0 = vsel %vm89_vm0, %v8631_v60, 0.0 }
0x16b4   :  { %8654 = vadd.xlane.f32.xlu1 %v8653_v0  ;;  %v8617_v7 = vpop.f32.mrf.mxu1 }
0x16b5   :  { %v8633_v31 = vadd.f32 %v8623_v21, %v12347_v10  ;;  %v8618_v40 = vadd.f32 %v9240_v9, %v8617_v7  ;;  %v8650_v19 = vsel %vm89_vm0, %v8630_v8, 0.0 }
0x16b6   :  { %8651 = vadd.xlane.f32.xlu0 %v8650_v19  ;;  %v9251_v19 = vld [vmem:[%s12546_s18 + $0x1] ss:$0 sm:$0xff] }
0x16b7   :  { %v8632_v63 = vadd.f32 %v8618_v40, %v12345_v50  ;;  %v8659_v48 = vsel %vm89_vm0, %v8633_v31, 0.0 }
0x16b8   :  { %8660 = vadd.xlane.f32.xlu1 %v8659_v48 }
0x16b9   :  { %v8656_v47 = vsel %vm89_vm0, %v8632_v63, 0.0 }
0x16ba   :  { %8657 = vadd.xlane.f32.xlu0 %v8656_v47 }
0x172f   :  { %v8643_v24 = vpop.xlane.xlu1 %8642 }
0x1730   :  { %v8663_v17 = vmul.f32 0.03125, %v8643_v24 }
0x1731   :  { %v8640_v34 = vpop.xlane.xlu0 %8639 }
0x1732   :  { %v12437_v18 = vsub.f32 %v8627_v16, %v8663_v17  ;;  %v8662_v20 = vmul.f32 0.03125, %v8640_v34  ;;  %v9252_v34 = vld [vmem:[%s12547_s19 + $0x1] ss:$0 sm:$0xff] }
0x1734   :  { %v12439_v4 = vsub.f32 %v8626_v39, %v8662_v20  ;;  %v8679_v10 = vmul.f32 %v12437_v18, %v12437_v18 }
0x1736   :  { %v8689_v61 = vsel %vm89_vm0, %v8679_v10, 0.0  ;;  %v8678_v50 = vmul.f32 %v12439_v4, %v12439_v4 }
0x1737   :  { %8690 = vadd.xlane.f32.xlu1 %v8689_v61 }
0x1738   :  { %v8649_v11 = vpop.xlane.xlu1 %8648  ;;  %v8686_v41 = vsel %vm89_vm0, %v8678_v50, 0.0 }
0x1739   :  { %v8665_v26 = vmul.f32 0.03125, %v8649_v11  ;;  %8687 = vadd.xlane.f32.xlu0 %v8686_v41 }
0x173a   :  { %v8646_v57 = vpop.xlane.xlu0 %8645 }
0x173b   :  { %v12447_v52 = vsub.f32 %v8629_v5, %v8665_v26  ;;  %v8664_v3 = vmul.f32 0.03125, %v8646_v57  ;;  %v8782_v5 = vld [vmem:[%s12548_s20 + $0x8] sm:$0xff] }
0x173c   :  { %10355 = vmatpush3.msra.mxu0 %v8782_v5 }
0x173d   :  { %v12449_v35 = vsub.f32 %v8628_v23, %v8664_v3  ;;  %v8681_v45 = vmul.f32 %v12447_v52, %v12447_v52  ;;  %v8655_v54 = vpop.xlane.xlu1 %8654  ;;  %10356 = vmatprep.subr.mxu0 %v10613_v62 }
0x173e   :  { %v8667_v32 = vmul.f32 0.03125, %v8655_v54  ;;  %10357 = vmatpush3.msra.mxu0 %v8781_v38 }
0x173f   :  { %v8695_v33 = vsel %vm89_vm0, %v8681_v45, 0.0  ;;  %v8680_v6 = vmul.f32 %v12449_v35, %v12449_v35  ;;  %v8652_v59 = vpop.xlane.xlu0 %8651 }
0x1740   :  { %8696 = vadd.xlane.f32.xlu1 %v8695_v33  ;;  %v12456_v27 = vsub.f32 %v8631_v60, %v8667_v32  ;;  %v8666_v14 = vmul.f32 0.03125, %v8652_v59 }
0x1741   :  { %v8692_v30 = vsel %vm89_vm0, %v8680_v6, 0.0  ;;  %v8661_v29 = vpop.xlane.xlu1 %8660 }
0x1742   :  { %8693 = vadd.xlane.f32.xlu0 %v8692_v30  ;;  %v12459_v22 = vsub.f32 %v8630_v8, %v8666_v14  ;;  %v8669_v51 = vmul.f32 0.03125, %v8661_v29  ;;  %v8683_v46 = vmul.f32 %v12456_v27, %v12456_v27 }
0x1743   :  { %v8658_v55 = vpop.xlane.xlu0 %8657 }
0x1744   :  { %v12463_v9 = vsub.f32 %v8633_v31, %v8669_v51  ;;  %v8668_v58 = vmul.f32 0.03125, %v8658_v55  ;;  %v8701_v28 = vsel %vm89_vm0, %v8683_v46, 0.0  ;;  %v8682_v12 = vmul.f32 %v12459_v22, %v12459_v22 }
0x1745   :  { %8702 = vadd.xlane.f32.xlu1 %v8701_v28 }
0x1746   :  { %v12468_v16 = vsub.f32 %v8632_v63, %v8668_v58  ;;  %v8698_v36 = vsel %vm89_vm0, %v8682_v12, 0.0  ;;  %v8685_v39 = vmul.f32 %v12463_v9, %v12463_v9 }
0x1747   :  { %8699 = vadd.xlane.f32.xlu0 %v8698_v36 }
0x1748   :  { %v8707_v25 = vsel %vm89_vm0, %v8685_v39, 0.0  ;;  %v8684_v37 = vmul.f32 %v12468_v16, %v12468_v16 }
0x1749   :  { %8708 = vadd.xlane.f32.xlu1 %v8707_v25 }
0x174a   :  { %v8704_v53 = vsel %vm89_vm0, %v8684_v37, 0.0 }
0x174b   :  { %8705 = vadd.xlane.f32.xlu0 %v8704_v53 }
0x17c0   :  { %v8691_v23 = vpop.xlane.xlu1 %8690 }
0x17c1   :  { %v8711_v44 = vmul.f32 0.03125, %v8691_v23 }
0x17c2   :  { %v8688_v42 = vpop.xlane.xlu0 %8687 }
0x17c3   :  { %v8719_v15 = vadd.f32 1e-12, %v8711_v44  ;;  %v8710_v49 = vmul.f32 0.03125, %v8688_v42  ;;  %v9255_v42 = vld [vmem:[%s12551_s22] ss:$0 sm:$0xff] }
0x17c5   :  { %10587 = vrsqrt.f32 %v8719_v15  ;;  %v8718_v56 = vadd.f32 1e-12, %v8710_v49 }
0x17c7   :  { %10589 = vrsqrt.f32 %v8718_v56 }
0x17c9   :  { %v8697_v60 = vpop.xlane.xlu1 %8696 }
0x17ca   :  { %v8713_v13 = vmul.f32 0.03125, %v8697_v60 }
0x17cb   :  { %v8694_v43 = vpop.xlane.xlu0 %8693 }
0x17cc   :  { %v8721_v8 = vadd.f32 1e-12, %v8713_v13  ;;  %v8712_v21 = vmul.f32 0.03125, %v8694_v43 }
0x17ce   :  { %10591 = vrsqrt.f32 %v8721_v8  ;;  %v8720_v0 = vadd.f32 1e-12, %v8712_v21  ;;  %v8703_v7 = vpop.xlane.xlu1 %8702 }
0x17cf   :  { %v8715_v31 = vmul.f32 0.03125, %v8703_v7 }
0x17d0   :  { %10593 = vrsqrt.f32 %v8720_v0  ;;  %v8700_v62 = vpop.xlane.xlu0 %8699 }
0x17d1   :  { %v8723_v63 = vadd.f32 1e-12, %v8715_v31  ;;  %v8714_v48 = vmul.f32 0.03125, %v8700_v62 }
0x17d2   :  { %v10588_v40 = vpop.eup %10587  ;;  %v8709_v24 = vpop.xlane.xlu1 %8708 }
0x17d3   :  { %v8735_v47 = vmul.f32 %v10588_v40, %v12437_v18  ;;  %10595 = vrsqrt.f32 %v8723_v63  ;;  %v8722_v20 = vadd.f32 1e-12, %v8714_v48  ;;  %v8717_v10 = vmul.f32 0.03125, %v8709_v24 }
0x17d4   :  { %v10590_v17 = vpop.eup %10589  ;;  %v8706_v11 = vpop.xlane.xlu0 %8705 }
0x17d5   :  { %v8749_v61 = vmul.f32 %v9251_v19, %v8735_v47  ;;  %v8734_v50 = vmul.f32 %v10590_v17, %v12439_v4  ;;  %10597 = vrsqrt.f32 %v8722_v20  ;;  %v8725_v41 = vadd.f32 1e-12, %v8717_v10 }
0x17d6   :  { %v8716_v26 = vmul.f32 0.03125, %v8706_v11 }
0x17d7   :  { %v8763_v57 = vadd.f32 %v9252_v34, %v8749_v61  ;;  %v8748_v3 = vmul.f32 %v9251_v19, %v8734_v50  ;;  %10599 = vrsqrt.f32 %v8725_v41 }
0x17d8   :  { %v8724_v18 = vadd.f32 1e-12, %v8716_v26 }
0x17d9   :  { %8771 = vst.msk [vmem:[#allocation2 + $0x8] sm:$0xff] %vm89_vm0, %v8763_v57  ;;  %v8762_v45 = vadd.f32 %v9252_v34, %v8748_v3 }
0x17da   :  { %10601 = vrsqrt.f32 %v8724_v18 }
0x17db   :  { %v10592_v54 = vpop.eup %10591  ;;  %8770 = vst.msk [vmem:[#allocation2] sm:$0xff] %vm89_vm0, %v8762_v45 }
0x17dc   :  { %v8737_v32 = vmul.f32 %v10592_v54, %v12447_v52 }
0x17dd   :  { %v10594_v33 = vpop.eup %10593 }
0x17de   :  { %v8751_v6 = vmul.f32 %v9251_v19, %v8737_v32  ;;  %v8736_v4 = vmul.f32 %v10594_v33, %v12449_v35 }
0x17e0   :  { %v8765_v59 = vadd.f32 %v9252_v34, %v8751_v6  ;;  %v8750_v14 = vmul.f32 %v9251_v19, %v8736_v4  ;;  %v10596_v30 = vpop.eup %10595 }
0x17e1   :  { %v8739_v51 = vmul.f32 %v10596_v30, %v12456_v27 }
0x17e2   :  { %8773 = vst.msk [vmem:[#allocation2 + $0x18] sm:$0xff] %vm89_vm0, %v8765_v59  ;;  %v8764_v29 = vadd.f32 %v9252_v34, %v8750_v14  ;;  %v10598_v46 = vpop.eup %10597 }
0x17e3   :  { %v8753_v55 = vmul.f32 %v9251_v19, %v8739_v51  ;;  %v8738_v58 = vmul.f32 %v10598_v46, %v12459_v22 }
0x17e4   :  { %8772 = vst.msk [vmem:[#allocation2 + $0x10] sm:$0xff] %vm89_vm0, %v8764_v29  ;;  %v10600_v28 = vpop.eup %10599 }
0x17e5   :  { %v8767_v52 = vadd.f32 %v9252_v34, %v8753_v55  ;;  %v8752_v12 = vmul.f32 %v9251_v19, %v8738_v58  ;;  %v8741_v36 = vmul.f32 %v10600_v28, %v12463_v9  ;;  %v29_v9 = vstv %s12549_s23 }
0x17e6   :  { %30 = vst [vmem:[#allocation3] sm:$0x1] %v29_v9 }
0x17e7   :  { %v10602_v35 = vpop.eup %10601  ;;  %8775 = vst.msk [vmem:[#allocation2 + $0x28] sm:$0xff] %vm89_vm0, %v8767_v52  ;;  %v8766_v39 = vadd.f32 %v9252_v34, %v8752_v12  ;;  %v8755_v25 = vmul.f32 %v9251_v19, %v8741_v36 }
0x17e8   :  { %v8740_v37 = vmul.f32 %v10602_v35, %v12468_v16  ;;  %v9253_v16 = vld [vmem:[%s12550_s21] ss:$0 sm:$0xff] }
0x17e9   :  { %8774 = vst.msk [vmem:[#allocation2 + $0x20] sm:$0xff] %vm89_vm0, %v8766_v39  ;;  %v8769_v27 = vadd.f32 %v9252_v34, %v8755_v25 }
0x17ea   :  { %v8754_v53 = vmul.f32 %v9251_v19, %v8740_v37 }
0x17eb   :  { %8777 = vst.msk [vmem:[#allocation2 + $0x38] sm:$0xff] %vm89_vm0, %v8769_v27  ;;  %v8778_v22 = vld [vmem:[#allocation2] ss:$8 sm:$0xf] }
0x17ec   :  { %v8768_v2 = vadd.f32 %v9252_v34, %v8754_v53 }
0x17ed   :  { %v9256_v60 = vld [vmem:[#allocation3] ss:$0 sm:$0xff] }
0x17ee   :  { %8776 = vst.msk [vmem:[#allocation2 + $0x30] sm:$0xff] %vm89_vm0, %v8768_v2 }
0x17f5   :  { %v8779_v1 = vld [vmem:[#allocation2] ss:$8 sm:$0xf0] }
0x17f6   :  { %v8780_v5 = vor.u32 %v8779_v1, %v8778_v22 }
0x17f8   :  { %10359 = vmatmul.mubr.msk.f32.vlgmr.msra.gmra.mxu0 %vm89_vm0, %v8780_v5 }
0x18b8   :  { %v8861_v38 = vpop.f32.mrf.mxu0 }
0x18b9   :  { %v8862_v23 = vadd.f32 %v9253_v16, %v8861_v38 }
0x18ba   :  { %v10360_v44 = vpop.f32.mrf.mxu0 }
0x18bb   :  { %10603 = vtanh.f32 %v8862_v23 }
0x18c8   :  { %v10604_v15 = vpop.eup %10603 }
0x18c9   :  { %v8873_v49 = vmul.f32 %v10604_v15, %v9255_v42 }
0x18cb   :  { %v8874_v56 = vsel %vm89_vm0, %v8873_v49, 0.0 }
0x18cc   :  { %8875 = vadd.xlane.f32.xlu0 %v8874_v56 }
0x1955   :  { %v8876_v13 = vpop.xlane.xlu0 %8875 }
0x1956   :  { %v8884_v43 = vadd.f32 %v9256_v60, %v8876_v13 }
0x1958   :  { %8886 = vst.msk [vmem:[%s12552_s24] sm:$0xff] %vm8885_vm5, %v8884_v43 }

</bundles_post_ra>
